<compile_context>
chip_gen: v7x
topology: tpu7x:2x2x1
jax: 0.10.0
libtpu: 0.0.40
codegen_flags: <defaults>
</compile_context>

<pallas_src>
import jax
import jax.numpy as jnp
from jax.experimental import pallas as pl
from jax.experimental.pallas import tpu as pltpu

# ---------------------------------------------------------------------------
# Model hyper-parameters (small shapes consistent with the module).
# ---------------------------------------------------------------------------
BATCH = 8
INPUT_SHAPE = 32
OUTPUT_SHAPE = 10
HIDDENS = (1024, 512, 256, 128, 64)
HIDDEN5_PAD = 128          # hidden-5 (64) padded to one full lane group
OUT_PAD = 128              # output (10) padded to one full lane group
BN_EPS = 1e-5
BIAS_PACK_W = max(HIDDENS)  # 1024: lane width of the packed bias operand


# ---------------------------------------------------------------------------
# Pallas kernel: fused matmul + bias + ReLU chain.  One grid axis over batch;
# weights/biases are VMEM-resident across batch tiles (block index fixed at 0).
# ---------------------------------------------------------------------------
def _perceptron_kernel(x_ref,
                       w1_ref, w2_ref, w3_ref, w4_ref, w5_ref, w6_ref,
                       b_ref, o_ref):
    def layer(h, w_ref, row, width):
        # bf16 x bf16 MXU matmul with f32 accumulation, bias add, ReLU.
        z = jnp.dot(h, w_ref[...], preferred_element_type=jnp.float32)
        z = z + b_ref[row:row + 1, :width]
        return jnp.maximum(z, 0.0).astype(jnp.bfloat16)

    h = x_ref[...]                        # already bf16 (cast once on host)
    h = layer(h, w1_ref, 0, HIDDENS[0])   # dropout1: identity in eval
    h = layer(h, w2_ref, 1, HIDDENS[1])   # dropout2: identity in eval
    h = layer(h, w3_ref, 2, HIDDENS[2])
    h = layer(h, w4_ref, 3, HIDDENS[3])
    h = layer(h, w5_ref, 4, HIDDEN5_PAD)  # padded lanes stay exactly 0
    out = jnp.dot(h, w6_ref[...], preferred_element_type=jnp.float32)
    out = out + b_ref[5:6, :OUT_PAD]
    o_ref[...] = out.astype(o_ref.dtype)  # bf16 writeback


# ---------------------------------------------------------------------------
# Wrapper.
# ---------------------------------------------------------------------------
def _round_up(n, m):
    return ((n + m - 1) // m) * m


def _tile_cap():
    """v5e saturates its 4x128^2 MXU with smaller tiles; cap there."""
    try:
        kind = jax.devices()[0].device_kind.lower()
        if "v5 lite" in kind or "v5e" in kind or "v5lite" in kind:
            return 512
    except Exception:
        pass
    return 1024


def _build_call(B_pad, tile_b, weight_shapes, bias_shape,
                single_buffer_invariants):
    """Construct the pallas_call for a given padded batch / tile size."""
    inv_kwargs = {}
    if single_buffer_invariants and hasattr(pl, "Buffered"):
        # Grid-invariant operands: no point double-buffering them.
        inv_kwargs = dict(pipeline_mode=pl.Buffered(1))

    weight_specs = [pl.BlockSpec(s, lambda i: (0, 0), **inv_kwargs)
                    for s in weight_shapes]
    bias_spec = pl.BlockSpec(bias_shape, lambda i: (0, 0), **inv_kwargs)
    in_specs = ([pl.BlockSpec((tile_b, INPUT_SHAPE), lambda i: (i, 0))]
                + weight_specs + [bias_spec])
    out_specs = pl.BlockSpec((tile_b, OUT_PAD), lambda i: (i, 0))

    fan_pairs = ((INPUT_SHAPE, HIDDENS[0]), (HIDDENS[0], HIDDENS[1]),
                 (HIDDENS[1], HIDDENS[2]), (HIDDENS[2], HIDDENS[3]),
                 (HIDDENS[3], HIDDEN5_PAD), (HIDDEN5_PAD, OUT_PAD))
    flops = 2 * B_pad * sum(a * b for a, b in fan_pairs)
    weight_bytes = sum(int(a) * int(b) for a, b in
                       ((s[0], s[1]) for s in weight_shapes)) * 2   # bf16
    bytes_accessed = (B_pad * INPUT_SHAPE * 2          # bf16 input
                      + weight_bytes
                      + int(bias_shape[0]) * int(bias_shape[1]) * 4
                      + B_pad * OUT_PAD * 2)           # bf16 output

    return pl.pallas_call(
        _perceptron_kernel,
        out_shape=jax.ShapeDtypeStruct((B_pad, OUT_PAD), jnp.bfloat16),
        grid=(B_pad // tile_b,),
        in_specs=in_specs,
        out_specs=out_specs,
        compiler_params=pltpu.CompilerParams(
            dimension_semantics=("parallel",),
            vmem_limit_bytes=32 << 20),
        cost_estimate=pl.CostEstimate(flops=flops, transcendentals=0,
                                      bytes_accessed=bytes_accessed),
    )


def perceptron_forward(x, folded, *, tile_b=None):
    """x: (B, INPUT_SHAPE) float.  folded: dict from fold_params().

    Returns (B, OUTPUT_SHAPE) bf16 logits.
    """
    B = x.shape[0]
    ws = folded["weights"]           # 6 bf16 weight matrices, (in, out) layout
    bias_pack = folded["bias_pack"]  # (6, 1024) f32, row i = padded bias i+1

    if tile_b is None:
        cap = _tile_cap()
        if B <= 256:
            # Small batch: one grid step; pad to >=16 rows (full bf16 sublane
            # tile).  At this size the kernel is launch/weight-DMA bound.
            # TODO(synk): persistent cross-call VMEM-resident weights would
            #             remove the dominant per-call weight DMA at B~8.
            tile_b = max(16, _round_up(B, 16))
        else:
            # >=2 grid steps so v7x's two TensorCores both get batch tiles.
            tile_b = min(cap, _round_up(-(-B // 2), 16))
    tile_b = max(16, _round_up(int(tile_b), 16))

    B_pad = _round_up(B, tile_b)
    x_bf16 = x.astype(jnp.bfloat16)          # cast once, outside the kernel
    if B_pad != B:
        x_bf16 = jnp.pad(x_bf16, ((0, B_pad - B), (0, 0)))

    weight_shapes = tuple(w.shape for w in ws)
    try:
        fn = _build_call(B_pad, tile_b, weight_shapes, bias_pack.shape, True)
        out = fn(x_bf16, *ws, bias_pack)
    except Exception:
        # Fallback: installed jax may not accept pipeline_mode=Buffered(1).
        fn = _build_call(B_pad, tile_b, weight_shapes, bias_pack.shape, False)
        out = fn(x_bf16, *ws, bias_pack)
    return out[:B, :OUTPUT_SHAPE]


# ---------------------------------------------------------------------------
# Deterministic parameter construction (synthetic, PyTorch-shaped) + folding.
# ---------------------------------------------------------------------------
def make_params(key):
    dims = (INPUT_SHAPE,) + HIDDENS + (OUTPUT_SHAPE,)
    raw = {}
    for i in range(6):
        fan_in, fan_out = dims[i], dims[i + 1]
        key, kw, kb = jax.random.split(key, 3)
        bound = 1.0 / jnp.sqrt(fan_in)
        # Stored transposed relative to PyTorch: (in, out) so `x @ W` works.
        raw[f"W{i + 1}"] = jax.random.uniform(
            kw, (fan_in, fan_out), jnp.float32, -bound, bound)
        raw[f"b{i + 1}"] = jax.random.uniform(
            kb, (1, fan_out), jnp.float32, -bound, bound)
    # BatchNorm1d parameters / running stats for layers 1..5.
    for i in range(1, 6):
        n = dims[i]
        key, kg, kb2, km, kv = jax.random.split(key, 5)
        raw[f"gamma{i}"] = 1.0 + 0.1 * jax.random.normal(kg, (1, n), jnp.float32)
        raw[f"beta{i}"] = 0.1 * jax.random.normal(kb2, (1, n), jnp.float32)
        raw[f"mean{i}"] = 0.1 * jax.random.normal(km, (1, n), jnp.float32)
        raw[f"var{i}"] = jnp.abs(jax.random.normal(kv, (1, n), jnp.float32)) + 0.5
    return raw


def fold_params(raw):
    """Fold eval-mode BN into the Linears, pad tail layers to 128 lanes,
    pack all biases into one operand, cast weights to bf16."""
    weights, biases = [], []
    for i in range(1, 6):
        scale = raw[f"gamma{i}"] / jnp.sqrt(raw[f"var{i}"] + BN_EPS)   # (1, n)
        shift = raw[f"beta{i}"] - raw[f"mean{i}"] * scale
        weights.append(raw[f"W{i}"] * scale)                           # fold W
        biases.append(raw[f"b{i}"] * scale + shift)                    # fold b
    weights.append(raw["W6"])
    biases.append(raw["b6"])

    # Zero-pad hidden-5 (64 -> 128) and the output (10 -> 128): exact.
    pad5 = HIDDEN5_PAD - HIDDENS[4]
    weights[4] = jnp.pad(weights[4], ((0, 0), (0, pad5)))
    biases[4] = jnp.pad(biases[4], ((0, 0), (0, pad5)))
    weights[5] = jnp.pad(weights[5], ((0, pad5), (0, OUT_PAD - OUTPUT_SHAPE)))
    biases[5] = jnp.pad(biases[5], ((0, 0), (0, OUT_PAD - OUTPUT_SHAPE)))

    bias_pack = jnp.zeros((6, BIAS_PACK_W), jnp.float32)
    for i, b in enumerate(biases):
        bias_pack = bias_pack.at[i, :b.shape[1]].set(b[0])

    return {"weights": [w.astype(jnp.bfloat16) for w in weights],
            "bias_pack": bias_pack}


# ---------------------------------------------------------------------------
# References for correctness checking.
# ---------------------------------------------------------------------------
def reference_forward_bf16(x, folded):
    """Mirrors the kernel math (bf16 weights/activations, f32 accumulation)."""
    ws, bp = folded["weights"], folded["bias_pack"]
    widths = (HIDDENS[0], HIDDENS[1], HIDDENS[2], HIDDENS[3], HIDDEN5_PAD)
    h = x.astype(jnp.bfloat16)
    for i in range(5):
        z = jnp.dot(h, ws[i], preferred_element_type=jnp.float32)
        z = z + bp[i:i + 1, :widths[i]]
        h = jnp.maximum(z, 0.0).astype(jnp.bfloat16)
    out = jnp.dot(h, ws[5], preferred_element_type=jnp.float32) + bp[5:6, :OUT_PAD]
    return out[:, :OUTPUT_SHAPE]


def reference_forward_f32(x, raw):
    """Un-folded f32 eval-mode reference (Linear -> BN(eval) -> ReLU chain)."""
    h = x
    for i in range(1, 6):
        h = h @ raw[f"W{i}"] + raw[f"b{i}"]
        scale = raw[f"gamma{i}"] / jnp.sqrt(raw[f"var{i}"] + BN_EPS)
        h = (h - raw[f"mean{i}"]) * scale + raw[f"beta{i}"]
        h = jnp.maximum(h, 0.0)
    return h @ raw["W6"] + raw["b6"]


if __name__ == "__main__":
    key = jax.random.PRNGKey(0)
    key, kx = jax.random.split(key)
    x = jax.random.normal(kx, (BATCH, INPUT_SHAPE), jnp.float32)

    raw = make_params(key)
    folded = fold_params(raw)

    out = jax.block_until_ready(perceptron_forward(x, folded))
    assert out.shape == (BATCH, OUTPUT_SHAPE), out.shape
    out_f32 = out.astype(jnp.float32)

    # Tight check against a reference that mirrors the kernel's bf16 math
    # (bf16 output quantization allows ~0.4% relative deviation).
    ref_bf16 = reference_forward_bf16(x, folded)
    assert jnp.allclose(out_f32, ref_bf16, atol=2e-2, rtol=2e-2), \
        "mismatch vs bf16 mirrored reference"

    # Looser check against the full-precision, un-folded eval-mode reference.
    ref_f32 = reference_forward_f32(x, raw)
    assert jnp.allclose(out_f32, ref_f32, atol=1e-1, rtol=1e-1), \
        "mismatch vs f32 reference"

    print("KERNEL_OK")
</pallas_src>

<mosaic_0001>
module attributes {stable_mosaic.version = 11 : i64} {
  func.func @_perceptron_kernel(%arg0: i32, %arg1: memref<16x32xbf16, #tpu.memory_space<vmem>>, %arg2: memref<32x1024xbf16, #tpu.memory_space<vmem>>, %arg3: memref<1024x512xbf16, #tpu.memory_space<vmem>>, %arg4: memref<512x256xbf16, #tpu.memory_space<vmem>>, %arg5: memref<256x128xbf16, #tpu.memory_space<vmem>>, %arg6: memref<128x128xbf16, #tpu.memory_space<vmem>>, %arg7: memref<128x128xbf16, #tpu.memory_space<vmem>>, %arg8: memref<6x1024xf32, #tpu.memory_space<vmem>>, %arg9: memref<16x128xbf16, #tpu.memory_space<vmem>>) attributes {dimension_semantics = [#tpu.dimension_semantics<parallel>], iteration_bounds = array<i64: 1>, scalar_prefetch = 0 : i64, scratch_operands = 0 : i64, tpu.core_type = #tpu.core_type<tc>, window_params = [{transform_indices = @transform_0, window_bounds = array<i64: 16, 32>}, {pipeline_mode = #tpu.pipeline_mode<synchronous>, transform_indices = @transform_1, window_bounds = array<i64: 32, 1024>}, {pipeline_mode = #tpu.pipeline_mode<synchronous>, transform_indices = @transform_2, window_bounds = array<i64: 1024, 512>}, {pipeline_mode = #tpu.pipeline_mode<synchronous>, transform_indices = @transform_3, window_bounds = array<i64: 512, 256>}, {pipeline_mode = #tpu.pipeline_mode<synchronous>, transform_indices = @transform_4, window_bounds = array<i64: 256, 128>}, {pipeline_mode = #tpu.pipeline_mode<synchronous>, transform_indices = @transform_5, window_bounds = array<i64: 128, 128>}, {pipeline_mode = #tpu.pipeline_mode<synchronous>, transform_indices = @transform_6, window_bounds = array<i64: 128, 128>}, {pipeline_mode = #tpu.pipeline_mode<synchronous>, transform_indices = @transform_7, window_bounds = array<i64: 6, 1024>}, {transform_indices = @transform_8, window_bounds = array<i64: 16, 128>}]} {
    %c0 = arith.constant 0 : index
    %c0_0 = arith.constant 0 : index
    %0 = vector.load %arg1[%c0, %c0_0] : memref<16x32xbf16, #tpu.memory_space<vmem>>, vector<16x32xbf16>
    %c0_1 = arith.constant 0 : index
    %c0_2 = arith.constant 0 : index
    %1 = vector.load %arg2[%c0_1, %c0_2] : memref<32x1024xbf16, #tpu.memory_space<vmem>>, vector<32x1024xbf16>
    %cst = arith.constant dense<0.000000e+00> : vector<16x1024xf32>
    %2 = tpu.matmul %0, %1, %cst {dimension_numbers = #tpu.dot_dimension_numbers<[1], [0], [0], [1], [0, 0, 1, 1], [], []>} : vector<16x32xbf16>, vector<32x1024xbf16>, vector<16x1024xf32> -> vector<16x1024xf32>
    %c0_3 = arith.constant 0 : index
    %c0_4 = arith.constant 0 : index
    %3 = vector.load %arg8[%c0_3, %c0_4] : memref<6x1024xf32, #tpu.memory_space<vmem>>, vector<1x1024xf32>
    %4 = vector.broadcast %3 : vector<1x1024xf32> to vector<16x1024xf32>
    %5 = arith.addf %2, %4 : vector<16x1024xf32>
    %cst_5 = arith.constant 0.000000e+00 : f32
    %6 = vector.broadcast %cst_5 : f32 to vector<16x1024xf32>
    %7 = arith.maximumf %5, %6 : vector<16x1024xf32>
    %8 = arith.truncf %7 : vector<16x1024xf32> to vector<16x1024xbf16>
    %c0_6 = arith.constant 0 : index
    %c0_7 = arith.constant 0 : index
    %9 = vector.load %arg3[%c0_6, %c0_7] : memref<1024x512xbf16, #tpu.memory_space<vmem>>, vector<1024x512xbf16>
    %cst_8 = arith.constant dense<0.000000e+00> : vector<16x512xf32>
    %10 = tpu.matmul %8, %9, %cst_8 {dimension_numbers = #tpu.dot_dimension_numbers<[1], [0], [0], [1], [0, 0, 1, 1], [], []>} : vector<16x1024xbf16>, vector<1024x512xbf16>, vector<16x512xf32> -> vector<16x512xf32>
    %c1 = arith.constant 1 : index
    %c0_9 = arith.constant 0 : index
    %11 = vector.load %arg8[%c1, %c0_9] : memref<6x1024xf32, #tpu.memory_space<vmem>>, vector<1x512xf32>
    %12 = vector.broadcast %11 : vector<1x512xf32> to vector<16x512xf32>
    %13 = arith.addf %10, %12 : vector<16x512xf32>
    %cst_10 = arith.constant 0.000000e+00 : f32
    %14 = vector.broadcast %cst_10 : f32 to vector<16x512xf32>
    %15 = arith.maximumf %13, %14 : vector<16x512xf32>
    %16 = arith.truncf %15 : vector<16x512xf32> to vector<16x512xbf16>
    %c0_11 = arith.constant 0 : index
    %c0_12 = arith.constant 0 : index
    %17 = vector.load %arg4[%c0_11, %c0_12] : memref<512x256xbf16, #tpu.memory_space<vmem>>, vector<512x256xbf16>
    %cst_13 = arith.constant dense<0.000000e+00> : vector<16x256xf32>
    %18 = tpu.matmul %16, %17, %cst_13 {dimension_numbers = #tpu.dot_dimension_numbers<[1], [0], [0], [1], [0, 0, 1, 1], [], []>} : vector<16x512xbf16>, vector<512x256xbf16>, vector<16x256xf32> -> vector<16x256xf32>
    %c2 = arith.constant 2 : index
    %c0_14 = arith.constant 0 : index
    %19 = vector.load %arg8[%c2, %c0_14] : memref<6x1024xf32, #tpu.memory_space<vmem>>, vector<1x256xf32>
    %20 = vector.broadcast %19 : vector<1x256xf32> to vector<16x256xf32>
    %21 = arith.addf %18, %20 : vector<16x256xf32>
    %cst_15 = arith.constant 0.000000e+00 : f32
    %22 = vector.broadcast %cst_15 : f32 to vector<16x256xf32>
    %23 = arith.maximumf %21, %22 : vector<16x256xf32>
    %24 = arith.truncf %23 : vector<16x256xf32> to vector<16x256xbf16>
    %c0_16 = arith.constant 0 : index
    %c0_17 = arith.constant 0 : index
    %25 = vector.load %arg5[%c0_16, %c0_17] : memref<256x128xbf16, #tpu.memory_space<vmem>>, vector<256x128xbf16>
    %cst_18 = arith.constant dense<0.000000e+00> : vector<16x128xf32>
    %26 = tpu.matmul %24, %25, %cst_18 {dimension_numbers = #tpu.dot_dimension_numbers<[1], [0], [0], [1], [0, 0, 1, 1], [], []>} : vector<16x256xbf16>, vector<256x128xbf16>, vector<16x128xf32> -> vector<16x128xf32>
    %c3 = arith.constant 3 : index
    %c0_19 = arith.constant 0 : index
    %27 = vector.load %arg8[%c3, %c0_19] : memref<6x1024xf32, #tpu.memory_space<vmem>>, vector<1x128xf32>
    %28 = vector.broadcast %27 : vector<1x128xf32> to vector<16x128xf32>
    %29 = arith.addf %26, %28 : vector<16x128xf32>
    %cst_20 = arith.constant 0.000000e+00 : f32
    %30 = vector.broadcast %cst_20 : f32 to vector<16x128xf32>
    %31 = arith.maximumf %29, %30 : vector<16x128xf32>
    %32 = arith.truncf %31 : vector<16x128xf32> to vector<16x128xbf16>
    %c0_21 = arith.constant 0 : index
    %c0_22 = arith.constant 0 : index
    %33 = vector.load %arg6[%c0_21, %c0_22] : memref<128x128xbf16, #tpu.memory_space<vmem>>, vector<128x128xbf16>
    %cst_23 = arith.constant dense<0.000000e+00> : vector<16x128xf32>
    %34 = tpu.matmul %32, %33, %cst_23 {dimension_numbers = #tpu.dot_dimension_numbers<[1], [0], [0], [1], [0, 0, 1, 1], [], []>} : vector<16x128xbf16>, vector<128x128xbf16>, vector<16x128xf32> -> vector<16x128xf32>
    %c4 = arith.constant 4 : index
    %c0_24 = arith.constant 0 : index
    %35 = vector.load %arg8[%c4, %c0_24] : memref<6x1024xf32, #tpu.memory_space<vmem>>, vector<1x128xf32>
    %36 = vector.broadcast %35 : vector<1x128xf32> to vector<16x128xf32>
    %37 = arith.addf %34, %36 : vector<16x128xf32>
    %cst_25 = arith.constant 0.000000e+00 : f32
    %38 = vector.broadcast %cst_25 : f32 to vector<16x128xf32>
    %39 = arith.maximumf %37, %38 : vector<16x128xf32>
    %40 = arith.truncf %39 : vector<16x128xf32> to vector<16x128xbf16>
    %c0_26 = arith.constant 0 : index
    %c0_27 = arith.constant 0 : index
    %41 = vector.load %arg7[%c0_26, %c0_27] : memref<128x128xbf16, #tpu.memory_space<vmem>>, vector<128x128xbf16>
    %cst_28 = arith.constant dense<0.000000e+00> : vector<16x128xf32>
    %42 = tpu.matmul %40, %41, %cst_28 {dimension_numbers = #tpu.dot_dimension_numbers<[1], [0], [0], [1], [0, 0, 1, 1], [], []>} : vector<16x128xbf16>, vector<128x128xbf16>, vector<16x128xf32> -> vector<16x128xf32>
    %c5 = arith.constant 5 : index
    %c0_29 = arith.constant 0 : index
    %43 = vector.load %arg8[%c5, %c0_29] : memref<6x1024xf32, #tpu.memory_space<vmem>>, vector<1x128xf32>
    %44 = vector.broadcast %43 : vector<1x128xf32> to vector<16x128xf32>
    %45 = arith.addf %42, %44 : vector<16x128xf32>
    %46 = arith.truncf %45 : vector<16x128xf32> to vector<16x128xbf16>
    %c0_30 = arith.constant 0 : index
    %c0_31 = arith.constant 0 : index
    %47 = vector.load %arg9[%c0_30, %c0_31] : memref<16x128xbf16, #tpu.memory_space<vmem>>, vector<16x128xbf16>
    tpu.vector_store %arg9[%c0_30, %c0_31], %46 {strides = array<i32>} : memref<16x128xbf16, #tpu.memory_space<vmem>>, vector<16x128xbf16>,
    return
  }
  func.func @transform_0(%arg0: i32) -> (i32, i32) {
    %c0_i32 = arith.constant 0 : i32
    %c0_i32_0 = arith.constant 0 : i32
    return %arg0, %c0_i32 : i32, i32
  }
  func.func @transform_1(%arg0: i32) -> (i32, i32) {
    %c0_i32 = arith.constant 0 : i32
    %c0_i32_0 = arith.constant 0 : i32
    %c0_i32_1 = arith.constant 0 : i32
    return %c0_i32, %c0_i32_0 : i32, i32
  }
  func.func @transform_2(%arg0: i32) -> (i32, i32) {
    %c0_i32 = arith.constant 0 : i32
    %c0_i32_0 = arith.constant 0 : i32
    %c0_i32_1 = arith.constant 0 : i32
    return %c0_i32, %c0_i32_0 : i32, i32
  }
  func.func @transform_3(%arg0: i32) -> (i32, i32) {
    %c0_i32 = arith.constant 0 : i32
    %c0_i32_0 = arith.constant 0 : i32
    %c0_i32_1 = arith.constant 0 : i32
    return %c0_i32, %c0_i32_0 : i32, i32
  }
  func.func @transform_4(%arg0: i32) -> (i32, i32) {
    %c0_i32 = arith.constant 0 : i32
    %c0_i32_0 = arith.constant 0 : i32
    %c0_i32_1 = arith.constant 0 : i32
    return %c0_i32, %c0_i32_0 : i32, i32
  }
  func.func @transform_5(%arg0: i32) -> (i32, i32) {
    %c0_i32 = arith.constant 0 : i32
    %c0_i32_0 = arith.constant 0 : i32
    %c0_i32_1 = arith.constant 0 : i32
    return %c0_i32, %c0_i32_0 : i32, i32
  }
  func.func @transform_6(%arg0: i32) -> (i32, i32) {
    %c0_i32 = arith.constant 0 : i32
    %c0_i32_0 = arith.constant 0 : i32
    %c0_i32_1 = arith.constant 0 : i32
    return %c0_i32, %c0_i32_0 : i32, i32
  }
  func.func @transform_7(%arg0: i32) -> (i32, i32) {
    %c0_i32 = arith.constant 0 : i32
    %c0_i32_0 = arith.constant 0 : i32
    %c0_i32_1 = arith.constant 0 : i32
    return %c0_i32, %c0_i32_0 : i32, i32
  }
  func.func @transform_8(%arg0: i32) -> (i32, i32) {
    %c0_i32 = arith.constant 0 : i32
    %c0_i32_0 = arith.constant 0 : i32
    return %arg0, %c0_i32 : i32, i32
  }
}

module attributes {stable_mosaic.version = 11 : i64} {
  func.func @_perceptron_kernel(%arg0: i32, %arg1: memref<16x32xbf16, #tpu.memory_space<vmem>>, %arg2: memref<32x1024xbf16, #tpu.memory_space<vmem>>, %arg3: memref<1024x512xbf16, #tpu.memory_space<vmem>>, %arg4: memref<512x256xbf16, #tpu.memory_space<vmem>>, %arg5: memref<256x128xbf16, #tpu.memory_space<vmem>>, %arg6: memref<128x128xbf16, #tpu.memory_space<vmem>>, %arg7: memref<128x128xbf16, #tpu.memory_space<vmem>>, %arg8: memref<6x1024xf32, #tpu.memory_space<vmem>>, %arg9: memref<16x128xbf16, #tpu.memory_space<vmem>>) attributes {dimension_semantics = [#tpu.dimension_semantics<parallel>], iteration_bounds = array<i64: 1>, scalar_prefetch = 0 : i64, scratch_operands = 0 : i64, tpu.core_type = #tpu.core_type<tc>, window_params = [{transform_indices = @transform_0, window_bounds = array<i64: 16, 32>}, {pipeline_mode = #tpu.pipeline_mode<synchronous>, transform_indices = @transform_1, window_bounds = array<i64: 32, 1024>}, {pipeline_mode = #tpu.pipeline_mode<synchronous>, transform_indices = @transform_2, window_bounds = array<i64: 1024, 512>}, {pipeline_mode = #tpu.pipeline_mode<synchronous>, transform_indices = @transform_3, window_bounds = array<i64: 512, 256>}, {pipeline_mode = #tpu.pipeline_mode<synchronous>, transform_indices = @transform_4, window_bounds = array<i64: 256, 128>}, {pipeline_mode = #tpu.pipeline_mode<synchronous>, transform_indices = @transform_5, window_bounds = array<i64: 128, 128>}, {pipeline_mode = #tpu.pipeline_mode<synchronous>, transform_indices = @transform_6, window_bounds = array<i64: 128, 128>}, {pipeline_mode = #tpu.pipeline_mode<synchronous>, transform_indices = @transform_7, window_bounds = array<i64: 6, 1024>}, {transform_indices = @transform_8, window_bounds = array<i64: 16, 128>}]} {
    %c0 = arith.constant 0 : index
    %c0_0 = arith.constant 0 : index
    %0 = vector.load %arg1[%c0, %c0_0] : memref<16x32xbf16, #tpu.memory_space<vmem>>, vector<16x32xbf16>
    %c0_1 = arith.constant 0 : index
    %c0_2 = arith.constant 0 : index
    %1 = vector.load %arg2[%c0_1, %c0_2] : memref<32x1024xbf16, #tpu.memory_space<vmem>>, vector<32x1024xbf16>
    %cst = arith.constant dense<0.000000e+00> : vector<16x1024xf32>
    %2 = tpu.matmul %0, %1, %cst {dimension_numbers = #tpu.dot_dimension_numbers<[1], [0], [0], [1], [0, 0, 1, 1], [], []>} : vector<16x32xbf16>, vector<32x1024xbf16>, vector<16x1024xf32> -> vector<16x1024xf32>
    %c0_3 = arith.constant 0 : index
    %c0_4 = arith.constant 0 : index
    %3 = vector.load %arg8[%c0_3, %c0_4] : memref<6x1024xf32, #tpu.memory_space<vmem>>, vector<1x1024xf32>
    %4 = vector.broadcast %3 : vector<1x1024xf32> to vector<16x1024xf32>
    %5 = arith.addf %2, %4 : vector<16x1024xf32>
    %cst_5 = arith.constant 0.000000e+00 : f32
    %6 = vector.broadcast %cst_5 : f32 to vector<16x1024xf32>
    %7 = arith.maximumf %5, %6 : vector<16x1024xf32>
    %8 = arith.truncf %7 : vector<16x1024xf32> to vector<16x1024xbf16>
    %c0_6 = arith.constant 0 : index
    %c0_7 = arith.constant 0 : index
    %9 = vector.load %arg3[%c0_6, %c0_7] : memref<1024x512xbf16, #tpu.memory_space<vmem>>, vector<1024x512xbf16>
    %cst_8 = arith.constant dense<0.000000e+00> : vector<16x512xf32>
    %10 = tpu.matmul %8, %9, %cst_8 {dimension_numbers = #tpu.dot_dimension_numbers<[1], [0], [0], [1], [0, 0, 1, 1], [], []>} : vector<16x1024xbf16>, vector<1024x512xbf16>, vector<16x512xf32> -> vector<16x512xf32>
    %c1 = arith.constant 1 : index
    %c0_9 = arith.constant 0 : index
    %11 = vector.load %arg8[%c1, %c0_9] : memref<6x1024xf32, #tpu.memory_space<vmem>>, vector<1x512xf32>
    %12 = vector.broadcast %11 : vector<1x512xf32> to vector<16x512xf32>
    %13 = arith.addf %10, %12 : vector<16x512xf32>
    %cst_10 = arith.constant 0.000000e+00 : f32
    %14 = vector.broadcast %cst_10 : f32 to vector<16x512xf32>
    %15 = arith.maximumf %13, %14 : vector<16x512xf32>
    %16 = arith.truncf %15 : vector<16x512xf32> to vector<16x512xbf16>
    %c0_11 = arith.constant 0 : index
    %c0_12 = arith.constant 0 : index
    %17 = vector.load %arg4[%c0_11, %c0_12] : memref<512x256xbf16, #tpu.memory_space<vmem>>, vector<512x256xbf16>
    %cst_13 = arith.constant dense<0.000000e+00> : vector<16x256xf32>
    %18 = tpu.matmul %16, %17, %cst_13 {dimension_numbers = #tpu.dot_dimension_numbers<[1], [0], [0], [1], [0, 0, 1, 1], [], []>} : vector<16x512xbf16>, vector<512x256xbf16>, vector<16x256xf32> -> vector<16x256xf32>
    %c2 = arith.constant 2 : index
    %c0_14 = arith.constant 0 : index
    %19 = vector.load %arg8[%c2, %c0_14] : memref<6x1024xf32, #tpu.memory_space<vmem>>, vector<1x256xf32>
    %20 = vector.broadcast %19 : vector<1x256xf32> to vector<16x256xf32>
    %21 = arith.addf %18, %20 : vector<16x256xf32>
    %cst_15 = arith.constant 0.000000e+00 : f32
    %22 = vector.broadcast %cst_15 : f32 to vector<16x256xf32>
    %23 = arith.maximumf %21, %22 : vector<16x256xf32>
    %24 = arith.truncf %23 : vector<16x256xf32> to vector<16x256xbf16>
    %c0_16 = arith.constant 0 : index
    %c0_17 = arith.constant 0 : index
    %25 = vector.load %arg5[%c0_16, %c0_17] : memref<256x128xbf16, #tpu.memory_space<vmem>>, vector<256x128xbf16>
    %cst_18 = arith.constant dense<0.000000e+00> : vector<16x128xf32>
    %26 = tpu.matmul %24, %25, %cst_18 {dimension_numbers = #tpu.dot_dimension_numbers<[1], [0], [0], [1], [0, 0, 1, 1], [], []>} : vector<16x256xbf16>, vector<256x128xbf16>, vector<16x128xf32> -> vector<16x128xf32>
    %c3 = arith.constant 3 : index
    %c0_19 = arith.constant 0 : index
    %27 = vector.load %arg8[%c3, %c0_19] : memref<6x1024xf32, #tpu.memory_space<vmem>>, vector<1x128xf32>
    %28 = vector.broadcast %27 : vector<1x128xf32> to vector<16x128xf32>
    %29 = arith.addf %26, %28 : vector<16x128xf32>
    %cst_20 = arith.constant 0.000000e+00 : f32
    %30 = vector.broadcast %cst_20 : f32 to vector<16x128xf32>
    %31 = arith.maximumf %29, %30 : vector<16x128xf32>
    %32 = arith.truncf %31 : vector<16x128xf32> to vector<16x128xbf16>
    %c0_21 = arith.constant 0 : index
    %c0_22 = arith.constant 0 : index
    %33 = vector.load %arg6[%c0_21, %c0_22] : memref<128x128xbf16, #tpu.memory_space<vmem>>, vector<128x128xbf16>
    %cst_23 = arith.constant dense<0.000000e+00> : vector<16x128xf32>
    %34 = tpu.matmul %32, %33, %cst_23 {dimension_numbers = #tpu.dot_dimension_numbers<[1], [0], [0], [1], [0, 0, 1, 1], [], []>} : vector<16x128xbf16>, vector<128x128xbf16>, vector<16x128xf32> -> vector<16x128xf32>
    %c4 = arith.constant 4 : index
    %c0_24 = arith.constant 0 : index
    %35 = vector.load %arg8[%c4, %c0_24] : memref<6x1024xf32, #tpu.memory_space<vmem>>, vector<1x128xf32>
    %36 = vector.broadcast %35 : vector<1x128xf32> to vector<16x128xf32>
    %37 = arith.addf %34, %36 : vector<16x128xf32>
    %cst_25 = arith.constant 0.000000e+00 : f32
    %38 = vector.broadcast %cst_25 : f32 to vector<16x128xf32>
    %39 = arith.maximumf %37, %38 : vector<16x128xf32>
    %40 = arith.truncf %39 : vector<16x128xf32> to vector<16x128xbf16>
    %c0_26 = arith.constant 0 : index
    %c0_27 = arith.constant 0 : index
    %41 = vector.load %arg7[%c0_26, %c0_27] : memref<128x128xbf16, #tpu.memory_space<vmem>>, vector<128x128xbf16>
    %cst_28 = arith.constant dense<0.000000e+00> : vector<16x128xf32>
    %42 = tpu.matmul %40, %41, %cst_28 {dimension_numbers = #tpu.dot_dimension_numbers<[1], [0], [0], [1], [0, 0, 1, 1], [], []>} : vector<16x128xbf16>, vector<128x128xbf16>, vector<16x128xf32> -> vector<16x128xf32>
    %c5 = arith.constant 5 : index
    %c0_29 = arith.constant 0 : index
    %43 = vector.load %arg8[%c5, %c0_29] : memref<6x1024xf32, #tpu.memory_space<vmem>>, vector<1x128xf32>
    %44 = vector.broadcast %43 : vector<1x128xf32> to vector<16x128xf32>
    %45 = arith.addf %42, %44 : vector<16x128xf32>
    %46 = arith.truncf %45 : vector<16x128xf32> to vector<16x128xbf16>
    %c0_30 = arith.constant 0 : index
    %c0_31 = arith.constant 0 : index
    %47 = vector.load %arg9[%c0_30, %c0_31] : memref<16x128xbf16, #tpu.memory_space<vmem>>, vector<16x128xbf16>
    tpu.vector_store %arg9[%c0_30, %c0_31], %46 {strides = array<i32>} : memref<16x128xbf16, #tpu.memory_space<vmem>>, vector<16x128xbf16>,
    return
  }
  func.func @transform_0(%arg0: i32) -> (i32, i32) {
    %c0_i32 = arith.constant 0 : i32
    %c0_i32_0 = arith.constant 0 : i32
    return %arg0, %c0_i32 : i32, i32
  }
  func.func @transform_1(%arg0: i32) -> (i32, i32) {
    %c0_i32 = arith.constant 0 : i32
    %c0_i32_0 = arith.constant 0 : i32
    %c0_i32_1 = arith.constant 0 : i32
    return %c0_i32, %c0_i32_0 : i32, i32
  }
  func.func @transform_2(%arg0: i32) -> (i32, i32) {
    %c0_i32 = arith.constant 0 : i32
    %c0_i32_0 = arith.constant 0 : i32
    %c0_i32_1 = arith.constant 0 : i32
    return %c0_i32, %c0_i32_0 : i32, i32
  }
  func.func @transform_3(%arg0: i32) -> (i32, i32) {
    %c0_i32 = arith.constant 0 : i32
    %c0_i32_0 = arith.constant 0 : i32
    %c0_i32_1 = arith.constant 0 : i32
    return %c0_i32, %c0_i32_0 : i32, i32
  }
  func.func @transform_4(%arg0: i32) -> (i32, i32) {
    %c0_i32 = arith.constant 0 : i32
    %c0_i32_0 = arith.constant 0 : i32
    %c0_i32_1 = arith.constant 0 : i32
    return %c0_i32, %c0_i32_0 : i32, i32
  }
  func.func @transform_5(%arg0: i32) -> (i32, i32) {
    %c0_i32 = arith.constant 0 : i32
    %c0_i32_0 = arith.constant 0 : i32
    %c0_i32_1 = arith.constant 0 : i32
    return %c0_i32, %c0_i32_0 : i32, i32
  }
  func.func @transform_6(%arg0: i32) -> (i32, i32) {
    %c0_i32 = arith.constant 0 : i32
    %c0_i32_0 = arith.constant 0 : i32
    %c0_i32_1 = arith.constant 0 : i32
    return %c0_i32, %c0_i32_0 : i32, i32
  }
  func.func @transform_7(%arg0: i32) -> (i32, i32) {
    %c0_i32 = arith.constant 0 : i32
    %c0_i32_0 = arith.constant 0 : i32
    %c0_i32_1 = arith.constant 0 : i32
    return %c0_i32, %c0_i32_0 : i32, i32
  }
  func.func @transform_8(%arg0: i32) -> (i32, i32) {
    %c0_i32 = arith.constant 0 : i32
    %c0_i32_0 = arith.constant 0 : i32
    return %arg0, %c0_i32 : i32, i32
  }
}

</mosaic_0001>

<bundles_post_ra>
// kernel: tpu_custom_call.1
= control target key start
LH: loop header
LB: loop body
LE: loop exit
PB: predicated region body
PF: predicated region fallthrough
CT: control target
= control target key end

     0   :  { %13 = vsyncpa [#allocation3], 0  ;;  %s4843_s0 = inlined_call_operand.hbm [shape: bf16[16,32], index: 0, kind: input, shape index: {}]   ;;  %s4844_s1 = inlined_call_operand.hbm [shape: bf16[32,1024], index: 1, kind: input, shape index: {}]   ;;  %s4845_s2 = inlined_call_operand.hbm [shape: bf16[1024,512], index: 2, kind: input, shape index: {}]   ;;  %s4846_s3 = inlined_call_operand.hbm [shape: bf16[512,256], index: 3, kind: input, shape index: {}]   ;;  %s4847_s4 = inlined_call_operand.hbm [shape: bf16[256,128], index: 4, kind: input, shape index: {}]   ;;  %s4848_s5 = inlined_call_operand.hbm [shape: bf16[128,128], index: 5, kind: input, shape index: {}]   ;;  %s4849_s6 = inlined_call_operand.hbm [shape: bf16[128,128], index: 6, kind: input, shape index: {}]   ;;  %s4850_s7 = inlined_call_operand.hbm [shape: f32[6,1024], index: 7, kind: input, shape index: {}]   ;;  %s4851_s8 = inlined_call_operand.hbm [shape: bf16[16,128], index: 8, kind: output, shape index: {}]  }
   0x1   :  { %14 = vsyncpa [#allocation6], 0 }
   0x2   :  { %15 = vsyncpa [#allocation9], 0 }
   0x3   :  { %16 = vsyncpa [#allocation12], 0 }
   0x4   :  { %17 = vsyncpa [#allocation15], 0 }
   0x5   :  { %18 = vsyncpa [#allocation4], 0  ;;  %s4553_s27 = smov [#allocation5]   ;;  %s4343_s9 = scalar_lea.hbm %s4844_s1, 2048 }
   0x6   :  { %s36_s28 = sshll.u32 %s4553_s27, 4  ;;  %p4344_p0 = scmp.ne.s32.totalorder %s4844_s1, %s4343_s9  ;;  %s37_s28 = int_to_ptr.vmem [resolvable:$true] %s36_s28 }
   0x7   :  { %p4347_p1 = scmp.lt.u32.totalorder %s4343_s9, %s4844_s1 }
   0x9   :  { %p4349_p2 = pnand %p4347_p1, %p4344_p0 }
   0xb   :  { %4352 = shalt.err (!%p4349_p2)
}
   0xc   :  { %s4353_s14 = scalar_lea.vmem %s37_s28, 2048  ;;  %p4358_p4 = scmp.lt.s32.totalorder %s37_s28, %s37_s28 }
   0xd   :  { %p4354_p3 = scmp.ne.s32.totalorder %s37_s28, %s4353_s14  ;;  %p4359_p5 = scmp.lt.s32.totalorder %s4353_s14, %s4353_s14 }
   0xf   :  { %p4360_p6 = por %p4359_p5, %p4358_p4 }
  0x11   :  { %p4361_p7 = pnand %p4360_p6, %p4354_p3 }
  0x13   :  { %4364 = shalt.err (!%p4361_p7)
}
  0x14   :  { %s4554_s15 = smov 512   ;;  %s4555_s16 = smov 32  }
  0x15   :  { %42 = dma.hbm_to_vmem [thread:$0]  %s4844_s1, 2048, %s37_s28, [#allocation6], %s4554_s15, %s4554_s15, %s4555_s16  }
  0x16   :  { %s4556_s19 = smov [#allocation8]   ;;  %s4365_s23 = scalar_lea.hbm %s4846_s3, 8192 }
  0x17   :  { %s60_s20 = sshll.u32 %s4556_s19, 4  ;;  %p4366_p8 = scmp.ne.s32.totalorder %s4846_s3, %s4365_s23  ;;  %s61_s20 = int_to_ptr.vmem [resolvable:$true] %s60_s20 }
  0x18   :  { %p4369_p9 = scmp.lt.u32.totalorder %s4365_s23, %s4846_s3 }
  0x1a   :  { %p4371_p10 = pnand %p4369_p9, %p4366_p8 }
  0x1c   :  { %4374 = shalt.err (!%p4371_p10)
}
  0x1d   :  { %s4375_s29 = scalar_lea.vmem %s61_s20, 8192  ;;  %p4380_p12 = scmp.lt.s32.totalorder %s61_s20, %s61_s20 }
  0x1e   :  { %p4376_p11 = scmp.ne.s32.totalorder %s61_s20, %s4375_s29  ;;  %p4381_p13 = scmp.lt.s32.totalorder %s4375_s29, %s4375_s29 }
  0x20   :  { %p4382_p0 = por %p4381_p13, %p4380_p12 }
  0x22   :  { %p4383_p1 = pnand %p4382_p0, %p4376_p11 }
  0x24   :  { %4386 = shalt.err (!%p4383_p1)
}
  0x25   :  { %s4557_s1 = smov 128   ;;  %s4558_s28 = smov 8  }
  0x26   :  { %66 = dma.hbm_to_vmem [thread:$0]  %s4846_s3, 8192, %s61_s20, [#allocation9], %s4557_s1, %s4557_s1, %s4558_s28  }
  0x27   :  { %s4559_s10 = smov [#allocation11]   ;;  %s4560_s12 = smov [#allocation2]  }
  0x28   :  { %s84_s11 = sshll.u32 %s4559_s10, 4  ;;  %s24_s13 = sshll.u32 %s4560_s12, 4  ;;  %s85_s11 = int_to_ptr.vmem [resolvable:$true] %s84_s11  ;;  %s4642_s13 = int_to_ptr.vmem [resolvable:$true] %s24_s13 }
  0x29   :  { %s4387_s16 = scalar_lea.hbm %s4848_s5, 1024 }
  0x2a   :  { %p4388_p2 = scmp.ne.s32.totalorder %s4848_s5, %s4387_s16  ;;  %p4391_p3 = scmp.lt.u32.totalorder %s4387_s16, %s4848_s5 }
  0x2c   :  { %p4393_p4 = pnand %p4391_p3, %p4388_p2 }
  0x2e   :  { %4396 = shalt.err (!%p4393_p4)
}
  0x2f   :  { %s4397_s3 = scalar_lea.vmem %s85_s11, 1024  ;;  %p4402_p6 = scmp.lt.s32.totalorder %s85_s11, %s85_s11 }
  0x30   :  { %p4398_p5 = scmp.ne.s32.totalorder %s85_s11, %s4397_s3  ;;  %p4403_p7 = scmp.lt.s32.totalorder %s4397_s3, %s4397_s3 }
  0x32   :  { %p4404_p8 = por %p4403_p7, %p4402_p6 }
  0x34   :  { %p4405_p9 = pnand %p4404_p8, %p4398_p5 }
  0x36   :  { %4408 = shalt.err (!%p4405_p9)
}
  0x37   :  { %s4561_s20 = smov 64   ;;  %s4562_s22 = smov 4  }
  0x38   :  { %90 = dma.hbm_to_vmem [thread:$0]  %s4848_s5, 1024, %s85_s11, [#allocation12], %s4561_s20, %s4561_s20, %s4562_s22  }
  0x39   :  { %s4409_s27 = scalar_lea.hbm %s4843_s0, 128 }
  0x3a   :  { %p4410_p10 = scmp.ne.s32.totalorder %s4843_s0, %s4409_s27  ;;  %p4413_p11 = scmp.lt.u32.totalorder %s4409_s27, %s4843_s0 }
  0x3c   :  { %p4415_p12 = pnand %p4413_p11, %p4410_p10 }
  0x3e   :  { %4418 = shalt.err (!%p4415_p12)
}
  0x3f   :  { %s4419_s9 = scalar_lea.vmem %s4642_s13, 128  ;;  %p4424_p0 = scmp.lt.s32.totalorder %s4642_s13, %s4642_s13 }
  0x40   :  { %p4420_p13 = scmp.ne.s32.totalorder %s4642_s13, %s4419_s9  ;;  %p4425_p1 = scmp.lt.s32.totalorder %s4419_s9, %s4419_s9 }
  0x42   :  { %p4426_p2 = por %p4425_p1, %p4424_p0 }
  0x44   :  { %p4427_p3 = pnand %p4426_p2, %p4420_p13 }
  0x46   :  { %4430 = shalt.err (!%p4427_p3)
}
  0x47   :  { %30 = dma.hbm_to_vmem [thread:$0]  %s4843_s0, 128, %s4642_s13, [#allocation3], %s4561_s20, %s4561_s20, %s4562_s22  }
  0x48   :  { %s4563_s11 = smov [#allocation7]   ;;  %s4431_s16 = scalar_lea.hbm %s4845_s2, 32768 }
  0x49   :  { %s48_s12 = sshll.u32 %s4563_s11, 4  ;;  %p4432_p4 = scmp.ne.s32.totalorder %s4845_s2, %s4431_s16  ;;  %s49_s12 = int_to_ptr.vmem [resolvable:$true] %s48_s12 }
  0x4a   :  { %p4435_p5 = scmp.lt.u32.totalorder %s4431_s16, %s4845_s2 }
  0x4c   :  { %p4437_p6 = pnand %p4435_p5, %p4432_p4 }
  0x4e   :  { %4440 = shalt.err (!%p4437_p6)
}
  0x4f   :  { %s4441_s3 = scalar_lea.vmem %s49_s12, 32768  ;;  %p4446_p8 = scmp.lt.s32.totalorder %s49_s12, %s49_s12 }
  0x50   :  { %p4442_p7 = scmp.ne.s32.totalorder %s49_s12, %s4441_s3  ;;  %p4447_p9 = scmp.lt.s32.totalorder %s4441_s3, %s4441_s3 }
  0x52   :  { %p4448_p10 = por %p4447_p9, %p4446_p8 }
  0x54   :  { %p4449_p11 = pnand %p4448_p10, %p4442_p7 }
  0x56   :  { %4452 = shalt.err (!%p4449_p11)
}
  0x57   :  { %s4564_s0 = smov 256   ;;  %s4565_s13 = smov 16  }
  0x58   :  { %54 = dma.hbm_to_vmem [thread:$0]  %s4845_s2, 32768, %s49_s12, [#allocation6], %s4564_s0, %s4564_s0, %s4565_s13  }
  0x59   :  { %s4566_s25 = smov [#allocation10]   ;;  %s4567_s27 = smov [#allocation13]  }
  0x5a   :  { %s72_s26 = sshll.u32 %s4566_s25, 4  ;;  %s96_s29 = sshll.u32 %s4567_s27, 4  ;;  %s73_s26 = int_to_ptr.vmem [resolvable:$true] %s72_s26  ;;  %s97_s29 = int_to_ptr.vmem [resolvable:$true] %s96_s29 }
  0x5b   :  { %s4453_s30 = scalar_lea.hbm %s4847_s4, 2048 }
  0x5c   :  { %p4454_p12 = scmp.ne.s32.totalorder %s4847_s4, %s4453_s30  ;;  %p4457_p13 = scmp.lt.u32.totalorder %s4453_s30, %s4847_s4 }
  0x5e   :  { %p4459_p0 = pnand %p4457_p13, %p4454_p12 }
  0x60   :  { %4462 = shalt.err (!%p4459_p0)
}
  0x61   :  { %s4463_s2 = scalar_lea.vmem %s73_s26, 2048  ;;  %p4468_p2 = scmp.lt.s32.totalorder %s73_s26, %s73_s26 }
  0x62   :  { %p4464_p1 = scmp.ne.s32.totalorder %s73_s26, %s4463_s2  ;;  %p4469_p3 = scmp.lt.s32.totalorder %s4463_s2, %s4463_s2 }
  0x64   :  { %p4470_p4 = por %p4469_p3, %p4468_p2 }
  0x66   :  { %p4471_p5 = pnand %p4470_p4, %p4464_p1 }
  0x68   :  { %4474 = shalt.err (!%p4471_p5)
}
  0x69   :  { %78 = dma.hbm_to_vmem [thread:$0]  %s4847_s4, 2048, %s73_s26, [#allocation9], %s4561_s20, %s4561_s20, %s4562_s22  }
  0x6a   :  { %s4475_s17 = scalar_lea.hbm %s4849_s6, 1024 }
  0x6b   :  { %p4476_p6 = scmp.ne.s32.totalorder %s4849_s6, %s4475_s17  ;;  %p4479_p7 = scmp.lt.u32.totalorder %s4475_s17, %s4849_s6 }
  0x6d   :  { %p4481_p8 = pnand %p4479_p7, %p4476_p6 }
  0x6f   :  { %4484 = shalt.err (!%p4481_p8)
}
  0x70   :  { %s4485_s0 = scalar_lea.vmem %s97_s29, 1024  ;;  %p4490_p10 = scmp.lt.s32.totalorder %s97_s29, %s97_s29 }
  0x71   :  { %p4486_p9 = scmp.ne.s32.totalorder %s97_s29, %s4485_s0  ;;  %p4491_p11 = scmp.lt.s32.totalorder %s4485_s0, %s4485_s0 }
  0x73   :  { %p4492_p12 = por %p4491_p11, %p4490_p10 }
  0x75   :  { %p4493_p13 = pnand %p4492_p12, %p4486_p9 }
  0x77   :  { %4496 = shalt.err (!%p4493_p13)
}
  0x78   :  { %102 = dma.hbm_to_vmem [thread:$0]  %s4849_s6, 1024, %s97_s29, [#allocation12], %s4561_s20, %s4561_s20, %s4562_s22  }
  0x79   :  { %s4568_s23 = smov [#allocation14]   ;;  %s4497_s27 = scalar_lea.hbm %s4850_s7, 1024 }
  0x7a   :  { %s109_s24 = sshll.u32 %s4568_s23, 4  ;;  %p4498_p0 = scmp.ne.s32.totalorder %s4850_s7, %s4497_s27  ;;  %s110_s24 = int_to_ptr.vmem [resolvable:$true] %s109_s24 }
  0x7b   :  { %p4501_p1 = scmp.lt.u32.totalorder %s4497_s27, %s4850_s7 }
  0x7d   :  { %p4503_p2 = pnand %p4501_p1, %p4498_p0 }
  0x7f   :  { %4506 = shalt.err (!%p4503_p2)
}
  0x80   :  { %s4507_s5 = scalar_lea.vmem %s110_s24, 1024  ;;  %p4512_p4 = scmp.lt.s32.totalorder %s110_s24, %s110_s24 }
  0x81   :  { %p4508_p3 = scmp.ne.s32.totalorder %s110_s24, %s4507_s5  ;;  %p4513_p5 = scmp.lt.s32.totalorder %s4507_s5, %s4507_s5 }
  0x83   :  { %p4514_p6 = por %p4513_p5, %p4512_p4 }
  0x85   :  { %p4515_p7 = pnand %p4514_p6, %p4508_p3 }
  0x87   :  { %4518 = shalt.err (!%p4515_p7)
}
  0x88   :  { %112 = dma.hbm_to_vmem [thread:$0]  %s4850_s7, 1024, %s110_s24, [#allocation15]  }
  0x89   :  { %4541 = dma.done.wait [#allocation3], 128  }
  0x8a   :  { %4542 = vsyncadd [#allocation3], 4294967168 }
  0x8b   :  { %4543 = dma.done.wait [#allocation6], 34816  }
  0x8c   :  { %4544 = vsyncadd [#allocation6], 4294932480 }
  0x8d   :  { %4545 = dma.done.wait [#allocation9], 10240  }
  0x8e   :  { %4546 = vsyncadd [#allocation9], 4294957056 }
  0x8f   :  { %4547 = dma.done.wait [#allocation12], 2048  }
  0x90   :  { %4548 = vsyncadd [#allocation12], 4294965248 }
  0x91   :  { %4549 = dma.done.wait [#allocation15], 1024  }
  0x92   :  { %4550 = vsyncadd [#allocation15], 4294966272  ;;  %v4569_v0 = vmov 0   ;;  %v140_v1 = vld [vmem:[#allocation5] sm:$0xff]  ;;  %v141_v8 = vld [vmem:[#allocation5 + $0x8] sm:$0xff]  ;;  %vm285_vm0 = vcmask 261120  }
  0x93   :  { %321 = vmatprep.mubr.bf16.mxu1 %v4569_v0  ;;  %v144_v2 = vld [vmem:[#allocation5 + $0x20] sm:$0xff]  ;;  %v145_v9 = vld [vmem:[#allocation5 + $0x28] sm:$0xff]  ;;  %v4734_v11 = vld [vmem:[#allocation2] sm:$0xff]   ;;  %vm4571_vm1 = vmmov 0   ;;  %s4572_s7 = smov [#allocation16]  }
  0x94   :  { %v148_v3 = vld [vmem:[#allocation5 + $0x40] sm:$0xff]  ;;  %v3310_v4 = vcombine.high %v140_v1, %v144_v2  ;;  %v3309_v5 = vcombine.low %v140_v1, %v144_v2  ;;  %v3312_v12 = vcombine.high %v141_v8, %v145_v9  ;;  %v149_v13 = vld [vmem:[#allocation5 + $0x48] sm:$0xff]  ;;  %v3311_v16 = vcombine.low %v141_v8, %v145_v9  ;;  %v142_v17 = vld [vmem:[#allocation5 + $0x10] sm:$0xff]  ;;  %s3292_s10 = sshll.u32 %s4572_s7, 4  ;;  %s3293_s10 = int_to_ptr.vmem [resolvable:$true] %s3292_s10 }
  0x95   :  { %v152_v6 = vld [vmem:[#allocation5 + $0x60] sm:$0xff]  ;;  %v153_v14 = vld [vmem:[#allocation5 + $0x68] sm:$0xff]  ;;  %v146_v21 = vld [vmem:[#allocation5 + $0x30] sm:$0xff]  ;;  %s4519_s11 = scalar_lea.vmem %s3293_s10, 128  ;;  %p4524_p9 = scmp.lt.s32.totalorder %s3293_s10, %s3293_s10 }
  0x96   :  { %v3318_v7 = vcombine.high %v148_v3, %v152_v6  ;;  %289 = vmatprep.subr.bf16.mxu1 %v3310_v4  ;;  %v3317_v10 = vcombine.low %v148_v3, %v152_v6  ;;  %v3831_v15 = vld [vmem:[#allocation7 + $0x4] ss:$16 sps:$4 sm:$0xff]   ;;  %v3836_v18 = vld [vmem:[#allocation7] ss:$16 sps:$4 sm:$0xff]   ;;  %v3320_v19 = vcombine.high %v149_v13, %v153_v14  ;;  %v3319_v23 = vcombine.low %v149_v13, %v153_v14  ;;  %v143_v31 = vld [vmem:[#allocation5 + $0x18] sm:$0xff]  ;;  %p4520_p8 = scmp.ne.s32.totalorder %s3293_s10, %s4519_s11  ;;  %p4525_p10 = scmp.lt.s32.totalorder %s4519_s11, %s4519_s11 }
  0x97   :  { %290 = vmatpush1.bf16.msra.mxu1 %v3309_v5  ;;  %2044 = vmatprep.subr.bf16.mxu0 %v3831_v15  ;;  %v3837_v20 = vld [vmem:[#allocation7 + $0x24] ss:$16 sps:$4 sm:$0xff]   ;;  %v3842_v22 = vld [vmem:[#allocation7 + $0x20] ss:$16 sps:$4 sm:$0xff]   ;;  %v3314_v25 = vcombine.high %v142_v17, %v146_v21  ;;  %v3313_v30 = vcombine.low %v142_v17, %v146_v21  ;;  %v147_v33 = vld [vmem:[#allocation5 + $0x38] sm:$0xff] }
  0x98   :  { %291 = vmatprep.subr.bf16.mxu1 %v3318_v7  ;;  %2045 = vmatpush1.bf16.msra.mxu0 %v3836_v18  ;;  %v3843_v24 = vld [vmem:[#allocation7 + $0x44] ss:$16 sps:$4 sm:$0xff]   ;;  %v3848_v28 = vld [vmem:[#allocation7 + $0x40] ss:$16 sps:$4 sm:$0xff]   ;;  %v3316_v37 = vcombine.high %v143_v31, %v147_v33  ;;  %v151_v38 = vld [vmem:[#allocation5 + $0x58] sm:$0xff]  ;;  %v3315_v42 = vcombine.low %v143_v31, %v147_v33  ;;  %p4526_p11 = por %p4525_p10, %p4524_p9 }
  0x99   :  { %2046 = vmatprep.subr.bf16.mxu0 %v3837_v20  ;;  %v150_v26 = vld [vmem:[#allocation5 + $0x50] sm:$0xff]  ;;  %v155_v39 = vld [vmem:[#allocation5 + $0x78] sm:$0xff] }
  0x9a   :  { %v154_v27 = vld [vmem:[#allocation5 + $0x70] sm:$0xff]  ;;  %v3324_v43 = vcombine.high %v151_v38, %v155_v39  ;;  %v3323_v46 = vcombine.low %v151_v38, %v155_v39  ;;  %v3835_v47 = vld [vmem:[#allocation7 + $0xc] ss:$16 sps:$4 sm:$0xff]   ;;  %v3833_v50 = vld [vmem:[#allocation7 + $0x8] ss:$16 sps:$4 sm:$0xff]   ;;  %p4527_p12 = pnand %p4526_p11, %p4520_p8 }
  0x9b   :  { %292 = vmatpush1.bf16.msra.mxu1 %v3317_v10  ;;  %v3849_v29 = vld [vmem:[#allocation7 + $0x64] ss:$16 sps:$4 sm:$0xff]   ;;  %v3322_v32 = vcombine.high %v150_v26, %v154_v27  ;;  %v3854_v34 = vld [vmem:[#allocation7 + $0x60] ss:$16 sps:$4 sm:$0xff]   ;;  %v3321_v36 = vcombine.low %v150_v26, %v154_v27  ;;  %v3841_v51 = vld [vmem:[#allocation7 + $0x2c] ss:$16 sps:$4 sm:$0xff]  }
  0x9c   :  { %332 = vmatprep.subr.bf16.mxu1 %v3312_v12  ;;  %2047 = vmatpush1.bf16.msra.mxu0 %v3842_v22  ;;  %v3855_v35 = vld [vmem:[#allocation7 + $0x84] ss:$16 sps:$4 sm:$0xff]   ;;  %v3860_v40 = vld [vmem:[#allocation7 + $0x80] ss:$16 sps:$4 sm:$0xff]   ;;  %v3839_v54 = vld [vmem:[#allocation7 + $0x28] ss:$16 sps:$4 sm:$0xff]  }
  0x9d   :  { %2048 = vmatprep.subr.bf16.mxu0 %v3843_v24  ;;  %v3861_v41 = vld [vmem:[#allocation7 + $0xa4] ss:$16 sps:$4 sm:$0xff]   ;;  %v3866_v44 = vld [vmem:[#allocation7 + $0xa0] ss:$16 sps:$4 sm:$0xff]   ;;  %v3847_v55 = vld [vmem:[#allocation7 + $0x4c] ss:$16 sps:$4 sm:$0xff]  }
  0x9e   :  { %3325 = vmatmul.mubr.msk.bf16.vlgmr.msra.gmra.mrb[0].mxu1 %vm285_vm0, %v4734_v11  ;;  %v3867_v45 = vld [vmem:[#allocation7 + $0xc4] ss:$16 sps:$4 sm:$0xff]   ;;  %v3872_v48 = vld [vmem:[#allocation7 + $0xc0] ss:$16 sps:$4 sm:$0xff]   ;;  %v3845_v58 = vld [vmem:[#allocation7 + $0x48] ss:$16 sps:$4 sm:$0xff]  }
  0x9f   :  { %333 = vmatpush1.bf16.msra.mxu1 %v3311_v16  ;;  %364 = vmatprep.mubr.bf16.mxu1 %v4569_v0  ;;  %v3873_v49 = vld [vmem:[#allocation7 + $0xe4] ss:$16 sps:$4 sm:$0xff]   ;;  %v3878_v52 = vld [vmem:[#allocation7 + $0xe0] ss:$16 sps:$4 sm:$0xff]   ;;  %v3853_v59 = vld [vmem:[#allocation7 + $0x6c] ss:$16 sps:$4 sm:$0xff]  }
  0xa0   :  { %334 = vmatprep.subr.bf16.mxu1 %v3320_v19  ;;  %2049 = vmatpush1.bf16.msra.mxu0 %v3848_v28  ;;  %v3879_v53 = vld [vmem:[#allocation7 + $0x104] ss:$16 sps:$4 sm:$0xff]   ;;  %v3884_v56 = vld [vmem:[#allocation7 + $0x100] ss:$16 sps:$4 sm:$0xff]   ;;  %v3851_v62 = vld [vmem:[#allocation7 + $0x68] ss:$16 sps:$4 sm:$0xff]  }
  0xa1   :  { %2050 = vmatprep.subr.bf16.mxu0 %v3849_v29  ;;  %v3885_v57 = vld [vmem:[#allocation7 + $0x124] ss:$16 sps:$4 sm:$0xff]   ;;  %v3890_v60 = vld [vmem:[#allocation7 + $0x120] ss:$16 sps:$4 sm:$0xff]   ;;  %v3859_v63 = vld [vmem:[#allocation7 + $0x8c] ss:$16 sps:$4 sm:$0xff]  }
  0xa2   :  { %v3891_v61 = vld [vmem:[#allocation7 + $0x144] ss:$16 sps:$4 sm:$0xff]   ;;  %v3857_v2 = vld [vmem:[#allocation7 + $0x88] ss:$16 sps:$4 sm:$0xff]   ;;  %v3865_v3 = vld [vmem:[#allocation7 + $0xac] ss:$16 sps:$4 sm:$0xff]  }
  0xa3   :  { %335 = vmatpush1.bf16.msra.mxu1 %v3319_v23  ;;  %v3897_v1 = vld [vmem:[#allocation7 + $0x164] ss:$16 sps:$4 sm:$0xff]   ;;  %v3902_v4 = vld [vmem:[#allocation7 + $0x160] ss:$16 sps:$4 sm:$0xff]   ;;  %v3863_v6 = vld [vmem:[#allocation7 + $0xa8] ss:$16 sps:$4 sm:$0xff]  }
  0xa4   :  { %375 = vmatprep.subr.bf16.mxu1 %v3314_v25  ;;  %2051 = vmatpush1.bf16.msra.mxu0 %v3854_v34  ;;  %v3903_v5 = vld [vmem:[#allocation7 + $0x184] ss:$16 sps:$4 sm:$0xff]   ;;  %v3871_v7 = vld [vmem:[#allocation7 + $0xcc] ss:$16 sps:$4 sm:$0xff]   ;;  %v3908_v8 = vld [vmem:[#allocation7 + $0x180] ss:$16 sps:$4 sm:$0xff]  }
  0xa5   :  { %2052 = vmatprep.subr.bf16.mxu0 %v3855_v35  ;;  %v3909_v9 = vld [vmem:[#allocation7 + $0x1a4] ss:$16 sps:$4 sm:$0xff]   ;;  %v3869_v10 = vld [vmem:[#allocation7 + $0xc8] ss:$16 sps:$4 sm:$0xff]   ;;  %v3914_v12 = vld [vmem:[#allocation7 + $0x1a0] ss:$16 sps:$4 sm:$0xff]  }
  0xa6   :  { %3326 = vmatmul.mubr.msk.bf16.vlgmr.msra.gmra.mrb[4].mxu1 %vm285_vm0, %v4734_v11  ;;  %v3875_v13 = vld [vmem:[#allocation7 + $0xe8] ss:$16 sps:$4 sm:$0xff]   ;;  %v3883_v14 = vld [vmem:[#allocation7 + $0x10c] ss:$16 sps:$4 sm:$0xff]   ;;  %v3915_v26 = vld [vmem:[#allocation7 + $0x1c4] ss:$16 sps:$4 sm:$0xff]  }
  0xa7   :  { %376 = vmatpush1.bf16.msra.mxu1 %v3313_v30  ;;  %407 = vmatprep.mubr.bf16.mxu1 %v4569_v0  ;;  %v3881_v15 = vld [vmem:[#allocation7 + $0x108] ss:$16 sps:$4 sm:$0xff]   ;;  %v3889_v16 = vld [vmem:[#allocation7 + $0x12c] ss:$16 sps:$4 sm:$0xff]   ;;  %v3920_v29 = vld [vmem:[#allocation7 + $0x1c0] ss:$16 sps:$4 sm:$0xff]  }
  0xa8   :  { %377 = vmatprep.subr.bf16.mxu1 %v3322_v32  ;;  %2053 = vmatpush1.bf16.msra.mxu0 %v3860_v40  ;;  %v3887_v17 = vld [vmem:[#allocation7 + $0x128] ss:$16 sps:$4 sm:$0xff]   ;;  %v3895_v18 = vld [vmem:[#allocation7 + $0x14c] ss:$16 sps:$4 sm:$0xff]   ;;  %v3921_v30 = vld [vmem:[#allocation7 + $0x1e4] ss:$16 sps:$4 sm:$0xff]  }
  0xa9   :  { %2054 = vmatprep.subr.bf16.mxu0 %v3861_v41  ;;  %v3893_v19 = vld [vmem:[#allocation7 + $0x148] ss:$16 sps:$4 sm:$0xff]   ;;  %v3901_v20 = vld [vmem:[#allocation7 + $0x16c] ss:$16 sps:$4 sm:$0xff]   ;;  %v3926_v33 = vld [vmem:[#allocation7 + $0x1e0] ss:$16 sps:$4 sm:$0xff]  }
  0xaa   :  { %v3899_v21 = vld [vmem:[#allocation7 + $0x168] ss:$16 sps:$4 sm:$0xff]   ;;  %v3907_v22 = vld [vmem:[#allocation7 + $0x18c] ss:$16 sps:$4 sm:$0xff]   ;;  %v3929_v34 = vld [vmem:[#allocation7 + $0x204] ss:$16 sps:$4 sm:$0xff]  }
  0xab   :  { %378 = vmatpush1.bf16.msra.mxu1 %v3321_v36  ;;  %v3905_v23 = vld [vmem:[#allocation7 + $0x188] ss:$16 sps:$4 sm:$0xff]   ;;  %v3913_v24 = vld [vmem:[#allocation7 + $0x1ac] ss:$16 sps:$4 sm:$0xff]   ;;  %v160_v36 = vlaneseq }
  0xac   :  { %418 = vmatprep.subr.bf16.mxu1 %v3316_v37  ;;  %2055 = vmatpush1.bf16.msra.mxu0 %v3866_v44  ;;  %v3911_v25 = vld [vmem:[#allocation7 + $0x1a8] ss:$16 sps:$4 sm:$0xff]   ;;  %v3919_v27 = vld [vmem:[#allocation7 + $0x1cc] ss:$16 sps:$4 sm:$0xff]  }
  0xad   :  { %2056 = vmatprep.subr.bf16.mxu0 %v3867_v45  ;;  %v3917_v28 = vld [vmem:[#allocation7 + $0x1c8] ss:$16 sps:$4 sm:$0xff]   ;;  %v3925_v31 = vld [vmem:[#allocation7 + $0x1ec] ss:$16 sps:$4 sm:$0xff]   ;;  %v4747_v37 = vshrl.u32 %v160_v36, 7 }
  0xae   :  { %3327 = vmatmul.mubr.msk.bf16.vlgmr.msra.gmra.mrb[8].mxu1 %vm285_vm0, %v4734_v11  ;;  %v3923_v32 = vld [vmem:[#allocation7 + $0x1e8] ss:$16 sps:$4 sm:$0xff]   ;;  %v3932_v35 = vld [vmem:[#allocation7 + $0x20c] ss:$16 sps:$4 sm:$0xff]  }
  0xaf   :  { %419 = vmatpush1.bf16.msra.mxu1 %v3315_v42  ;;  %450 = vmatprep.mubr.bf16.mxu1 %v4569_v0  ;;  %v3896_v0 = vld [vmem:[#allocation7 + $0x140] ss:$16 sps:$4 sm:$0xff]   ;;  %v4752_v41 = vsub.s32 0, %v4747_v37  ;;  %v4755_v42 = vsub.s32 1, %v4747_v37 }
  0xb0   :  { %420 = vmatprep.subr.bf16.mxu1 %v3324_v43  ;;  %2057 = vmatpush1.bf16.msra.mxu0 %v3872_v48  ;;  %v156_v38 = vld [vmem:[#allocation14] ss:$8 sm:$0xf]  ;;  %v170_v48 = vsub.s32 2, %v4747_v37 }
  0xb1   :  { %2058 = vmatprep.subr.bf16.mxu0 %v3873_v49  ;;  %v157_v39 = vld [vmem:[#allocation14] ss:$8 sm:$0xf0] }
  0xb2   :  { %v4749_v40 = vor.u32 %v157_v39, %v156_v38  ;;  %v3945_v38 = vld [vmem:[#allocation7 + $0x260] ss:$16 sps:$4 sm:$0xff]   ;;  %v3948_v39 = vld [vmem:[#allocation7 + $0x268] ss:$16 sps:$4 sm:$0xff]  }
  0xb3   :  { %421 = vmatpush1.bf16.msra.mxu1 %v3323_v46 }
  0xb4   :  { %2216 = vmatprep.subr.bf16.mxu1 %v3835_v47  ;;  %2059 = vmatpush1.bf16.msra.mxu0 %v3878_v52  ;;  %v163_v43 = vrot.slane %v4749_v40, %v4752_v41  ;;  %v167_v44 = vrot.slane %v4749_v40, %v4755_v42 }
  0xb5   :  { %2060 = vmatprep.subr.bf16.mxu0 %v3879_v53 }
  0xb6   :  { %3328 = vmatmul.mubr.msk.bf16.vlgmr.msra.gmra.mrb[12].mxu1 %vm285_vm0, %v4734_v11  ;;  %v3877_v11 = vld [vmem:[#allocation7 + $0xec] ss:$16 sps:$4 sm:$0xff]  }
  0xb7   :  { %2217 = vmatpush1.bf16.msra.mxu1 %v3833_v50 }
  0xb8   :  { %2218 = vmatprep.subr.bf16.mxu1 %v3841_v51  ;;  %2061 = vmatpush1.bf16.msra.mxu0 %v3884_v56  ;;  %v174_v51 = vsub.s32 3, %v4747_v37 }
  0xb9   :  { %2062 = vmatprep.subr.bf16.mxu0 %v3885_v57  ;;  %v171_v57 = vrot.slane %v4749_v40, %v170_v48 }
  0xbb   :  { %2219 = vmatpush1.bf16.msra.mxu1 %v3839_v54 }
  0xbc   :  { %2220 = vmatprep.subr.bf16.mxu1 %v3847_v55  ;;  %2063 = vmatpush1.bf16.msra.mxu0 %v3890_v60  ;;  %v175_v60 = vrot.slane %v4749_v40, %v174_v51 }
  0xbd   :  { %2064 = vmatprep.subr.bf16.mxu0 %v3891_v61 }
  0xbf   :  { %2221 = vmatpush1.bf16.msra.mxu1 %v3845_v58 }
  0xc0   :  { %2222 = vmatprep.subr.bf16.mxu1 %v3853_v59  ;;  %2065 = vmatpush1.bf16.msra.mxu0 %v3896_v0  ;;  %v3930_v0 = vld [vmem:[#allocation7 + $0x208] ss:$16 sps:$4 sm:$0xff]  }
  0xc1   :  { %2066 = vmatprep.subr.bf16.mxu0 %v3897_v1 }
  0xc3   :  { %2223 = vmatpush1.bf16.msra.mxu1 %v3851_v62 }
  0xc4   :  { %2224 = vmatprep.subr.bf16.mxu1 %v3859_v63  ;;  %2067 = vmatpush1.bf16.msra.mxu0 %v3902_v4  ;;  %v3927_v63 = vld [vmem:[#allocation7 + $0x200] ss:$16 sps:$4 sm:$0xff]  }
  0xc5   :  { %2068 = vmatprep.subr.bf16.mxu0 %v3903_v5 }
  0xc7   :  { %2225 = vmatpush1.bf16.msra.mxu1 %v3857_v2  ;;  %v3935_v2 = vld [vmem:[#allocation7 + $0x224] ss:$16 sps:$4 sm:$0xff]  }
  0xc8   :  { %2226 = vmatprep.subr.bf16.mxu1 %v3865_v3  ;;  %2069 = vmatpush1.bf16.msra.mxu0 %v3908_v8  ;;  %v3938_v3 = vld [vmem:[#allocation7 + $0x22c] ss:$16 sps:$4 sm:$0xff]  }
  0xc9   :  { %2070 = vmatprep.subr.bf16.mxu0 %v3909_v9  ;;  %v182_v9 = vsub.s32 5, %v4747_v37 }
  0xcb   :  { %2227 = vmatpush1.bf16.msra.mxu1 %v3863_v6  ;;  %v178_v6 = vsub.s32 4, %v4747_v37 }
  0xcc   :  { %2228 = vmatprep.subr.bf16.mxu1 %v3871_v7  ;;  %2071 = vmatpush1.bf16.msra.mxu0 %v3914_v12 }
  0xcd   :  { %2072 = vmatprep.subr.bf16.mxu0 %v3915_v26 }
  0xcf   :  { %2229 = vmatpush1.bf16.msra.mxu1 %v3869_v10 }
  0xd0   :  { %2230 = vmatprep.subr.bf16.mxu1 %v3877_v11  ;;  %2073 = vmatpush1.bf16.msra.mxu0 %v3920_v29  ;;  %v3950_v29 = vld [vmem:[#allocation7 + $0x26c] ss:$16 sps:$4 sm:$0xff]  }
  0xd1   :  { %2074 = vmatprep.subr.bf16.mxu0 %v3921_v30 }
  0xd3   :  { %2231 = vmatpush1.bf16.msra.mxu1 %v3875_v13  ;;  %v3933_v13 = vld [vmem:[#allocation7 + $0x220] ss:$16 sps:$4 sm:$0xff]  }
  0xd4   :  { %2232 = vmatprep.subr.bf16.mxu1 %v3883_v14  ;;  %2075 = vmatpush1.bf16.msra.mxu0 %v3926_v33  ;;  %v3936_v14 = vld [vmem:[#allocation7 + $0x228] ss:$16 sps:$4 sm:$0xff]  }
  0xd5   :  { %2087 = vmatprep.subr.bf16.mxu0 %v3929_v34 }
  0xd7   :  { %2233 = vmatpush1.bf16.msra.mxu1 %v3881_v15 }
  0xd8   :  { %2234 = vmatprep.subr.bf16.mxu1 %v3889_v16 }
  0xdb   :  { %2235 = vmatpush1.bf16.msra.mxu1 %v3887_v17  ;;  %v3941_v17 = vld [vmem:[#allocation7 + $0x244] ss:$16 sps:$4 sm:$0xff]  }
  0xdc   :  { %2236 = vmatprep.subr.bf16.mxu1 %v3895_v18  ;;  %v3944_v18 = vld [vmem:[#allocation7 + $0x24c] ss:$16 sps:$4 sm:$0xff]  }
  0xdf   :  { %2237 = vmatpush1.bf16.msra.mxu1 %v3893_v19 }
  0xe0   :  { %2238 = vmatprep.subr.bf16.mxu1 %v3901_v20  ;;  %v179_v20 = vrot.slane %v4749_v40, %v178_v6  ;;  %v3978_v6 = vld [vmem:[#allocation7 + $0x308] ss:$16 sps:$4 sm:$0xff]  }
  0xe3   :  { %2239 = vmatpush1.bf16.msra.mxu1 %v3899_v21 }
  0xe4   :  { %2240 = vmatprep.subr.bf16.mxu1 %v3907_v22  ;;  %v183_v22 = vrot.slane %v4749_v40, %v182_v9  ;;  %v3981_v9 = vld [vmem:[#allocation7 + $0x320] ss:$16 sps:$4 sm:$0xff]  }
  0xe7   :  { %2241 = vmatpush1.bf16.msra.mxu1 %v3905_v23 }
  0xe8   :  { %2242 = vmatprep.subr.bf16.mxu1 %v3913_v24  ;;  %v3939_v24 = vld [vmem:[#allocation7 + $0x240] ss:$16 sps:$4 sm:$0xff]  }
  0xeb   :  { %2243 = vmatpush1.bf16.msra.mxu1 %v3911_v25  ;;  %v3942_v25 = vld [vmem:[#allocation7 + $0x248] ss:$16 sps:$4 sm:$0xff]  }
  0xec   :  { %2244 = vmatprep.subr.bf16.mxu1 %v3919_v27 }
  0xef   :  { %2245 = vmatpush1.bf16.msra.mxu1 %v3917_v28  ;;  %v3947_v28 = vld [vmem:[#allocation7 + $0x264] ss:$16 sps:$4 sm:$0xff]  }
  0xf0   :  { %2246 = vmatprep.subr.bf16.mxu1 %v3925_v31 }
  0xf3   :  { %2247 = vmatpush1.bf16.msra.mxu1 %v3923_v32 }
  0xf4   :  { %2259 = vmatprep.subr.bf16.mxu1 %v3932_v35 }
 0x171   :  { %v323_v45 = vpop.f32.mrb[0].mxu1 }
 0x172   :  { %v324_v46 = vadd.f32 %v323_v45, %v163_v43  ;;  %v325_v47 = vpop.f32.mrb[1].mxu1  ;;  %v3953_v45 = vld [vmem:[#allocation7 + $0x284] ss:$16 sps:$4 sm:$0xff]  }
 0x173   :  { %v326_v49 = vadd.f32 %v325_v47, %v167_v44  ;;  %v327_v50 = vpop.f32.mrb[2].mxu1 }
 0x174   :  { %v328_v52 = vadd.f32 %v327_v50, %v163_v43  ;;  %v329_v53 = vpop.f32.mrb[3].mxu1  ;;  %v461_v55 = vmax.f32 %v324_v46, 0.0  ;;  %v3956_v46 = vld [vmem:[#allocation7 + $0x28c] ss:$16 sps:$4 sm:$0xff]  }
 0x175   :  { %v330_v54 = vadd.f32 %v329_v53, %v167_v44  ;;  %v462_v58 = vmax.f32 %v326_v49, 0.0  ;;  %v3954_v53 = vld [vmem:[#allocation7 + $0x288] ss:$16 sps:$4 sm:$0xff]  }
 0x176   :  { %v469_v56 = vmax.f32 %v328_v52, 0.0  ;;  %v3951_v52 = vld [vmem:[#allocation7 + $0x280] ss:$16 sps:$4 sm:$0xff]  }
 0x177   :  { %v470_v59 = vmax.f32 %v330_v54, 0.0 }
 0x178   :  { %v477_v61 = vpack.c.bf16 %v469_v56, %v461_v55  ;;  %v3959_v55 = vld [vmem:[#allocation7 + $0x2a4] ss:$16 sps:$4 sm:$0xff]   ;;  %v3962_v56 = vld [vmem:[#allocation7 + $0x2ac] ss:$16 sps:$4 sm:$0xff]  }
 0x179   :  { %v478_v62 = vpack.c.bf16 %v470_v59, %v462_v58  ;;  %v366_v1 = vpop.f32.mrb[4].mxu1  ;;  %v3960_v58 = vld [vmem:[#allocation7 + $0x2a8] ss:$16 sps:$4 sm:$0xff]   ;;  %v3965_v59 = vld [vmem:[#allocation7 + $0x2c4] ss:$16 sps:$4 sm:$0xff]  }
 0x17a   :  { %v367_v4 = vadd.f32 %v366_v1, %v171_v57  ;;  %v368_v5 = vpop.f32.mrb[5].mxu1  ;;  %v3969_v1 = vld [vmem:[#allocation7 + $0x2e0] ss:$16 sps:$4 sm:$0xff]  }
 0x17b   :  { %2076 = vmatprep.mubr.bf16.mxu0 %v478_v62  ;;  %2248 = vmatprep.mubr.bf16.mxu1 %v478_v62  ;;  %v369_v7 = vadd.f32 %v368_v5, %v175_v60  ;;  %v370_v8 = vpop.f32.mrb[6].mxu1  ;;  %v3966_v62 = vld [vmem:[#allocation7 + $0x2c8] ss:$16 sps:$4 sm:$0xff]   ;;  %v3975_v5 = vld [vmem:[#allocation7 + $0x300] ss:$16 sps:$4 sm:$0xff]  }
 0x17c   :  { %2077 = vmatmul.mubr.bf16.vlgmr.msra.gmra.mrb[0].mxu0 %v477_v61  ;;  %2249 = vmatmul.mubr.bf16.vlgmr.msra.gmra.mrb[16].mxu1 %v477_v61  ;;  %v463_v10 = vmax.f32 %v367_v4, 0.0  ;;  %v371_v11 = vadd.f32 %v370_v8, %v171_v57  ;;  %v372_v12 = vpop.f32.mrb[7].mxu1  ;;  %v3957_v57 = vld [vmem:[#allocation7 + $0x2a0] ss:$16 sps:$4 sm:$0xff]   ;;  %v3980_v4 = vld [vmem:[#allocation7 + $0x30c] ss:$16 sps:$4 sm:$0xff]  }
 0x17d   :  { %2088 = vmatpush1.bf16.msra.mxu0 %v3927_v63  ;;  %2260 = vmatpush1.bf16.msra.mxu1 %v3930_v0  ;;  %v464_v15 = vmax.f32 %v369_v7, 0.0  ;;  %v373_v16 = vadd.f32 %v372_v12, %v175_v60  ;;  %v3968_v60 = vld [vmem:[#allocation7 + $0x2cc] ss:$16 sps:$4 sm:$0xff]   ;;  %v3963_v61 = vld [vmem:[#allocation7 + $0x2c0] ss:$16 sps:$4 sm:$0xff]  }
 0x17e   :  { %2089 = vmatprep.subr.bf16.mxu0 %v3935_v2  ;;  %2261 = vmatprep.subr.bf16.mxu1 %v3938_v3  ;;  %v471_v19 = vmax.f32 %v371_v11, 0.0  ;;  %v3971_v63 = vld [vmem:[#allocation7 + $0x2e4] ss:$16 sps:$4 sm:$0xff]   ;;  %v3974_v0 = vld [vmem:[#allocation7 + $0x2ec] ss:$16 sps:$4 sm:$0xff]  }
 0x17f   :  { %v472_v21 = vmax.f32 %v373_v16, 0.0  ;;  %v3972_v2 = vld [vmem:[#allocation7 + $0x2e8] ss:$16 sps:$4 sm:$0xff]   ;;  %v3977_v3 = vld [vmem:[#allocation7 + $0x304] ss:$16 sps:$4 sm:$0xff]  }
 0x180   :  { %v4773_v23 = vpack.c.bf16 %v471_v19, %v463_v10  ;;  %v3983_v7 = vld [vmem:[#allocation7 + $0x324] ss:$16 sps:$4 sm:$0xff]   ;;  %v3986_v8 = vld [vmem:[#allocation7 + $0x32c] ss:$16 sps:$4 sm:$0xff]   ;;  %v3984_v10 = vld [vmem:[#allocation7 + $0x328] ss:$16 sps:$4 sm:$0xff]  }
 0x181   :  { %2090 = vmatpush1.bf16.msra.mxu0 %v3933_v13  ;;  %2262 = vmatpush1.bf16.msra.mxu1 %v3936_v14  ;;  %v480_v26 = vpack.c.bf16 %v472_v21, %v464_v15  ;;  %v409_v27 = vpop.f32.mrb[8].mxu1  ;;  %v3989_v11 = vld [vmem:[#allocation7 + $0x344] ss:$16 sps:$4 sm:$0xff]   ;;  %v3992_v12 = vld [vmem:[#allocation7 + $0x34c] ss:$16 sps:$4 sm:$0xff]  }
 0x182   :  { %2091 = vmatprep.subr.bf16.mxu0 %v3941_v17  ;;  %2263 = vmatprep.subr.bf16.mxu1 %v3944_v18  ;;  %v410_v30 = vadd.f32 %v409_v27, %v179_v20  ;;  %v411_v31 = vpop.f32.mrb[9].mxu1  ;;  %v3987_v13 = vld [vmem:[#allocation7 + $0x340] ss:$16 sps:$4 sm:$0xff]   ;;  %v3990_v14 = vld [vmem:[#allocation7 + $0x348] ss:$16 sps:$4 sm:$0xff]  }
 0x183   :  { %2119 = vmatprep.mubr.bf16.mxu0 %v480_v26  ;;  %2291 = vmatprep.mubr.bf16.mxu1 %v480_v26  ;;  %v412_v32 = vadd.f32 %v411_v31, %v183_v22  ;;  %v413_v33 = vpop.f32.mrb[10].mxu1  ;;  %v3995_v15 = vld [vmem:[#allocation7 + $0x364] ss:$16 sps:$4 sm:$0xff]   ;;  %v3998_v16 = vld [vmem:[#allocation7 + $0x36c] ss:$16 sps:$4 sm:$0xff]  }
 0x184   :  { %v465_v34 = vmax.f32 %v410_v30, 0.0  ;;  %v414_v35 = vadd.f32 %v413_v33, %v179_v20  ;;  %v415_v36 = vpop.f32.mrb[11].mxu1  ;;  %v3993_v17 = vld [vmem:[#allocation7 + $0x360] ss:$16 sps:$4 sm:$0xff]   ;;  %v3996_v18 = vld [vmem:[#allocation7 + $0x368] ss:$16 sps:$4 sm:$0xff]  }
 0x185   :  { %2092 = vmatpush1.bf16.msra.mxu0 %v3939_v24  ;;  %2264 = vmatpush1.bf16.msra.mxu1 %v3942_v25  ;;  %v466_v43 = vmax.f32 %v412_v32, 0.0  ;;  %v416_v44 = vadd.f32 %v415_v36, %v183_v22  ;;  %v4001_v19 = vld [vmem:[#allocation7 + $0x384] ss:$16 sps:$4 sm:$0xff]   ;;  %v4004_v20 = vld [vmem:[#allocation7 + $0x38c] ss:$16 sps:$4 sm:$0xff]   ;;  %v190_v30 = vsub.s32 7, %v4747_v37 }
 0x186   :  { %2093 = vmatprep.subr.bf16.mxu0 %v3947_v28  ;;  %2265 = vmatprep.subr.bf16.mxu1 %v3950_v29  ;;  %v473_v47 = vmax.f32 %v414_v35, 0.0  ;;  %v3999_v21 = vld [vmem:[#allocation7 + $0x380] ss:$16 sps:$4 sm:$0xff]   ;;  %v4002_v22 = vld [vmem:[#allocation7 + $0x388] ss:$16 sps:$4 sm:$0xff]   ;;  %v186_v28 = vsub.s32 6, %v4747_v37 }
 0x187   :  { %v474_v49 = vmax.f32 %v416_v44, 0.0  ;;  %v4007_v24 = vld [vmem:[#allocation7 + $0x3a4] ss:$16 sps:$4 sm:$0xff]   ;;  %v4010_v25 = vld [vmem:[#allocation7 + $0x3ac] ss:$16 sps:$4 sm:$0xff]   ;;  %v191_v35 = vrot.slane %v4749_v40, %v190_v30 }
 0x188   :  { %v4775_v50 = vpack.c.bf16 %v473_v47, %v465_v34  ;;  %v4005_v26 = vld [vmem:[#allocation7 + $0x3a0] ss:$16 sps:$4 sm:$0xff]   ;;  %v4008_v27 = vld [vmem:[#allocation7 + $0x3a8] ss:$16 sps:$4 sm:$0xff]   ;;  %v4013_v31 = vld [vmem:[#allocation7 + $0x3c4] ss:$16 sps:$4 sm:$0xff]   ;;  %v187_v34 = vrot.slane %v4749_v40, %v186_v28 }
 0x189   :  { %2094 = vmatpush1.bf16.msra.mxu0 %v3945_v38  ;;  %2266 = vmatpush1.bf16.msra.mxu1 %v3948_v39  ;;  %v4777_v54 = vpack.c.bf16 %v474_v49, %v466_v43  ;;  %v452_v29 = vpop.f32.mrb[12].mxu1  ;;  %v4016_v32 = vld [vmem:[#allocation7 + $0x3cc] ss:$16 sps:$4 sm:$0xff]   ;;  %v4011_v39 = vld [vmem:[#allocation7 + $0x3c0] ss:$16 sps:$4 sm:$0xff]  }
 0x18a   :  { %2095 = vmatprep.subr.bf16.mxu0 %v3953_v45  ;;  %2267 = vmatprep.subr.bf16.mxu1 %v3956_v46  ;;  %v454_v33 = vpop.f32.mrb[13].mxu1  ;;  %v4014_v43 = vld [vmem:[#allocation7 + $0x3c8] ss:$16 sps:$4 sm:$0xff]   ;;  %v453_v44 = vadd.f32 %v452_v29, %v187_v34  ;;  %v4019_v47 = vld [vmem:[#allocation7 + $0x3e4] ss:$16 sps:$4 sm:$0xff]  }
 0x18b   :  { %v456_v36 = vpop.f32.mrb[14].mxu1  ;;  %v455_v45 = vadd.f32 %v454_v33, %v191_v35  ;;  %v4022_v49 = vld [vmem:[#allocation7 + $0x3ec] ss:$16 sps:$4 sm:$0xff]   ;;  %v4017_v40 = vld [vmem:[#allocation7 + $0x3e0] ss:$16 sps:$4 sm:$0xff]  }
 0x18c   :  { %v458_v38 = vpop.f32.mrb[15].mxu1  ;;  %v457_v46 = vadd.f32 %v456_v36, %v187_v34  ;;  %v4073_v28 = vld [vmem:[#allocation7 + $0x504] ss:$16 sps:$4 sm:$0xff]   ;;  %v4076_v29 = vld [vmem:[#allocation7 + $0x50c] ss:$16 sps:$4 sm:$0xff]  }
 0x18d   :  { %2096 = vmatpush1.bf16.msra.mxu0 %v3951_v52  ;;  %2268 = vmatpush1.bf16.msra.mxu1 %v3954_v53  ;;  %v459_v52 = vadd.f32 %v458_v38, %v191_v35  ;;  %v467_v53 = vmax.f32 %v453_v44, 0.0  ;;  %v4071_v30 = vld [vmem:[#allocation7 + $0x500] ss:$16 sps:$4 sm:$0xff]   ;;  %v4082_v33 = vld [vmem:[#allocation7 + $0x52c] ss:$16 sps:$4 sm:$0xff]  }
 0x18e   :  { %2097 = vmatprep.subr.bf16.mxu0 %v3959_v55  ;;  %2269 = vmatprep.subr.bf16.mxu1 %v3962_v56  ;;  %v468_v55 = vmax.f32 %v455_v45, 0.0  ;;  %v475_v56 = vmax.f32 %v457_v46, 0.0  ;;  %v4077_v34 = vld [vmem:[#allocation7 + $0x520] ss:$16 sps:$4 sm:$0xff]   ;;  %v4080_v35 = vld [vmem:[#allocation7 + $0x528] ss:$16 sps:$4 sm:$0xff]  }
 0x18f   :  { %v4085_v36 = vld [vmem:[#allocation7 + $0x544] ss:$16 sps:$4 sm:$0xff]   ;;  %v4088_v38 = vld [vmem:[#allocation7 + $0x54c] ss:$16 sps:$4 sm:$0xff]   ;;  %v4089_v46 = vld [vmem:[#allocation7 + $0x560] ss:$16 sps:$4 sm:$0xff]  }
 0x190   :  { %v4091_v44 = vld [vmem:[#allocation7 + $0x564] ss:$16 sps:$4 sm:$0xff]   ;;  %v4094_v45 = vld [vmem:[#allocation7 + $0x56c] ss:$16 sps:$4 sm:$0xff]  }
 0x191   :  { %2098 = vmatpush1.bf16.msra.mxu0 %v3957_v57  ;;  %2270 = vmatpush1.bf16.msra.mxu1 %v3960_v58  ;;  %v476_v57 = vmax.f32 %v459_v52, 0.0  ;;  %v4020_v58 = vld [vmem:[#allocation7 + $0x3e8] ss:$16 sps:$4 sm:$0xff]   ;;  %v4100_v52 = vld [vmem:[#allocation7 + $0x58c] ss:$16 sps:$4 sm:$0xff]  }
 0x192   :  { %2099 = vmatprep.subr.bf16.mxu0 %v3965_v59  ;;  %2271 = vmatprep.subr.bf16.mxu1 %v3968_v60  ;;  %v4783_v59 = vpack.c.bf16 %v475_v56, %v467_v53  ;;  %v4025_v60 = vld [vmem:[#allocation7 + $0x404] ss:$16 sps:$4 sm:$0xff]   ;;  %v4095_v53 = vld [vmem:[#allocation7 + $0x580] ss:$16 sps:$4 sm:$0xff]  }
 0x193   :  { %v4103_v56 = vld [vmem:[#allocation7 + $0x5a4] ss:$16 sps:$4 sm:$0xff]  }
 0x195   :  { %2100 = vmatpush1.bf16.msra.mxu0 %v3963_v61  ;;  %2272 = vmatpush1.bf16.msra.mxu1 %v3966_v62  ;;  %v4028_v61 = vld [vmem:[#allocation7 + $0x40c] ss:$16 sps:$4 sm:$0xff]   ;;  %v4785_v62 = vpack.c.bf16 %v476_v57, %v468_v55  ;;  %v4098_v55 = vld [vmem:[#allocation7 + $0x588] ss:$16 sps:$4 sm:$0xff]  }
 0x196   :  { %2101 = vmatprep.subr.bf16.mxu0 %v3971_v63  ;;  %2273 = vmatprep.subr.bf16.mxu1 %v3974_v0  ;;  %v4023_v63 = vld [vmem:[#allocation7 + $0x400] ss:$16 sps:$4 sm:$0xff]   ;;  %v4026_v0 = vld [vmem:[#allocation7 + $0x408] ss:$16 sps:$4 sm:$0xff]   ;;  %v4106_v57 = vld [vmem:[#allocation7 + $0x5ac] ss:$16 sps:$4 sm:$0xff]  }
 0x199   :  { %2102 = vmatpush1.bf16.msra.mxu0 %v3969_v1  ;;  %2274 = vmatpush1.bf16.msra.mxu1 %v3972_v2  ;;  %v4031_v1 = vld [vmem:[#allocation7 + $0x424] ss:$16 sps:$4 sm:$0xff]   ;;  %v4034_v2 = vld [vmem:[#allocation7 + $0x42c] ss:$16 sps:$4 sm:$0xff]  }
 0x19a   :  { %2103 = vmatprep.subr.bf16.mxu0 %v3977_v3  ;;  %2275 = vmatprep.subr.bf16.mxu1 %v3980_v4  ;;  %v4029_v3 = vld [vmem:[#allocation7 + $0x420] ss:$16 sps:$4 sm:$0xff]   ;;  %v4032_v4 = vld [vmem:[#allocation7 + $0x428] ss:$16 sps:$4 sm:$0xff]  }
 0x19d   :  { %2104 = vmatpush1.bf16.msra.mxu0 %v3975_v5  ;;  %2276 = vmatpush1.bf16.msra.mxu1 %v3978_v6  ;;  %v4037_v5 = vld [vmem:[#allocation7 + $0x444] ss:$16 sps:$4 sm:$0xff]   ;;  %v4040_v6 = vld [vmem:[#allocation7 + $0x44c] ss:$16 sps:$4 sm:$0xff]  }
 0x19e   :  { %2105 = vmatprep.subr.bf16.mxu0 %v3983_v7  ;;  %2277 = vmatprep.subr.bf16.mxu1 %v3986_v8  ;;  %v4035_v7 = vld [vmem:[#allocation7 + $0x440] ss:$16 sps:$4 sm:$0xff]   ;;  %v4038_v8 = vld [vmem:[#allocation7 + $0x448] ss:$16 sps:$4 sm:$0xff]  }
 0x1a1   :  { %2106 = vmatpush1.bf16.msra.mxu0 %v3981_v9  ;;  %2278 = vmatpush1.bf16.msra.mxu1 %v3984_v10  ;;  %v4043_v9 = vld [vmem:[#allocation7 + $0x464] ss:$16 sps:$4 sm:$0xff]   ;;  %v4041_v10 = vld [vmem:[#allocation7 + $0x460] ss:$16 sps:$4 sm:$0xff]  }
 0x1a2   :  { %2107 = vmatprep.subr.bf16.mxu0 %v3989_v11  ;;  %2279 = vmatprep.subr.bf16.mxu1 %v3992_v12  ;;  %v4044_v11 = vld [vmem:[#allocation7 + $0x468] ss:$16 sps:$4 sm:$0xff]   ;;  %v4049_v12 = vld [vmem:[#allocation7 + $0x484] ss:$16 sps:$4 sm:$0xff]  }
 0x1a5   :  { %2108 = vmatpush1.bf16.msra.mxu0 %v3987_v13  ;;  %2280 = vmatpush1.bf16.msra.mxu1 %v3990_v14  ;;  %v4052_v13 = vld [vmem:[#allocation7 + $0x48c] ss:$16 sps:$4 sm:$0xff]   ;;  %v4047_v14 = vld [vmem:[#allocation7 + $0x480] ss:$16 sps:$4 sm:$0xff]  }
 0x1a6   :  { %2109 = vmatprep.subr.bf16.mxu0 %v3995_v15  ;;  %2281 = vmatprep.subr.bf16.mxu1 %v3998_v16  ;;  %v4055_v15 = vld [vmem:[#allocation7 + $0x4a4] ss:$16 sps:$4 sm:$0xff]   ;;  %v4058_v16 = vld [vmem:[#allocation7 + $0x4ac] ss:$16 sps:$4 sm:$0xff]  }
 0x1a9   :  { %2110 = vmatpush1.bf16.msra.mxu0 %v3993_v17  ;;  %2282 = vmatpush1.bf16.msra.mxu1 %v3996_v18  ;;  %v4053_v17 = vld [vmem:[#allocation7 + $0x4a0] ss:$16 sps:$4 sm:$0xff]   ;;  %v4056_v18 = vld [vmem:[#allocation7 + $0x4a8] ss:$16 sps:$4 sm:$0xff]  }
 0x1aa   :  { %2111 = vmatprep.subr.bf16.mxu0 %v4001_v19  ;;  %2283 = vmatprep.subr.bf16.mxu1 %v4004_v20  ;;  %v4061_v19 = vld [vmem:[#allocation7 + $0x4c4] ss:$16 sps:$4 sm:$0xff]   ;;  %v4064_v20 = vld [vmem:[#allocation7 + $0x4cc] ss:$16 sps:$4 sm:$0xff]  }
 0x1ad   :  { %2112 = vmatpush1.bf16.msra.mxu0 %v3999_v21  ;;  %2284 = vmatpush1.bf16.msra.mxu1 %v4002_v22  ;;  %v4059_v21 = vld [vmem:[#allocation7 + $0x4c0] ss:$16 sps:$4 sm:$0xff]   ;;  %v4062_v22 = vld [vmem:[#allocation7 + $0x4c8] ss:$16 sps:$4 sm:$0xff]  }
 0x1ae   :  { %2113 = vmatprep.subr.bf16.mxu0 %v4007_v24  ;;  %2285 = vmatprep.subr.bf16.mxu1 %v4010_v25  ;;  %v4067_v24 = vld [vmem:[#allocation7 + $0x4e4] ss:$16 sps:$4 sm:$0xff]   ;;  %v4070_v25 = vld [vmem:[#allocation7 + $0x4ec] ss:$16 sps:$4 sm:$0xff]  }
 0x1b1   :  { %2114 = vmatpush1.bf16.msra.mxu0 %v4005_v26  ;;  %2286 = vmatpush1.bf16.msra.mxu1 %v4008_v27  ;;  %v4065_v26 = vld [vmem:[#allocation7 + $0x4e0] ss:$16 sps:$4 sm:$0xff]   ;;  %v4068_v27 = vld [vmem:[#allocation7 + $0x4e8] ss:$16 sps:$4 sm:$0xff]  }
 0x1b2   :  { %2115 = vmatprep.subr.bf16.mxu0 %v4013_v31  ;;  %2287 = vmatprep.subr.bf16.mxu1 %v4016_v32  ;;  %v4074_v31 = vld [vmem:[#allocation7 + $0x508] ss:$16 sps:$4 sm:$0xff]   ;;  %v4079_v32 = vld [vmem:[#allocation7 + $0x524] ss:$16 sps:$4 sm:$0xff]  }
 0x1b5   :  { %2116 = vmatpush1.bf16.msra.mxu0 %v4011_v39  ;;  %2288 = vmatpush1.bf16.msra.mxu1 %v4014_v43  ;;  %v4083_v39 = vld [vmem:[#allocation7 + $0x540] ss:$16 sps:$4 sm:$0xff]   ;;  %v4086_v43 = vld [vmem:[#allocation7 + $0x548] ss:$16 sps:$4 sm:$0xff]  }
 0x1b6   :  { %2117 = vmatprep.subr.bf16.mxu0 %v4019_v47  ;;  %2289 = vmatprep.subr.bf16.mxu1 %v4022_v49  ;;  %v4092_v47 = vld [vmem:[#allocation7 + $0x568] ss:$16 sps:$4 sm:$0xff]   ;;  %v4097_v49 = vld [vmem:[#allocation7 + $0x584] ss:$16 sps:$4 sm:$0xff]  }
 0x1b9   :  { %2118 = vmatpush1.bf16.msra.mxu0 %v4017_v40  ;;  %2290 = vmatpush1.bf16.msra.mxu1 %v4020_v58  ;;  %v4101_v40 = vld [vmem:[#allocation7 + $0x5a0] ss:$16 sps:$4 sm:$0xff]   ;;  %v4104_v58 = vld [vmem:[#allocation7 + $0x5a8] ss:$16 sps:$4 sm:$0xff]  }
 0x1ba   :  { %2130 = vmatprep.subr.bf16.mxu0 %v4025_v60  ;;  %2302 = vmatprep.subr.bf16.mxu1 %v4028_v61  ;;  %v4109_v60 = vld [vmem:[#allocation7 + $0x5c4] ss:$16 sps:$4 sm:$0xff]   ;;  %v4112_v61 = vld [vmem:[#allocation7 + $0x5cc] ss:$16 sps:$4 sm:$0xff]  }
 0x1bc   :  { %2120 = vmatmul.mubr.bf16.vlgmr.msra.gmra.mrb[0].mxu0 %v4773_v23  ;;  %2292 = vmatmul.mubr.bf16.vlgmr.msra.gmra.mrb[16].mxu1 %v4773_v23  ;;  %v4046_v23 = vld [vmem:[#allocation7 + $0x46c] ss:$16 sps:$4 sm:$0xff]  }
 0x1bd   :  { %2131 = vmatpush1.bf16.msra.mxu0 %v4023_v63  ;;  %2303 = vmatpush1.bf16.msra.mxu1 %v4026_v0  ;;  %v4107_v63 = vld [vmem:[#allocation7 + $0x5c0] ss:$16 sps:$4 sm:$0xff]   ;;  %v4110_v0 = vld [vmem:[#allocation7 + $0x5c8] ss:$16 sps:$4 sm:$0xff]  }
 0x1be   :  { %2132 = vmatprep.subr.bf16.mxu0 %v4031_v1  ;;  %2304 = vmatprep.subr.bf16.mxu1 %v4034_v2  ;;  %v4115_v1 = vld [vmem:[#allocation7 + $0x5e4] ss:$16 sps:$4 sm:$0xff]   ;;  %v4118_v2 = vld [vmem:[#allocation7 + $0x5ec] ss:$16 sps:$4 sm:$0xff]  }
 0x1bf   :  { %2162 = vmatprep.mubr.bf16.mxu0 %v4777_v54  ;;  %2334 = vmatprep.mubr.bf16.mxu1 %v4777_v54  ;;  %v4050_v54 = vld [vmem:[#allocation7 + $0x488] ss:$16 sps:$4 sm:$0xff]  }
 0x1c1   :  { %2133 = vmatpush1.bf16.msra.mxu0 %v4029_v3  ;;  %2305 = vmatpush1.bf16.msra.mxu1 %v4032_v4  ;;  %v4113_v3 = vld [vmem:[#allocation7 + $0x5e0] ss:$16 sps:$4 sm:$0xff]   ;;  %v4116_v4 = vld [vmem:[#allocation7 + $0x5e8] ss:$16 sps:$4 sm:$0xff]  }
 0x1c2   :  { %2134 = vmatprep.subr.bf16.mxu0 %v4037_v5  ;;  %2306 = vmatprep.subr.bf16.mxu1 %v4040_v6  ;;  %v4121_v5 = vld [vmem:[#allocation7 + $0x604] ss:$16 sps:$4 sm:$0xff]   ;;  %v4124_v6 = vld [vmem:[#allocation7 + $0x60c] ss:$16 sps:$4 sm:$0xff]  }
 0x1c5   :  { %2135 = vmatpush1.bf16.msra.mxu0 %v4035_v7  ;;  %2307 = vmatpush1.bf16.msra.mxu1 %v4038_v8  ;;  %v4119_v7 = vld [vmem:[#allocation7 + $0x600] ss:$16 sps:$4 sm:$0xff]   ;;  %v4122_v8 = vld [vmem:[#allocation7 + $0x608] ss:$16 sps:$4 sm:$0xff]  }
 0x1c6   :  { %2136 = vmatprep.subr.bf16.mxu0 %v4043_v9  ;;  %2308 = vmatprep.subr.bf16.mxu1 %v4046_v23  ;;  %v4127_v9 = vld [vmem:[#allocation7 + $0x624] ss:$16 sps:$4 sm:$0xff]   ;;  %v4130_v23 = vld [vmem:[#allocation7 + $0x62c] ss:$16 sps:$4 sm:$0xff]  }
 0x1c9   :  { %2137 = vmatpush1.bf16.msra.mxu0 %v4041_v10  ;;  %2309 = vmatpush1.bf16.msra.mxu1 %v4044_v11  ;;  %v4125_v10 = vld [vmem:[#allocation7 + $0x620] ss:$16 sps:$4 sm:$0xff]   ;;  %v4128_v11 = vld [vmem:[#allocation7 + $0x628] ss:$16 sps:$4 sm:$0xff]  }
 0x1ca   :  { %2138 = vmatprep.subr.bf16.mxu0 %v4049_v12  ;;  %2310 = vmatprep.subr.bf16.mxu1 %v4052_v13  ;;  %v4133_v12 = vld [vmem:[#allocation7 + $0x644] ss:$16 sps:$4 sm:$0xff]   ;;  %v4136_v13 = vld [vmem:[#allocation7 + $0x64c] ss:$16 sps:$4 sm:$0xff]  }
 0x1cd   :  { %2139 = vmatpush1.bf16.msra.mxu0 %v4047_v14  ;;  %2311 = vmatpush1.bf16.msra.mxu1 %v4050_v54  ;;  %v4131_v14 = vld [vmem:[#allocation7 + $0x640] ss:$16 sps:$4 sm:$0xff]   ;;  %v4134_v54 = vld [vmem:[#allocation7 + $0x648] ss:$16 sps:$4 sm:$0xff]  }
 0x1ce   :  { %2140 = vmatprep.subr.bf16.mxu0 %v4055_v15  ;;  %2312 = vmatprep.subr.bf16.mxu1 %v4058_v16  ;;  %v4139_v15 = vld [vmem:[#allocation7 + $0x664] ss:$16 sps:$4 sm:$0xff]   ;;  %v4137_v16 = vld [vmem:[#allocation7 + $0x660] ss:$16 sps:$4 sm:$0xff]  }
 0x1d1   :  { %2141 = vmatpush1.bf16.msra.mxu0 %v4053_v17  ;;  %2313 = vmatpush1.bf16.msra.mxu1 %v4056_v18  ;;  %v4140_v17 = vld [vmem:[#allocation7 + $0x668] ss:$16 sps:$4 sm:$0xff]   ;;  %v4145_v18 = vld [vmem:[#allocation7 + $0x684] ss:$16 sps:$4 sm:$0xff]  }
 0x1d2   :  { %2142 = vmatprep.subr.bf16.mxu0 %v4061_v19  ;;  %2314 = vmatprep.subr.bf16.mxu1 %v4064_v20  ;;  %v4148_v19 = vld [vmem:[#allocation7 + $0x68c] ss:$16 sps:$4 sm:$0xff]   ;;  %v4143_v20 = vld [vmem:[#allocation7 + $0x680] ss:$16 sps:$4 sm:$0xff]  }
 0x1d5   :  { %2143 = vmatpush1.bf16.msra.mxu0 %v4059_v21  ;;  %2315 = vmatpush1.bf16.msra.mxu1 %v4062_v22  ;;  %v4151_v21 = vld [vmem:[#allocation7 + $0x6a4] ss:$16 sps:$4 sm:$0xff]   ;;  %v4154_v22 = vld [vmem:[#allocation7 + $0x6ac] ss:$16 sps:$4 sm:$0xff]  }
 0x1d6   :  { %2144 = vmatprep.subr.bf16.mxu0 %v4067_v24  ;;  %2316 = vmatprep.subr.bf16.mxu1 %v4070_v25  ;;  %v4149_v24 = vld [vmem:[#allocation7 + $0x6a0] ss:$16 sps:$4 sm:$0xff]   ;;  %v4152_v25 = vld [vmem:[#allocation7 + $0x6a8] ss:$16 sps:$4 sm:$0xff]  }
 0x1d9   :  { %2145 = vmatpush1.bf16.msra.mxu0 %v4065_v26  ;;  %2317 = vmatpush1.bf16.msra.mxu1 %v4068_v27  ;;  %v4157_v26 = vld [vmem:[#allocation7 + $0x6c4] ss:$16 sps:$4 sm:$0xff]   ;;  %v4160_v27 = vld [vmem:[#allocation7 + $0x6cc] ss:$16 sps:$4 sm:$0xff]  }
 0x1da   :  { %2146 = vmatprep.subr.bf16.mxu0 %v4073_v28  ;;  %2318 = vmatprep.subr.bf16.mxu1 %v4076_v29  ;;  %v4155_v28 = vld [vmem:[#allocation7 + $0x6c0] ss:$16 sps:$4 sm:$0xff]   ;;  %v4158_v29 = vld [vmem:[#allocation7 + $0x6c8] ss:$16 sps:$4 sm:$0xff]  }
 0x1dd   :  { %2147 = vmatpush1.bf16.msra.mxu0 %v4071_v30  ;;  %2319 = vmatpush1.bf16.msra.mxu1 %v4074_v31  ;;  %v4163_v30 = vld [vmem:[#allocation7 + $0x6e4] ss:$16 sps:$4 sm:$0xff]   ;;  %v4166_v31 = vld [vmem:[#allocation7 + $0x6ec] ss:$16 sps:$4 sm:$0xff]  }
 0x1de   :  { %2148 = vmatprep.subr.bf16.mxu0 %v4079_v32  ;;  %2320 = vmatprep.subr.bf16.mxu1 %v4082_v33  ;;  %v4161_v32 = vld [vmem:[#allocation7 + $0x6e0] ss:$16 sps:$4 sm:$0xff]   ;;  %v4164_v33 = vld [vmem:[#allocation7 + $0x6e8] ss:$16 sps:$4 sm:$0xff]  }
 0x1e1   :  { %2149 = vmatpush1.bf16.msra.mxu0 %v4077_v34  ;;  %2321 = vmatpush1.bf16.msra.mxu1 %v4080_v35  ;;  %v4169_v34 = vld [vmem:[#allocation7 + $0x704] ss:$16 sps:$4 sm:$0xff]   ;;  %v4172_v35 = vld [vmem:[#allocation7 + $0x70c] ss:$16 sps:$4 sm:$0xff]  }
 0x1e2   :  { %2150 = vmatprep.subr.bf16.mxu0 %v4085_v36  ;;  %2322 = vmatprep.subr.bf16.mxu1 %v4088_v38  ;;  %v4167_v36 = vld [vmem:[#allocation7 + $0x700] ss:$16 sps:$4 sm:$0xff]   ;;  %v4170_v38 = vld [vmem:[#allocation7 + $0x708] ss:$16 sps:$4 sm:$0xff]  }
 0x1e5   :  { %2151 = vmatpush1.bf16.msra.mxu0 %v4083_v39  ;;  %2323 = vmatpush1.bf16.msra.mxu1 %v4086_v43  ;;  %v4175_v39 = vld [vmem:[#allocation7 + $0x724] ss:$16 sps:$4 sm:$0xff]   ;;  %v4178_v43 = vld [vmem:[#allocation7 + $0x72c] ss:$16 sps:$4 sm:$0xff]  }
 0x1e6   :  { %2152 = vmatprep.subr.bf16.mxu0 %v4091_v44  ;;  %2324 = vmatprep.subr.bf16.mxu1 %v4094_v45  ;;  %v4173_v44 = vld [vmem:[#allocation7 + $0x720] ss:$16 sps:$4 sm:$0xff]   ;;  %v4176_v45 = vld [vmem:[#allocation7 + $0x728] ss:$16 sps:$4 sm:$0xff]  }
 0x1e9   :  { %2153 = vmatpush1.bf16.msra.mxu0 %v4089_v46  ;;  %2325 = vmatpush1.bf16.msra.mxu1 %v4092_v47  ;;  %v4181_v46 = vld [vmem:[#allocation7 + $0x744] ss:$16 sps:$4 sm:$0xff]   ;;  %v4184_v47 = vld [vmem:[#allocation7 + $0x74c] ss:$16 sps:$4 sm:$0xff]  }
 0x1ea   :  { %2154 = vmatprep.subr.bf16.mxu0 %v4097_v49  ;;  %2326 = vmatprep.subr.bf16.mxu1 %v4100_v52  ;;  %v4179_v49 = vld [vmem:[#allocation7 + $0x740] ss:$16 sps:$4 sm:$0xff]   ;;  %v4182_v52 = vld [vmem:[#allocation7 + $0x748] ss:$16 sps:$4 sm:$0xff]  }
 0x1ed   :  { %2155 = vmatpush1.bf16.msra.mxu0 %v4095_v53  ;;  %2327 = vmatpush1.bf16.msra.mxu1 %v4098_v55  ;;  %v4187_v53 = vld [vmem:[#allocation7 + $0x764] ss:$16 sps:$4 sm:$0xff]   ;;  %v4190_v55 = vld [vmem:[#allocation7 + $0x76c] ss:$16 sps:$4 sm:$0xff]  }
 0x1ee   :  { %2156 = vmatprep.subr.bf16.mxu0 %v4103_v56  ;;  %2328 = vmatprep.subr.bf16.mxu1 %v4106_v57  ;;  %v4185_v56 = vld [vmem:[#allocation7 + $0x760] ss:$16 sps:$4 sm:$0xff]   ;;  %v4188_v57 = vld [vmem:[#allocation7 + $0x768] ss:$16 sps:$4 sm:$0xff]  }
 0x1f1   :  { %2157 = vmatpush1.bf16.msra.mxu0 %v4101_v40  ;;  %2329 = vmatpush1.bf16.msra.mxu1 %v4104_v58  ;;  %v4193_v40 = vld [vmem:[#allocation7 + $0x784] ss:$16 sps:$4 sm:$0xff]   ;;  %v4196_v58 = vld [vmem:[#allocation7 + $0x78c] ss:$16 sps:$4 sm:$0xff]  }
 0x1f2   :  { %2158 = vmatprep.subr.bf16.mxu0 %v4109_v60  ;;  %2330 = vmatprep.subr.bf16.mxu1 %v4112_v61  ;;  %v4191_v60 = vld [vmem:[#allocation7 + $0x780] ss:$16 sps:$4 sm:$0xff]   ;;  %v4194_v61 = vld [vmem:[#allocation7 + $0x788] ss:$16 sps:$4 sm:$0xff]  }
 0x1f5   :  { %2159 = vmatpush1.bf16.msra.mxu0 %v4107_v63  ;;  %2331 = vmatpush1.bf16.msra.mxu1 %v4110_v0  ;;  %v4199_v63 = vld [vmem:[#allocation7 + $0x7a4] ss:$16 sps:$4 sm:$0xff]   ;;  %v4202_v0 = vld [vmem:[#allocation7 + $0x7ac] ss:$16 sps:$4 sm:$0xff]  }
 0x1f6   :  { %2160 = vmatprep.subr.bf16.mxu0 %v4115_v1  ;;  %2332 = vmatprep.subr.bf16.mxu1 %v4118_v2  ;;  %v4197_v1 = vld [vmem:[#allocation7 + $0x7a0] ss:$16 sps:$4 sm:$0xff]   ;;  %v4200_v2 = vld [vmem:[#allocation7 + $0x7a8] ss:$16 sps:$4 sm:$0xff]  }
 0x1f9   :  { %2161 = vmatpush1.bf16.msra.mxu0 %v4113_v3  ;;  %2333 = vmatpush1.bf16.msra.mxu1 %v4116_v4  ;;  %v4205_v3 = vld [vmem:[#allocation7 + $0x7c4] ss:$16 sps:$4 sm:$0xff]   ;;  %v4208_v4 = vld [vmem:[#allocation7 + $0x7cc] ss:$16 sps:$4 sm:$0xff]  }
 0x1fa   :  { %2173 = vmatprep.subr.bf16.mxu0 %v4121_v5  ;;  %2345 = vmatprep.subr.bf16.mxu1 %v4124_v6  ;;  %v4203_v5 = vld [vmem:[#allocation7 + $0x7c0] ss:$16 sps:$4 sm:$0xff]   ;;  %v4206_v6 = vld [vmem:[#allocation7 + $0x7c8] ss:$16 sps:$4 sm:$0xff]  }
 0x1fc   :  { %2163 = vmatmul.mubr.bf16.vlgmr.msra.gmra.mrb[0].mxu0 %v4775_v50  ;;  %2335 = vmatmul.mubr.bf16.vlgmr.msra.gmra.mrb[16].mxu1 %v4775_v50  ;;  %v4142_v50 = vld [vmem:[#allocation7 + $0x66c] ss:$16 sps:$4 sm:$0xff]  }
 0x1fd   :  { %2174 = vmatpush1.bf16.msra.mxu0 %v4119_v7  ;;  %2346 = vmatpush1.bf16.msra.mxu1 %v4122_v8  ;;  %v4211_v7 = vld [vmem:[#allocation7 + $0x7e4] ss:$16 sps:$4 sm:$0xff]   ;;  %v4214_v8 = vld [vmem:[#allocation7 + $0x7ec] ss:$16 sps:$4 sm:$0xff]  }
 0x1fe   :  { %2175 = vmatprep.subr.bf16.mxu0 %v4127_v9  ;;  %2347 = vmatprep.subr.bf16.mxu1 %v4130_v23  ;;  %v4209_v9 = vld [vmem:[#allocation7 + $0x7e0] ss:$16 sps:$4 sm:$0xff]   ;;  %v4212_v23 = vld [vmem:[#allocation7 + $0x7e8] ss:$16 sps:$4 sm:$0xff]  }
 0x1ff   :  { %2205 = vmatprep.mubr.bf16.mxu0 %v4785_v62  ;;  %2377 = vmatprep.mubr.bf16.mxu1 %v4785_v62  ;;  %v4146_v62 = vld [vmem:[#allocation7 + $0x688] ss:$16 sps:$4 sm:$0xff]  }
 0x201   :  { %2176 = vmatpush1.bf16.msra.mxu0 %v4125_v10  ;;  %2348 = vmatpush1.bf16.msra.mxu1 %v4128_v11  ;;  %v4217_v10 = vld [vmem:[#allocation8 + $0x4] ss:$8 sps:$4 sm:$0xff]   ;;  %v4215_v11 = vld [vmem:[#allocation8] ss:$8 sps:$4 sm:$0xff]  }
 0x202   :  { %2177 = vmatprep.subr.bf16.mxu0 %v4133_v12  ;;  %2349 = vmatprep.subr.bf16.mxu1 %v4136_v13  ;;  %v4220_v12 = vld [vmem:[#allocation8 + $0x14] ss:$8 sps:$4 sm:$0xff]   ;;  %v4218_v13 = vld [vmem:[#allocation8 + $0x10] ss:$8 sps:$4 sm:$0xff]  }
 0x205   :  { %2178 = vmatpush1.bf16.msra.mxu0 %v4131_v14  ;;  %2350 = vmatpush1.bf16.msra.mxu1 %v4134_v54  ;;  %v4223_v14 = vld [vmem:[#allocation8 + $0x24] ss:$8 sps:$4 sm:$0xff]   ;;  %v4221_v54 = vld [vmem:[#allocation8 + $0x20] ss:$8 sps:$4 sm:$0xff]  }
 0x206   :  { %2179 = vmatprep.subr.bf16.mxu0 %v4139_v15  ;;  %2351 = vmatprep.subr.bf16.mxu1 %v4142_v50  ;;  %v4226_v15 = vld [vmem:[#allocation8 + $0x34] ss:$8 sps:$4 sm:$0xff]   ;;  %v4224_v50 = vld [vmem:[#allocation8 + $0x30] ss:$8 sps:$4 sm:$0xff]  }
 0x209   :  { %2180 = vmatpush1.bf16.msra.mxu0 %v4137_v16  ;;  %2352 = vmatpush1.bf16.msra.mxu1 %v4140_v17  ;;  %v4229_v16 = vld [vmem:[#allocation8 + $0x44] ss:$8 sps:$4 sm:$0xff]   ;;  %v4227_v17 = vld [vmem:[#allocation8 + $0x40] ss:$8 sps:$4 sm:$0xff]  }
 0x20a   :  { %2181 = vmatprep.subr.bf16.mxu0 %v4145_v18  ;;  %2353 = vmatprep.subr.bf16.mxu1 %v4148_v19  ;;  %v4232_v18 = vld [vmem:[#allocation8 + $0x54] ss:$8 sps:$4 sm:$0xff]   ;;  %v4230_v19 = vld [vmem:[#allocation8 + $0x50] ss:$8 sps:$4 sm:$0xff]  }
 0x20d   :  { %2182 = vmatpush1.bf16.msra.mxu0 %v4143_v20  ;;  %2354 = vmatpush1.bf16.msra.mxu1 %v4146_v62  ;;  %v4233_v20 = vld [vmem:[#allocation8 + $0x60] ss:$8 sps:$4 sm:$0xff]   ;;  %v4238_v62 = vld [vmem:[#allocation8 + $0x74] ss:$8 sps:$4 sm:$0xff]  }
 0x20e   :  { %2183 = vmatprep.subr.bf16.mxu0 %v4151_v21  ;;  %2355 = vmatprep.subr.bf16.mxu1 %v4154_v22  ;;  %v4236_v21 = vld [vmem:[#allocation8 + $0x70] ss:$8 sps:$4 sm:$0xff]   ;;  %v4241_v22 = vld [vmem:[#allocation8 + $0x84] ss:$8 sps:$4 sm:$0xff]  }
 0x211   :  { %2184 = vmatpush1.bf16.msra.mxu0 %v4149_v24  ;;  %2356 = vmatpush1.bf16.msra.mxu1 %v4152_v25  ;;  %v4239_v24 = vld [vmem:[#allocation8 + $0x80] ss:$8 sps:$4 sm:$0xff]   ;;  %v4244_v25 = vld [vmem:[#allocation8 + $0x94] ss:$8 sps:$4 sm:$0xff]  }
 0x212   :  { %2185 = vmatprep.subr.bf16.mxu0 %v4157_v26  ;;  %2357 = vmatprep.subr.bf16.mxu1 %v4160_v27  ;;  %v4242_v26 = vld [vmem:[#allocation8 + $0x90] ss:$8 sps:$4 sm:$0xff]   ;;  %v4247_v27 = vld [vmem:[#allocation8 + $0xa4] ss:$8 sps:$4 sm:$0xff]  }
 0x215   :  { %2186 = vmatpush1.bf16.msra.mxu0 %v4155_v28  ;;  %2358 = vmatpush1.bf16.msra.mxu1 %v4158_v29  ;;  %v4245_v28 = vld [vmem:[#allocation8 + $0xa0] ss:$8 sps:$4 sm:$0xff]   ;;  %v4250_v29 = vld [vmem:[#allocation8 + $0xb4] ss:$8 sps:$4 sm:$0xff]  }
 0x216   :  { %2187 = vmatprep.subr.bf16.mxu0 %v4163_v30  ;;  %2359 = vmatprep.subr.bf16.mxu1 %v4166_v31  ;;  %v4248_v30 = vld [vmem:[#allocation8 + $0xb0] ss:$8 sps:$4 sm:$0xff]   ;;  %v4253_v31 = vld [vmem:[#allocation8 + $0xc4] ss:$8 sps:$4 sm:$0xff]  }
 0x219   :  { %2188 = vmatpush1.bf16.msra.mxu0 %v4161_v32  ;;  %2360 = vmatpush1.bf16.msra.mxu1 %v4164_v33  ;;  %v4251_v32 = vld [vmem:[#allocation8 + $0xc0] ss:$8 sps:$4 sm:$0xff]   ;;  %v4256_v33 = vld [vmem:[#allocation8 + $0xd4] ss:$8 sps:$4 sm:$0xff]  }
 0x21a   :  { %2189 = vmatprep.subr.bf16.mxu0 %v4169_v34  ;;  %2361 = vmatprep.subr.bf16.mxu1 %v4172_v35  ;;  %v4254_v34 = vld [vmem:[#allocation8 + $0xd0] ss:$8 sps:$4 sm:$0xff]   ;;  %v4259_v35 = vld [vmem:[#allocation8 + $0xe4] ss:$8 sps:$4 sm:$0xff]  }
 0x21d   :  { %2190 = vmatpush1.bf16.msra.mxu0 %v4167_v36  ;;  %2362 = vmatpush1.bf16.msra.mxu1 %v4170_v38  ;;  %v4257_v36 = vld [vmem:[#allocation8 + $0xe0] ss:$8 sps:$4 sm:$0xff]   ;;  %v4262_v38 = vld [vmem:[#allocation8 + $0xf4] ss:$8 sps:$4 sm:$0xff]  }
 0x21e   :  { %2191 = vmatprep.subr.bf16.mxu0 %v4175_v39  ;;  %2363 = vmatprep.subr.bf16.mxu1 %v4178_v43  ;;  %v4260_v39 = vld [vmem:[#allocation8 + $0xf0] ss:$8 sps:$4 sm:$0xff]   ;;  %v4265_v43 = vld [vmem:[#allocation8 + $0x104] ss:$8 sps:$4 sm:$0xff]  }
 0x221   :  { %2192 = vmatpush1.bf16.msra.mxu0 %v4173_v44  ;;  %2364 = vmatpush1.bf16.msra.mxu1 %v4176_v45  ;;  %v4311_v44 = vld [vmem:[#allocation10 + $0x40] sm:$0xff]  }
 0x222   :  { %2193 = vmatprep.subr.bf16.mxu0 %v4181_v46  ;;  %2365 = vmatprep.subr.bf16.mxu1 %v4184_v47  ;;  %v4312_v45 = vld [vmem:[#allocation10] sm:$0xff]   ;;  %v4313_v46 = vld [vmem:[#allocation10 + $0x48] sm:$0xff]  }
 0x223   :  { %v4314_v47 = vld [vmem:[#allocation10 + $0x8] sm:$0xff]  }
 0x225   :  { %2194 = vmatpush1.bf16.msra.mxu0 %v4179_v49  ;;  %2366 = vmatpush1.bf16.msra.mxu1 %v4182_v52  ;;  %v4315_v49 = vld [vmem:[#allocation10 + $0x50] sm:$0xff]  }
 0x226   :  { %2195 = vmatprep.subr.bf16.mxu0 %v4187_v53  ;;  %2367 = vmatprep.subr.bf16.mxu1 %v4190_v55  ;;  %v4316_v52 = vld [vmem:[#allocation10 + $0x10] sm:$0xff]   ;;  %v4317_v53 = vld [vmem:[#allocation10 + $0x58] sm:$0xff]  }
 0x227   :  { %v4318_v55 = vld [vmem:[#allocation10 + $0x18] sm:$0xff]  }
 0x229   :  { %2196 = vmatpush1.bf16.msra.mxu0 %v4185_v56  ;;  %2368 = vmatpush1.bf16.msra.mxu1 %v4188_v57  ;;  %v4319_v56 = vld [vmem:[#allocation10 + $0x60] sm:$0xff]  }
 0x22a   :  { %2197 = vmatprep.subr.bf16.mxu0 %v4193_v40  ;;  %2369 = vmatprep.subr.bf16.mxu1 %v4196_v58  ;;  %v4320_v57 = vld [vmem:[#allocation10 + $0x20] sm:$0xff]   ;;  %v4321_v40 = vld [vmem:[#allocation10 + $0x68] sm:$0xff]  }
 0x22b   :  { %v742_v58 = vld [vmem:[#allocation14 + $0x1] ss:$8 sm:$0xf] }
 0x22d   :  { %2198 = vmatpush1.bf16.msra.mxu0 %v4191_v60  ;;  %2370 = vmatpush1.bf16.msra.mxu1 %v4194_v61  ;;  %v747_v60 = vrot.slane %v742_v58, %v4752_v41  ;;  %v755_v61 = vrot.slane %v742_v58, %v170_v48 }
 0x22e   :  { %2199 = vmatprep.subr.bf16.mxu0 %v4199_v63  ;;  %2371 = vmatprep.subr.bf16.mxu1 %v4202_v0  ;;  %v751_v63 = vrot.slane %v742_v58, %v4755_v42  ;;  %v759_v0 = vrot.slane %v742_v58, %v174_v51  ;;  %v4310_v58 = vld [vmem:[#allocation8 + $0x1f4] ss:$8 sps:$4 sm:$0xff]  }
 0x231   :  { %2200 = vmatpush1.bf16.msra.mxu0 %v4197_v1  ;;  %2372 = vmatpush1.bf16.msra.mxu1 %v4200_v2 }
 0x232   :  { %2201 = vmatprep.subr.bf16.mxu0 %v4205_v3  ;;  %2373 = vmatprep.subr.bf16.mxu1 %v4208_v4 }
 0x235   :  { %2202 = vmatpush1.bf16.msra.mxu0 %v4203_v5  ;;  %2374 = vmatpush1.bf16.msra.mxu1 %v4206_v6 }
 0x236   :  { %2203 = vmatprep.subr.bf16.mxu0 %v4211_v7  ;;  %2375 = vmatprep.subr.bf16.mxu1 %v4214_v8 }
 0x239   :  { %2204 = vmatpush1.bf16.msra.mxu0 %v4209_v9  ;;  %2376 = vmatpush1.bf16.msra.mxu1 %v4212_v23 }
 0x23a   :  { %2797 = vmatprep.subr.bf16.mxu0 %v4217_v10  ;;  %3690 = vmatprep.subr.bf16.mxu1 %v4311_v44  ;;  %v4290_v44 = vld [vmem:[#allocation8 + $0x190] ss:$8 sps:$4 sm:$0xff]  }
 0x23c   :  { %2206 = vmatmul.mubr.bf16.vlgmr.msra.gmra.mrb[0].mxu0 %v4783_v59  ;;  %2378 = vmatmul.mubr.bf16.vlgmr.msra.gmra.mrb[16].mxu1 %v4783_v59  ;;  %v4235_v59 = vld [vmem:[#allocation8 + $0x64] ss:$8 sps:$4 sm:$0xff]  }
 0x23d   :  { %2798 = vmatpush1.bf16.msra.mxu0 %v4215_v11  ;;  %3691 = vmatpush3.bf16.msra.mxu1 %v4312_v45  ;;  %v4295_v45 = vld [vmem:[#allocation8 + $0x1a4] ss:$8 sps:$4 sm:$0xff]  }
 0x23e   :  { %2799 = vmatprep.subr.bf16.mxu0 %v4220_v12  ;;  %3692 = vmatprep.subr.bf16.mxu1 %v4313_v46  ;;  %v4293_v46 = vld [vmem:[#allocation8 + $0x1a0] ss:$8 sps:$4 sm:$0xff]  }
 0x241   :  { %2800 = vmatpush1.bf16.msra.mxu0 %v4218_v13  ;;  %3693 = vmatpush3.bf16.msra.mxu1 %v4314_v47  ;;  %v4298_v47 = vld [vmem:[#allocation8 + $0x1b4] ss:$8 sps:$4 sm:$0xff]  }
 0x242   :  { %2801 = vmatprep.subr.bf16.mxu0 %v4223_v14  ;;  %3694 = vmatprep.subr.bf16.mxu1 %v4315_v49  ;;  %v4296_v49 = vld [vmem:[#allocation8 + $0x1b0] ss:$8 sps:$4 sm:$0xff]  }
 0x245   :  { %2802 = vmatpush1.bf16.msra.mxu0 %v4221_v54  ;;  %3695 = vmatpush3.bf16.msra.mxu1 %v4316_v52  ;;  %v4301_v52 = vld [vmem:[#allocation8 + $0x1c4] ss:$8 sps:$4 sm:$0xff]  }
 0x246   :  { %2803 = vmatprep.subr.bf16.mxu0 %v4226_v15  ;;  %3696 = vmatprep.subr.bf16.mxu1 %v4317_v53  ;;  %v4299_v53 = vld [vmem:[#allocation8 + $0x1c0] ss:$8 sps:$4 sm:$0xff]  }
 0x249   :  { %2804 = vmatpush1.bf16.msra.mxu0 %v4224_v50  ;;  %3697 = vmatpush3.bf16.msra.mxu1 %v4318_v55  ;;  %v4304_v55 = vld [vmem:[#allocation8 + $0x1d4] ss:$8 sps:$4 sm:$0xff]  }
 0x24a   :  { %2805 = vmatprep.subr.bf16.mxu0 %v4229_v16  ;;  %3698 = vmatprep.subr.bf16.mxu1 %v4319_v56  ;;  %v4302_v56 = vld [vmem:[#allocation8 + $0x1d0] ss:$8 sps:$4 sm:$0xff]  }
 0x24d   :  { %2806 = vmatpush1.bf16.msra.mxu0 %v4227_v17  ;;  %3699 = vmatpush3.bf16.msra.mxu1 %v4320_v57  ;;  %v4307_v57 = vld [vmem:[#allocation8 + $0x1e4] ss:$8 sps:$4 sm:$0xff]  }
 0x24e   :  { %2807 = vmatprep.subr.bf16.mxu0 %v4232_v18  ;;  %3700 = vmatprep.subr.bf16.mxu1 %v4321_v40  ;;  %v4305_v40 = vld [vmem:[#allocation8 + $0x1e0] ss:$8 sps:$4 sm:$0xff]  }
 0x251   :  { %2808 = vmatpush1.bf16.msra.mxu0 %v4230_v19 }
 0x252   :  { %2809 = vmatprep.subr.bf16.mxu0 %v4235_v59 }
 0x255   :  { %2810 = vmatpush1.bf16.msra.mxu0 %v4233_v20 }
 0x256   :  { %2811 = vmatprep.subr.bf16.mxu0 %v4238_v62 }
 0x259   :  { %2812 = vmatpush1.bf16.msra.mxu0 %v4236_v21  ;;  %v4263_v21 = vld [vmem:[#allocation8 + $0x100] ss:$8 sps:$4 sm:$0xff]  }
 0x25a   :  { %2813 = vmatprep.subr.bf16.mxu0 %v4241_v22  ;;  %v4268_v22 = vld [vmem:[#allocation8 + $0x114] ss:$8 sps:$4 sm:$0xff]  }
 0x25d   :  { %2814 = vmatpush1.bf16.msra.mxu0 %v4239_v24  ;;  %v4266_v24 = vld [vmem:[#allocation8 + $0x110] ss:$8 sps:$4 sm:$0xff]  }
 0x25e   :  { %2815 = vmatprep.subr.bf16.mxu0 %v4244_v25  ;;  %v4271_v25 = vld [vmem:[#allocation8 + $0x124] ss:$8 sps:$4 sm:$0xff]  }
 0x261   :  { %2816 = vmatpush1.bf16.msra.mxu0 %v4242_v26  ;;  %v4269_v26 = vld [vmem:[#allocation8 + $0x120] ss:$8 sps:$4 sm:$0xff]  }
 0x262   :  { %2817 = vmatprep.subr.bf16.mxu0 %v4247_v27  ;;  %v4274_v27 = vld [vmem:[#allocation8 + $0x134] ss:$8 sps:$4 sm:$0xff]  }
 0x265   :  { %2818 = vmatpush1.bf16.msra.mxu0 %v4245_v28  ;;  %v4272_v28 = vld [vmem:[#allocation8 + $0x130] ss:$8 sps:$4 sm:$0xff]  }
 0x266   :  { %2819 = vmatprep.subr.bf16.mxu0 %v4250_v29  ;;  %v4277_v29 = vld [vmem:[#allocation8 + $0x144] ss:$8 sps:$4 sm:$0xff]  }
 0x269   :  { %2820 = vmatpush1.bf16.msra.mxu0 %v4248_v30  ;;  %v4275_v30 = vld [vmem:[#allocation8 + $0x140] ss:$8 sps:$4 sm:$0xff]  }
 0x26a   :  { %2821 = vmatprep.subr.bf16.mxu0 %v4253_v31  ;;  %v4280_v31 = vld [vmem:[#allocation8 + $0x154] ss:$8 sps:$4 sm:$0xff]  }
 0x26d   :  { %2822 = vmatpush1.bf16.msra.mxu0 %v4251_v32  ;;  %v4278_v32 = vld [vmem:[#allocation8 + $0x150] ss:$8 sps:$4 sm:$0xff]  }
 0x26e   :  { %2823 = vmatprep.subr.bf16.mxu0 %v4256_v33  ;;  %v4283_v33 = vld [vmem:[#allocation8 + $0x164] ss:$8 sps:$4 sm:$0xff]  }
 0x271   :  { %2824 = vmatpush1.bf16.msra.mxu0 %v4254_v34  ;;  %v4281_v34 = vld [vmem:[#allocation8 + $0x160] ss:$8 sps:$4 sm:$0xff]  }
 0x272   :  { %2825 = vmatprep.subr.bf16.mxu0 %v4259_v35  ;;  %v4286_v35 = vld [vmem:[#allocation8 + $0x174] ss:$8 sps:$4 sm:$0xff]  }
 0x275   :  { %2826 = vmatpush1.bf16.msra.mxu0 %v4257_v36  ;;  %v4284_v36 = vld [vmem:[#allocation8 + $0x170] ss:$8 sps:$4 sm:$0xff]  }
 0x276   :  { %2827 = vmatprep.subr.bf16.mxu0 %v4262_v38  ;;  %v4289_v38 = vld [vmem:[#allocation8 + $0x184] ss:$8 sps:$4 sm:$0xff]  }
 0x279   :  { %2828 = vmatpush1.bf16.msra.mxu0 %v4260_v39  ;;  %v4287_v39 = vld [vmem:[#allocation8 + $0x180] ss:$8 sps:$4 sm:$0xff]  }
 0x27a   :  { %2840 = vmatprep.subr.bf16.mxu0 %v4265_v43  ;;  %v4292_v43 = vld [vmem:[#allocation8 + $0x194] ss:$8 sps:$4 sm:$0xff]  }
 0x30f   :  { %v2207_v1 = vpop.f32.mrb[0].mxu0  ;;  %v2379_v2 = vpop.f32.mrb[16].mxu1 }
 0x310   :  { %v3770_v3 = vadd.f32 %v2207_v1, %v747_v60  ;;  %v3774_v4 = vadd.f32 %v2379_v2, %v755_v61  ;;  %v2209_v5 = vpop.f32.mrb[1].mxu0  ;;  %v2381_v6 = vpop.f32.mrb[17].mxu1  ;;  %v4325_v1 = vld [vmem:[#allocation10 + $0x78] sm:$0xff]  }
 0x311   :  { %v3771_v7 = vadd.f32 %v2209_v5, %v751_v63  ;;  %v3775_v8 = vadd.f32 %v2381_v6, %v759_v0  ;;  %v2211_v9 = vpop.f32.mrb[2].mxu0  ;;  %v2383_v23 = vpop.f32.mrb[18].mxu1  ;;  %v4326_v2 = vld [vmem:[#allocation10 + $0x38] sm:$0xff]  }
 0x312   :  { %v3772_v10 = vadd.f32 %v2211_v9, %v747_v60  ;;  %v3776_v11 = vadd.f32 %v2383_v23, %v755_v61  ;;  %v2213_v12 = vpop.f32.mrb[3].mxu0  ;;  %v2385_v13 = vpop.f32.mrb[19].mxu1  ;;  %v2388_v54 = vmax.f32 %v3770_v3, 0.0  ;;  %v2390_v15 = vmax.f32 %v3774_v4, 0.0  ;;  %v4308_v60 = vld [vmem:[#allocation8 + $0x1f0] ss:$8 sps:$4 sm:$0xff]  }
 0x313   :  { %v3773_v48 = vadd.f32 %v2213_v12, %v751_v63  ;;  %v3777_v14 = vadd.f32 %v2385_v13, %v759_v0  ;;  %v2389_v50 = vmax.f32 %v3771_v7, 0.0  ;;  %v2391_v16 = vmax.f32 %v3775_v8, 0.0  ;;  %v4322_v61 = vld [vmem:[#allocation10 + $0x28] sm:$0xff]   ;;  %v4323_v63 = vld [vmem:[#allocation10 + $0x70] sm:$0xff]  }
 0x314   :  { %v2392_v37 = vmax.f32 %v3772_v10, 0.0  ;;  %v2394_v51 = vmax.f32 %v3776_v11, 0.0  ;;  %3701 = vmatpush3.bf16.msra.mxu1 %v4322_v61  ;;  %v4324_v0 = vld [vmem:[#allocation10 + $0x30] sm:$0xff]   ;;  %v4570_v3 = vmov 0.0  }
 0x315   :  { %v2393_v17 = vmax.f32 %v3773_v48, 0.0  ;;  %v2395_v18 = vmax.f32 %v3777_v14, 0.0  ;;  %3702 = vmatprep.subr.bf16.mxu1 %v4323_v63  ;;  %v2465_v4 = vld [vmem:[#allocation14 + $0x2] ss:$8 sm:$0x3] }
 0x316   :  { %v2396_v19 = vpack.c.bf16 %v2392_v37, %v2388_v54  ;;  %v4803_v59 = vpack.c.bf16 %v2394_v51, %v2390_v15  ;;  %v2470_v5 = vrot.slane %v2465_v4, %v4752_v41  ;;  %v2474_v6 = vrot.slane %v2465_v4, %v4755_v42  ;;  %v4328_v41 = vld [vmem:[#allocation11 + $0x8] sm:$0xff]   ;;  %v4329_v42 = vld [vmem:[#allocation11 + $0x10] sm:$0xff]  }
 0x317   :  { %v2397_v20 = vpack.c.bf16 %v2393_v17, %v2389_v50  ;;  %v2399_v62 = vpack.c.bf16 %v2395_v18, %v2391_v16  ;;  %v4327_v50 = vld [vmem:[#allocation11] sm:$0xff]   ;;  %v4330_v16 = vld [vmem:[#allocation11 + $0x18] sm:$0xff]   ;;  %v4332_v18 = vld [vmem:[#allocation11 + $0x28] sm:$0xff]  }
 0x318   :  { %3703 = vmatpush3.bf16.msra.mxu1 %v4324_v0  ;;  %v4331_v17 = vld [vmem:[#allocation11 + $0x20] sm:$0xff]  }
 0x319   :  { %2829 = vmatprep.mubr.bf16.mxu0 %v2397_v20  ;;  %3704 = vmatprep.subr.bf16.mxu1 %v4325_v1 }
 0x31a   :  { %2830 = vmatmul.mubr.bf16.vlgmr.msra.gmra.mrb[4].mxu0 %v2396_v19  ;;  %v4333_v19 = vld [vmem:[#allocation11 + $0x30] sm:$0xff]  }
 0x31b   :  { %2841 = vmatpush1.bf16.msra.mxu0 %v4263_v21  ;;  %2872 = vmatprep.mubr.bf16.mxu0 %v2399_v62  ;;  %v2921_v62 = vld [vmem:[#allocation14 + $0x3] ss:$0 sm:$0xff] }
 0x31c   :  { %2842 = vmatprep.subr.bf16.mxu0 %v4268_v22  ;;  %3705 = vmatpush3.bf16.msra.mxu1 %v4326_v2 }
 0x31d   :  { %3730 = vmatprep.subr.bf16.mxu1 %v4570_v3 }
 0x31f   :  { %2843 = vmatpush1.bf16.msra.mxu0 %v4266_v24 }
 0x320   :  { %2844 = vmatprep.subr.bf16.mxu0 %v4271_v25 }
 0x323   :  { %2845 = vmatpush1.bf16.msra.mxu0 %v4269_v26 }
 0x324   :  { %2846 = vmatprep.subr.bf16.mxu0 %v4274_v27 }
 0x327   :  { %2847 = vmatpush1.bf16.msra.mxu0 %v4272_v28 }
 0x328   :  { %2848 = vmatprep.subr.bf16.mxu0 %v4277_v29 }
 0x32b   :  { %2849 = vmatpush1.bf16.msra.mxu0 %v4275_v30 }
 0x32c   :  { %2850 = vmatprep.subr.bf16.mxu0 %v4280_v31  ;;  %v4335_v31 = vld [vmem:[#allocation13] sm:$0xff]  }
 0x32f   :  { %2851 = vmatpush1.bf16.msra.mxu0 %v4278_v32 }
 0x330   :  { %2852 = vmatprep.subr.bf16.mxu0 %v4283_v33  ;;  %v4336_v33 = vld [vmem:[#allocation13 + $0x8] sm:$0xff]  }
 0x333   :  { %2853 = vmatpush1.bf16.msra.mxu0 %v4281_v34  ;;  %v4337_v34 = vld [vmem:[#allocation13 + $0x10] sm:$0xff]  }
 0x334   :  { %2854 = vmatprep.subr.bf16.mxu0 %v4286_v35  ;;  %v4338_v35 = vld [vmem:[#allocation13 + $0x18] sm:$0xff]  }
 0x337   :  { %2855 = vmatpush1.bf16.msra.mxu0 %v4284_v36  ;;  %v4339_v36 = vld [vmem:[#allocation13 + $0x20] sm:$0xff]  }
 0x338   :  { %2856 = vmatprep.subr.bf16.mxu0 %v4289_v38  ;;  %v4340_v38 = vld [vmem:[#allocation13 + $0x28] sm:$0xff]  }
 0x33b   :  { %2857 = vmatpush1.bf16.msra.mxu0 %v4287_v39  ;;  %v4341_v39 = vld [vmem:[#allocation13 + $0x30] sm:$0xff]  }
 0x33c   :  { %2858 = vmatprep.subr.bf16.mxu0 %v4292_v43  ;;  %v4342_v43 = vld [vmem:[#allocation13 + $0x38] sm:$0xff]  }
 0x33f   :  { %2859 = vmatpush1.bf16.msra.mxu0 %v4290_v44  ;;  %v3078_v44 = vld [vmem:[#allocation14 + $0x4] ss:$0 sm:$0xff] }
 0x340   :  { %2860 = vmatprep.subr.bf16.mxu0 %v4295_v45 }
 0x343   :  { %2861 = vmatpush1.bf16.msra.mxu0 %v4293_v46 }
 0x344   :  { %2862 = vmatprep.subr.bf16.mxu0 %v4298_v47 }
 0x347   :  { %2863 = vmatpush1.bf16.msra.mxu0 %v4296_v49 }
 0x348   :  { %2864 = vmatprep.subr.bf16.mxu0 %v4301_v52 }
 0x34b   :  { %2865 = vmatpush1.bf16.msra.mxu0 %v4299_v53 }
 0x34c   :  { %2866 = vmatprep.subr.bf16.mxu0 %v4304_v55 }
 0x34f   :  { %2867 = vmatpush1.bf16.msra.mxu0 %v4302_v56 }
 0x350   :  { %2868 = vmatprep.subr.bf16.mxu0 %v4307_v57 }
 0x353   :  { %2869 = vmatpush1.bf16.msra.mxu0 %v4305_v40  ;;  %v3187_v40 = vld [vmem:[#allocation14 + $0x5] ss:$0 sm:$0xff] }
 0x354   :  { %2870 = vmatprep.subr.bf16.mxu0 %v4310_v58 }
 0x357   :  { %2871 = vmatpush1.bf16.msra.mxu0 %v4308_v60 }
 0x35a   :  { %2873 = vmatmul.mubr.bf16.vlgmr.msra.gmra.mrb[4].mxu0 %v4803_v59  ;;  %v4334_v59 = vld [vmem:[#allocation11 + $0x38] sm:$0xff]  }
 0x42d   :  { %v2874_v7 = vpop.f32.mrb[4].mxu0 }
 0x42e   :  { %v3778_v8 = vadd.f32 %v2874_v7, %v2470_v5  ;;  %v2876_v9 = vpop.f32.mrb[5].mxu0 }
 0x42f   :  { %v3779_v23 = vadd.f32 %v2876_v9, %v2474_v6  ;;  %v2878_v10 = vpop.f32.mrb[6].mxu0 }
 0x430   :  { %v3780_v11 = vadd.f32 %v2878_v10, %v2470_v5  ;;  %v2880_v12 = vpop.f32.mrb[7].mxu0  ;;  %v2883_v48 = vmax.f32 %v3778_v8, 0.0 }
 0x431   :  { %v3781_v13 = vadd.f32 %v2880_v12, %v2474_v6  ;;  %v2884_v54 = vmax.f32 %v3779_v23, 0.0 }
 0x432   :  { %v2885_v14 = vmax.f32 %v3780_v11, 0.0 }
 0x433   :  { %v2886_v15 = vmax.f32 %v3781_v13, 0.0 }
 0x434   :  { %v2887_v37 = vpack.c.bf16 %v2885_v14, %v2883_v48 }
 0x435   :  { %v2888_v51 = vpack.c.bf16 %v2886_v15, %v2884_v54 }
 0x437   :  { %3050 = vmatprep.mubr.bf16.mxu1 %v2888_v51 }
 0x438   :  { %3051 = vmatmul.mubr.bf16.vlgmr.msra.gmra.mrb[20].mxu1 %v2887_v37 }
 0x439   :  { %3731 = vmatpush3.bf16.msra.mxu1 %v4327_v50  ;;  %3746 = vmatprep.mubr.msk.bf16.mxu1 %vm4571_vm1, %v4570_v3 }
 0x43a   :  { %3732 = vmatprep.subr.bf16.mxu1 %v4570_v3 }
 0x43d   :  { %3733 = vmatpush3.bf16.msra.mxu1 %v4328_v41 }
 0x43e   :  { %3734 = vmatprep.subr.bf16.mxu1 %v4570_v3 }
 0x441   :  { %3735 = vmatpush3.bf16.msra.mxu1 %v4329_v42 }
 0x442   :  { %3736 = vmatprep.subr.bf16.mxu1 %v4570_v3 }
 0x445   :  { %3737 = vmatpush3.bf16.msra.mxu1 %v4330_v16 }
 0x446   :  { %3738 = vmatprep.subr.bf16.mxu1 %v4570_v3 }
 0x449   :  { %3739 = vmatpush3.bf16.msra.mxu1 %v4331_v17 }
 0x44a   :  { %3740 = vmatprep.subr.bf16.mxu1 %v4570_v3 }
 0x44d   :  { %3741 = vmatpush3.bf16.msra.mxu1 %v4332_v18 }
 0x44e   :  { %3742 = vmatprep.subr.bf16.mxu1 %v4570_v3 }
 0x451   :  { %3743 = vmatpush3.bf16.msra.mxu1 %v4333_v19 }
 0x452   :  { %3744 = vmatprep.subr.bf16.mxu1 %v4570_v3 }
 0x455   :  { %3745 = vmatpush3.bf16.msra.mxu1 %v4334_v59 }
 0x456   :  { %3750 = vmatprep.subr.bf16.mxu1 %v4570_v3 }
 0x50b   :  { %v3706_v20 = vpop.f32.mrb[20].mxu1 }
 0x50c   :  { %v3707_v21 = vpop.f32.mrb[21].mxu1 }
 0x50d   :  { %v3708_v22 = vadd.f32 %v3707_v21, %v3706_v20  ;;  %v3709_v24 = vpop.f32.mrb[22].mxu1 }
 0x50e   :  { %v3710_v25 = vpop.f32.mrb[23].mxu1 }
 0x50f   :  { %v3053_v26 = vadd.f32 %v3708_v22, %v2921_v62  ;;  %v3711_v27 = vadd.f32 %v3710_v25, %v3709_v24 }
 0x511   :  { %v3056_v28 = vadd.f32 %v3711_v27, %v2921_v62  ;;  %v3059_v29 = vmax.f32 %v3053_v26, 0.0 }
 0x513   :  { %v3060_v30 = vmax.f32 %v3056_v28, 0.0 }
 0x515   :  { %v3061_v32 = vpack.c.bf16 %v3060_v30, %v3059_v29 }
 0x517   :  { %3747 = vmatmul.mubr.bf16.vlgmr.msra.gmra.mrb[24].mxu1 %v3061_v32 }
 0x518   :  { %3751 = vmatpush3.bf16.msra.mxu1 %v4335_v31  ;;  %3766 = vmatprep.mubr.msk.bf16.mxu1 %vm4571_vm1, %v4570_v3 }
 0x519   :  { %3752 = vmatprep.subr.bf16.mxu1 %v4570_v3 }
 0x51c   :  { %3753 = vmatpush3.bf16.msra.mxu1 %v4336_v33 }
 0x51d   :  { %3754 = vmatprep.subr.bf16.mxu1 %v4570_v3 }
 0x520   :  { %3755 = vmatpush3.bf16.msra.mxu1 %v4337_v34 }
 0x521   :  { %3756 = vmatprep.subr.bf16.mxu1 %v4570_v3 }
 0x524   :  { %3757 = vmatpush3.bf16.msra.mxu1 %v4338_v35 }
 0x525   :  { %3758 = vmatprep.subr.bf16.mxu1 %v4570_v3 }
 0x528   :  { %3759 = vmatpush3.bf16.msra.mxu1 %v4339_v36 }
 0x529   :  { %3760 = vmatprep.subr.bf16.mxu1 %v4570_v3 }
 0x52c   :  { %3761 = vmatpush3.bf16.msra.mxu1 %v4340_v38 }
 0x52d   :  { %3762 = vmatprep.subr.bf16.mxu1 %v4570_v3 }
 0x530   :  { %3763 = vmatpush3.bf16.msra.mxu1 %v4341_v39 }
 0x531   :  { %3764 = vmatprep.subr.bf16.mxu1 %v4570_v3 }
 0x534   :  { %3765 = vmatpush3.bf16.msra.mxu1 %v4342_v43 }
 0x5ea   :  { %v3161_v45 = vpop.f32.mrb[24].mxu1 }
 0x5eb   :  { %v3162_v46 = vadd.f32 %v3161_v45, %v3078_v44  ;;  %v3748_v47 = vpop.f32.mrb[25].mxu1 }
 0x5ec   :  { %v3164_v49 = vpop.f32.mrb[26].mxu1 }
 0x5ed   :  { %v3165_v52 = vadd.f32 %v3164_v49, %v3078_v44  ;;  %v3749_v53 = vpop.f32.mrb[27].mxu1  ;;  %v3168_v55 = vmax.f32 %v3162_v46, 0.0 }
 0x5ef   :  { %v3169_v56 = vmax.f32 %v3165_v52, 0.0 }
 0x5f1   :  { %v3170_v57 = vpack.c.bf16 %v3169_v56, %v3168_v55 }
 0x5f3   :  { %3767 = vmatmul.mubr.bf16.vlgmr.msra.gmra.mrb[28].mxu1 %v3170_v57 }
 0x6c6   :  { %v3270_v58 = vpop.f32.mrb[28].mxu1 }
 0x6c7   :  { %v3768_v60 = vpop.f32.mrb[29].mxu1  ;;  %v3271_v63 = vadd.f32 %v3270_v58, %v3187_v40 }
 0x6c8   :  { %v3273_v61 = vpop.f32.mrb[30].mxu1 }
 0x6c9   :  { %v3274_v0 = vadd.f32 %v3273_v61, %v3187_v40  ;;  %v3769_v1 = vpop.f32.mrb[31].mxu1 }
 0x6cb   :  { %v3688_v2 = vpack.c.bf16 %v3274_v0, %v3271_v63 }
 0x6cd   :  { %3689 = vst [vmem:[#allocation16] sm:$0xff] %v3688_v2  }
 0x6ce   :  { %4530 = shalt.err (!%p4527_p12)
}
 0x6cf   :  { %s4531_s14 = scalar_lea.hbm %s4851_s8, 128 }
 0x6d0   :  { %p4532_p13 = scmp.ne.s32.totalorder %s4851_s8, %s4531_s14  ;;  %p4535_p0 = scmp.lt.u32.totalorder %s4531_s14, %s4851_s8 }
 0x6d2   :  { %p4537_p1 = pnand %p4535_p0, %p4532_p13 }
 0x6d4   :  { %4540 = shalt.err (!%p4537_p1)
}
 0x6d5   :  { %3298 = dma.vmem_to_hbm [thread:$0]  %s3293_s10, 128, %s4851_s8, [#allocation4], %s4561_s20, %s4561_s20, %s4562_s22  }
 0x6d6   :  { %4551 = dma.done.wait [#allocation4], 128  }
 0x6d7   :  { %4552 = vsyncadd [#allocation4], 4294967168 }
 0x6d8   :  { %3302 = vsyncpa [#allocation3], 1 }
 0x6d9   :  { %3303 = vsyncpa [#allocation6], 1 }
 0x6da   :  { %3304 = vsyncpa [#allocation9], 1 }
 0x6db   :  { %3305 = vsyncpa [#allocation12], 1 }
 0x6dc   :  { %3306 = vsyncpa [#allocation15], 1 }
 0x6dd   :  { %3307 = vsyncpa [#allocation4], 1 }

// kernel: tpu_custom_call.1
= control target key start
LH: loop header
LB: loop body
LE: loop exit
PB: predicated region body
PF: predicated region fallthrough
CT: control target
= control target key end

     0   :  { %13 = vsyncpa [#allocation3], 0  ;;  %s4843_s0 = inlined_call_operand.hbm [shape: bf16[16,32], index: 0, kind: input, shape index: {}]   ;;  %s4844_s1 = inlined_call_operand.hbm [shape: bf16[32,1024], index: 1, kind: input, shape index: {}]   ;;  %s4845_s2 = inlined_call_operand.hbm [shape: bf16[1024,512], index: 2, kind: input, shape index: {}]   ;;  %s4846_s3 = inlined_call_operand.hbm [shape: bf16[512,256], index: 3, kind: input, shape index: {}]   ;;  %s4847_s4 = inlined_call_operand.hbm [shape: bf16[256,128], index: 4, kind: input, shape index: {}]   ;;  %s4848_s5 = inlined_call_operand.hbm [shape: bf16[128,128], index: 5, kind: input, shape index: {}]   ;;  %s4849_s6 = inlined_call_operand.hbm [shape: bf16[128,128], index: 6, kind: input, shape index: {}]   ;;  %s4850_s7 = inlined_call_operand.hbm [shape: f32[6,1024], index: 7, kind: input, shape index: {}]   ;;  %s4851_s8 = inlined_call_operand.hbm [shape: bf16[16,128], index: 8, kind: output, shape index: {}]  }
   0x1   :  { %14 = vsyncpa [#allocation6], 0 }
   0x2   :  { %15 = vsyncpa [#allocation9], 0 }
   0x3   :  { %16 = vsyncpa [#allocation12], 0 }
   0x4   :  { %17 = vsyncpa [#allocation15], 0 }
   0x5   :  { %18 = vsyncpa [#allocation4], 0  ;;  %s4553_s27 = smov [#allocation5]   ;;  %s4343_s9 = scalar_lea.hbm %s4844_s1, 2048 }
   0x6   :  { %s36_s28 = sshll.u32 %s4553_s27, 4  ;;  %p4344_p0 = scmp.ne.s32.totalorder %s4844_s1, %s4343_s9  ;;  %s37_s28 = int_to_ptr.vmem [resolvable:$true] %s36_s28 }
   0x7   :  { %p4347_p1 = scmp.lt.u32.totalorder %s4343_s9, %s4844_s1 }
   0x9   :  { %p4349_p2 = pnand %p4347_p1, %p4344_p0 }
   0xb   :  { %4352 = shalt.err (!%p4349_p2)
}
   0xc   :  { %s4353_s14 = scalar_lea.vmem %s37_s28, 2048  ;;  %p4358_p4 = scmp.lt.s32.totalorder %s37_s28, %s37_s28 }
   0xd   :  { %p4354_p3 = scmp.ne.s32.totalorder %s37_s28, %s4353_s14  ;;  %p4359_p5 = scmp.lt.s32.totalorder %s4353_s14, %s4353_s14 }
   0xf   :  { %p4360_p6 = por %p4359_p5, %p4358_p4 }
  0x11   :  { %p4361_p7 = pnand %p4360_p6, %p4354_p3 }
  0x13   :  { %4364 = shalt.err (!%p4361_p7)
}
  0x14   :  { %s4554_s15 = smov 512   ;;  %s4555_s16 = smov 32  }
  0x15   :  { %42 = dma.hbm_to_vmem [thread:$0]  %s4844_s1, 2048, %s37_s28, [#allocation6], %s4554_s15, %s4554_s15, %s4555_s16  }
  0x16   :  { %s4556_s19 = smov [#allocation8]   ;;  %s4365_s23 = scalar_lea.hbm %s4846_s3, 8192 }
  0x17   :  { %s60_s20 = sshll.u32 %s4556_s19, 4  ;;  %p4366_p8 = scmp.ne.s32.totalorder %s4846_s3, %s4365_s23  ;;  %s61_s20 = int_to_ptr.vmem [resolvable:$true] %s60_s20 }
  0x18   :  { %p4369_p9 = scmp.lt.u32.totalorder %s4365_s23, %s4846_s3 }
  0x1a   :  { %p4371_p10 = pnand %p4369_p9, %p4366_p8 }
  0x1c   :  { %4374 = shalt.err (!%p4371_p10)
}
  0x1d   :  { %s4375_s29 = scalar_lea.vmem %s61_s20, 8192  ;;  %p4380_p12 = scmp.lt.s32.totalorder %s61_s20, %s61_s20 }
  0x1e   :  { %p4376_p11 = scmp.ne.s32.totalorder %s61_s20, %s4375_s29  ;;  %p4381_p13 = scmp.lt.s32.totalorder %s4375_s29, %s4375_s29 }
  0x20   :  { %p4382_p0 = por %p4381_p13, %p4380_p12 }
  0x22   :  { %p4383_p1 = pnand %p4382_p0, %p4376_p11 }
  0x24   :  { %4386 = shalt.err (!%p4383_p1)
}
  0x25   :  { %s4557_s1 = smov 128   ;;  %s4558_s28 = smov 8  }
  0x26   :  { %66 = dma.hbm_to_vmem [thread:$0]  %s4846_s3, 8192, %s61_s20, [#allocation9], %s4557_s1, %s4557_s1, %s4558_s28  }
  0x27   :  { %s4559_s10 = smov [#allocation11]   ;;  %s4560_s12 = smov [#allocation2]  }
  0x28   :  { %s84_s11 = sshll.u32 %s4559_s10, 4  ;;  %s24_s13 = sshll.u32 %s4560_s12, 4  ;;  %s85_s11 = int_to_ptr.vmem [resolvable:$true] %s84_s11  ;;  %s4642_s13 = int_to_ptr.vmem [resolvable:$true] %s24_s13 }
  0x29   :  { %s4387_s16 = scalar_lea.hbm %s4848_s5, 1024 }
  0x2a   :  { %p4388_p2 = scmp.ne.s32.totalorder %s4848_s5, %s4387_s16  ;;  %p4391_p3 = scmp.lt.u32.totalorder %s4387_s16, %s4848_s5 }
  0x2c   :  { %p4393_p4 = pnand %p4391_p3, %p4388_p2 }
  0x2e   :  { %4396 = shalt.err (!%p4393_p4)
}
  0x2f   :  { %s4397_s3 = scalar_lea.vmem %s85_s11, 1024  ;;  %p4402_p6 = scmp.lt.s32.totalorder %s85_s11, %s85_s11 }
  0x30   :  { %p4398_p5 = scmp.ne.s32.totalorder %s85_s11, %s4397_s3  ;;  %p4403_p7 = scmp.lt.s32.totalorder %s4397_s3, %s4397_s3 }
  0x32   :  { %p4404_p8 = por %p4403_p7, %p4402_p6 }
  0x34   :  { %p4405_p9 = pnand %p4404_p8, %p4398_p5 }
  0x36   :  { %4408 = shalt.err (!%p4405_p9)
}
  0x37   :  { %s4561_s20 = smov 64   ;;  %s4562_s22 = smov 4  }
  0x38   :  { %90 = dma.hbm_to_vmem [thread:$0]  %s4848_s5, 1024, %s85_s11, [#allocation12], %s4561_s20, %s4561_s20, %s4562_s22  }
  0x39   :  { %s4409_s27 = scalar_lea.hbm %s4843_s0, 128 }
  0x3a   :  { %p4410_p10 = scmp.ne.s32.totalorder %s4843_s0, %s4409_s27  ;;  %p4413_p11 = scmp.lt.u32.totalorder %s4409_s27, %s4843_s0 }
  0x3c   :  { %p4415_p12 = pnand %p4413_p11, %p4410_p10 }
  0x3e   :  { %4418 = shalt.err (!%p4415_p12)
}
  0x3f   :  { %s4419_s9 = scalar_lea.vmem %s4642_s13, 128  ;;  %p4424_p0 = scmp.lt.s32.totalorder %s4642_s13, %s4642_s13 }
  0x40   :  { %p4420_p13 = scmp.ne.s32.totalorder %s4642_s13, %s4419_s9  ;;  %p4425_p1 = scmp.lt.s32.totalorder %s4419_s9, %s4419_s9 }
  0x42   :  { %p4426_p2 = por %p4425_p1, %p4424_p0 }
  0x44   :  { %p4427_p3 = pnand %p4426_p2, %p4420_p13 }
  0x46   :  { %4430 = shalt.err (!%p4427_p3)
}
  0x47   :  { %30 = dma.hbm_to_vmem [thread:$0]  %s4843_s0, 128, %s4642_s13, [#allocation3], %s4561_s20, %s4561_s20, %s4562_s22  }
  0x48   :  { %s4563_s11 = smov [#allocation7]   ;;  %s4431_s16 = scalar_lea.hbm %s4845_s2, 32768 }
  0x49   :  { %s48_s12 = sshll.u32 %s4563_s11, 4  ;;  %p4432_p4 = scmp.ne.s32.totalorder %s4845_s2, %s4431_s16  ;;  %s49_s12 = int_to_ptr.vmem [resolvable:$true] %s48_s12 }
  0x4a   :  { %p4435_p5 = scmp.lt.u32.totalorder %s4431_s16, %s4845_s2 }
  0x4c   :  { %p4437_p6 = pnand %p4435_p5, %p4432_p4 }
  0x4e   :  { %4440 = shalt.err (!%p4437_p6)
}
  0x4f   :  { %s4441_s3 = scalar_lea.vmem %s49_s12, 32768  ;;  %p4446_p8 = scmp.lt.s32.totalorder %s49_s12, %s49_s12 }
  0x50   :  { %p4442_p7 = scmp.ne.s32.totalorder %s49_s12, %s4441_s3  ;;  %p4447_p9 = scmp.lt.s32.totalorder %s4441_s3, %s4441_s3 }
  0x52   :  { %p4448_p10 = por %p4447_p9, %p4446_p8 }
  0x54   :  { %p4449_p11 = pnand %p4448_p10, %p4442_p7 }
  0x56   :  { %4452 = shalt.err (!%p4449_p11)
}
  0x57   :  { %s4564_s0 = smov 256   ;;  %s4565_s13 = smov 16  }
  0x58   :  { %54 = dma.hbm_to_vmem [thread:$0]  %s4845_s2, 32768, %s49_s12, [#allocation6], %s4564_s0, %s4564_s0, %s4565_s13  }
  0x59   :  { %s4566_s25 = smov [#allocation10]   ;;  %s4567_s27 = smov [#allocation13]  }
  0x5a   :  { %s72_s26 = sshll.u32 %s4566_s25, 4  ;;  %s96_s29 = sshll.u32 %s4567_s27, 4  ;;  %s73_s26 = int_to_ptr.vmem [resolvable:$true] %s72_s26  ;;  %s97_s29 = int_to_ptr.vmem [resolvable:$true] %s96_s29 }
  0x5b   :  { %s4453_s30 = scalar_lea.hbm %s4847_s4, 2048 }
  0x5c   :  { %p4454_p12 = scmp.ne.s32.totalorder %s4847_s4, %s4453_s30  ;;  %p4457_p13 = scmp.lt.u32.totalorder %s4453_s30, %s4847_s4 }
  0x5e   :  { %p4459_p0 = pnand %p4457_p13, %p4454_p12 }
  0x60   :  { %4462 = shalt.err (!%p4459_p0)
}
  0x61   :  { %s4463_s2 = scalar_lea.vmem %s73_s26, 2048  ;;  %p4468_p2 = scmp.lt.s32.totalorder %s73_s26, %s73_s26 }
  0x62   :  { %p4464_p1 = scmp.ne.s32.totalorder %s73_s26, %s4463_s2  ;;  %p4469_p3 = scmp.lt.s32.totalorder %s4463_s2, %s4463_s2 }
  0x64   :  { %p4470_p4 = por %p4469_p3, %p4468_p2 }
  0x66   :  { %p4471_p5 = pnand %p4470_p4, %p4464_p1 }
  0x68   :  { %4474 = shalt.err (!%p4471_p5)
}
  0x69   :  { %78 = dma.hbm_to_vmem [thread:$0]  %s4847_s4, 2048, %s73_s26, [#allocation9], %s4561_s20, %s4561_s20, %s4562_s22  }
  0x6a   :  { %s4475_s17 = scalar_lea.hbm %s4849_s6, 1024 }
  0x6b   :  { %p4476_p6 = scmp.ne.s32.totalorder %s4849_s6, %s4475_s17  ;;  %p4479_p7 = scmp.lt.u32.totalorder %s4475_s17, %s4849_s6 }
  0x6d   :  { %p4481_p8 = pnand %p4479_p7, %p4476_p6 }
  0x6f   :  { %4484 = shalt.err (!%p4481_p8)
}
  0x70   :  { %s4485_s0 = scalar_lea.vmem %s97_s29, 1024  ;;  %p4490_p10 = scmp.lt.s32.totalorder %s97_s29, %s97_s29 }
  0x71   :  { %p4486_p9 = scmp.ne.s32.totalorder %s97_s29, %s4485_s0  ;;  %p4491_p11 = scmp.lt.s32.totalorder %s4485_s0, %s4485_s0 }
  0x73   :  { %p4492_p12 = por %p4491_p11, %p4490_p10 }
  0x75   :  { %p4493_p13 = pnand %p4492_p12, %p4486_p9 }
  0x77   :  { %4496 = shalt.err (!%p4493_p13)
}
  0x78   :  { %102 = dma.hbm_to_vmem [thread:$0]  %s4849_s6, 1024, %s97_s29, [#allocation12], %s4561_s20, %s4561_s20, %s4562_s22  }
  0x79   :  { %s4568_s23 = smov [#allocation14]   ;;  %s4497_s27 = scalar_lea.hbm %s4850_s7, 1024 }
  0x7a   :  { %s109_s24 = sshll.u32 %s4568_s23, 4  ;;  %p4498_p0 = scmp.ne.s32.totalorder %s4850_s7, %s4497_s27  ;;  %s110_s24 = int_to_ptr.vmem [resolvable:$true] %s109_s24 }
  0x7b   :  { %p4501_p1 = scmp.lt.u32.totalorder %s4497_s27, %s4850_s7 }
  0x7d   :  { %p4503_p2 = pnand %p4501_p1, %p4498_p0 }
  0x7f   :  { %4506 = shalt.err (!%p4503_p2)
}
  0x80   :  { %s4507_s5 = scalar_lea.vmem %s110_s24, 1024  ;;  %p4512_p4 = scmp.lt.s32.totalorder %s110_s24, %s110_s24 }
  0x81   :  { %p4508_p3 = scmp.ne.s32.totalorder %s110_s24, %s4507_s5  ;;  %p4513_p5 = scmp.lt.s32.totalorder %s4507_s5, %s4507_s5 }
  0x83   :  { %p4514_p6 = por %p4513_p5, %p4512_p4 }
  0x85   :  { %p4515_p7 = pnand %p4514_p6, %p4508_p3 }
  0x87   :  { %4518 = shalt.err (!%p4515_p7)
}
  0x88   :  { %112 = dma.hbm_to_vmem [thread:$0]  %s4850_s7, 1024, %s110_s24, [#allocation15]  }
  0x89   :  { %4541 = dma.done.wait [#allocation3], 128  }
  0x8a   :  { %4542 = vsyncadd [#allocation3], 4294967168 }
  0x8b   :  { %4543 = dma.done.wait [#allocation6], 34816  }
  0x8c   :  { %4544 = vsyncadd [#allocation6], 4294932480 }
  0x8d   :  { %4545 = dma.done.wait [#allocation9], 10240  }
  0x8e   :  { %4546 = vsyncadd [#allocation9], 4294957056 }
  0x8f   :  { %4547 = dma.done.wait [#allocation12], 2048  }
  0x90   :  { %4548 = vsyncadd [#allocation12], 4294965248 }
  0x91   :  { %4549 = dma.done.wait [#allocation15], 1024  }
  0x92   :  { %4550 = vsyncadd [#allocation15], 4294966272  ;;  %v4569_v0 = vmov 0   ;;  %v140_v1 = vld [vmem:[#allocation5] sm:$0xff]  ;;  %v141_v8 = vld [vmem:[#allocation5 + $0x8] sm:$0xff]  ;;  %vm285_vm0 = vcmask 261120  }
  0x93   :  { %321 = vmatprep.mubr.bf16.mxu1 %v4569_v0  ;;  %v144_v2 = vld [vmem:[#allocation5 + $0x20] sm:$0xff]  ;;  %v145_v9 = vld [vmem:[#allocation5 + $0x28] sm:$0xff]  ;;  %v4734_v11 = vld [vmem:[#allocation2] sm:$0xff]   ;;  %vm4571_vm1 = vmmov 0   ;;  %s4572_s7 = smov [#allocation16]  }
  0x94   :  { %v148_v3 = vld [vmem:[#allocation5 + $0x40] sm:$0xff]  ;;  %v3310_v4 = vcombine.high %v140_v1, %v144_v2  ;;  %v3309_v5 = vcombine.low %v140_v1, %v144_v2  ;;  %v3312_v12 = vcombine.high %v141_v8, %v145_v9  ;;  %v149_v13 = vld [vmem:[#allocation5 + $0x48] sm:$0xff]  ;;  %v3311_v16 = vcombine.low %v141_v8, %v145_v9  ;;  %v142_v17 = vld [vmem:[#allocation5 + $0x10] sm:$0xff]  ;;  %s3292_s10 = sshll.u32 %s4572_s7, 4  ;;  %s3293_s10 = int_to_ptr.vmem [resolvable:$true] %s3292_s10 }
  0x95   :  { %v152_v6 = vld [vmem:[#allocation5 + $0x60] sm:$0xff]  ;;  %v153_v14 = vld [vmem:[#allocation5 + $0x68] sm:$0xff]  ;;  %v146_v21 = vld [vmem:[#allocation5 + $0x30] sm:$0xff]  ;;  %s4519_s11 = scalar_lea.vmem %s3293_s10, 128  ;;  %p4524_p9 = scmp.lt.s32.totalorder %s3293_s10, %s3293_s10 }
  0x96   :  { %v3318_v7 = vcombine.high %v148_v3, %v152_v6  ;;  %289 = vmatprep.subr.bf16.mxu1 %v3310_v4  ;;  %v3317_v10 = vcombine.low %v148_v3, %v152_v6  ;;  %v3831_v15 = vld [vmem:[#allocation7 + $0x4] ss:$16 sps:$4 sm:$0xff]   ;;  %v3836_v18 = vld [vmem:[#allocation7] ss:$16 sps:$4 sm:$0xff]   ;;  %v3320_v19 = vcombine.high %v149_v13, %v153_v14  ;;  %v3319_v23 = vcombine.low %v149_v13, %v153_v14  ;;  %v143_v31 = vld [vmem:[#allocation5 + $0x18] sm:$0xff]  ;;  %p4520_p8 = scmp.ne.s32.totalorder %s3293_s10, %s4519_s11  ;;  %p4525_p10 = scmp.lt.s32.totalorder %s4519_s11, %s4519_s11 }
  0x97   :  { %290 = vmatpush1.bf16.msra.mxu1 %v3309_v5  ;;  %2044 = vmatprep.subr.bf16.mxu0 %v3831_v15  ;;  %v3837_v20 = vld [vmem:[#allocation7 + $0x24] ss:$16 sps:$4 sm:$0xff]   ;;  %v3842_v22 = vld [vmem:[#allocation7 + $0x20] ss:$16 sps:$4 sm:$0xff]   ;;  %v3314_v25 = vcombine.high %v142_v17, %v146_v21  ;;  %v3313_v30 = vcombine.low %v142_v17, %v146_v21  ;;  %v147_v33 = vld [vmem:[#allocation5 + $0x38] sm:$0xff] }
  0x98   :  { %291 = vmatprep.subr.bf16.mxu1 %v3318_v7  ;;  %2045 = vmatpush1.bf16.msra.mxu0 %v3836_v18  ;;  %v3843_v24 = vld [vmem:[#allocation7 + $0x44] ss:$16 sps:$4 sm:$0xff]   ;;  %v3848_v28 = vld [vmem:[#allocation7 + $0x40] ss:$16 sps:$4 sm:$0xff]   ;;  %v3316_v37 = vcombine.high %v143_v31, %v147_v33  ;;  %v151_v38 = vld [vmem:[#allocation5 + $0x58] sm:$0xff]  ;;  %v3315_v42 = vcombine.low %v143_v31, %v147_v33  ;;  %p4526_p11 = por %p4525_p10, %p4524_p9 }
  0x99   :  { %2046 = vmatprep.subr.bf16.mxu0 %v3837_v20  ;;  %v150_v26 = vld [vmem:[#allocation5 + $0x50] sm:$0xff]  ;;  %v155_v39 = vld [vmem:[#allocation5 + $0x78] sm:$0xff] }
  0x9a   :  { %v154_v27 = vld [vmem:[#allocation5 + $0x70] sm:$0xff]  ;;  %v3324_v43 = vcombine.high %v151_v38, %v155_v39  ;;  %v3323_v46 = vcombine.low %v151_v38, %v155_v39  ;;  %v3835_v47 = vld [vmem:[#allocation7 + $0xc] ss:$16 sps:$4 sm:$0xff]   ;;  %v3833_v50 = vld [vmem:[#allocation7 + $0x8] ss:$16 sps:$4 sm:$0xff]   ;;  %p4527_p12 = pnand %p4526_p11, %p4520_p8 }
  0x9b   :  { %292 = vmatpush1.bf16.msra.mxu1 %v3317_v10  ;;  %v3849_v29 = vld [vmem:[#allocation7 + $0x64] ss:$16 sps:$4 sm:$0xff]   ;;  %v3322_v32 = vcombine.high %v150_v26, %v154_v27  ;;  %v3854_v34 = vld [vmem:[#allocation7 + $0x60] ss:$16 sps:$4 sm:$0xff]   ;;  %v3321_v36 = vcombine.low %v150_v26, %v154_v27  ;;  %v3841_v51 = vld [vmem:[#allocation7 + $0x2c] ss:$16 sps:$4 sm:$0xff]  }
  0x9c   :  { %332 = vmatprep.subr.bf16.mxu1 %v3312_v12  ;;  %2047 = vmatpush1.bf16.msra.mxu0 %v3842_v22  ;;  %v3855_v35 = vld [vmem:[#allocation7 + $0x84] ss:$16 sps:$4 sm:$0xff]   ;;  %v3860_v40 = vld [vmem:[#allocation7 + $0x80] ss:$16 sps:$4 sm:$0xff]   ;;  %v3839_v54 = vld [vmem:[#allocation7 + $0x28] ss:$16 sps:$4 sm:$0xff]  }
  0x9d   :  { %2048 = vmatprep.subr.bf16.mxu0 %v3843_v24  ;;  %v3861_v41 = vld [vmem:[#allocation7 + $0xa4] ss:$16 sps:$4 sm:$0xff]   ;;  %v3866_v44 = vld [vmem:[#allocation7 + $0xa0] ss:$16 sps:$4 sm:$0xff]   ;;  %v3847_v55 = vld [vmem:[#allocation7 + $0x4c] ss:$16 sps:$4 sm:$0xff]  }
  0x9e   :  { %3325 = vmatmul.mubr.msk.bf16.vlgmr.msra.gmra.mrb[0].mxu1 %vm285_vm0, %v4734_v11  ;;  %v3867_v45 = vld [vmem:[#allocation7 + $0xc4] ss:$16 sps:$4 sm:$0xff]   ;;  %v3872_v48 = vld [vmem:[#allocation7 + $0xc0] ss:$16 sps:$4 sm:$0xff]   ;;  %v3845_v58 = vld [vmem:[#allocation7 + $0x48] ss:$16 sps:$4 sm:$0xff]  }
  0x9f   :  { %333 = vmatpush1.bf16.msra.mxu1 %v3311_v16  ;;  %364 = vmatprep.mubr.bf16.mxu1 %v4569_v0  ;;  %v3873_v49 = vld [vmem:[#allocation7 + $0xe4] ss:$16 sps:$4 sm:$0xff]   ;;  %v3878_v52 = vld [vmem:[#allocation7 + $0xe0] ss:$16 sps:$4 sm:$0xff]   ;;  %v3853_v59 = vld [vmem:[#allocation7 + $0x6c] ss:$16 sps:$4 sm:$0xff]  }
  0xa0   :  { %334 = vmatprep.subr.bf16.mxu1 %v3320_v19  ;;  %2049 = vmatpush1.bf16.msra.mxu0 %v3848_v28  ;;  %v3879_v53 = vld [vmem:[#allocation7 + $0x104] ss:$16 sps:$4 sm:$0xff]   ;;  %v3884_v56 = vld [vmem:[#allocation7 + $0x100] ss:$16 sps:$4 sm:$0xff]   ;;  %v3851_v62 = vld [vmem:[#allocation7 + $0x68] ss:$16 sps:$4 sm:$0xff]  }
  0xa1   :  { %2050 = vmatprep.subr.bf16.mxu0 %v3849_v29  ;;  %v3885_v57 = vld [vmem:[#allocation7 + $0x124] ss:$16 sps:$4 sm:$0xff]   ;;  %v3890_v60 = vld [vmem:[#allocation7 + $0x120] ss:$16 sps:$4 sm:$0xff]   ;;  %v3859_v63 = vld [vmem:[#allocation7 + $0x8c] ss:$16 sps:$4 sm:$0xff]  }
  0xa2   :  { %v3891_v61 = vld [vmem:[#allocation7 + $0x144] ss:$16 sps:$4 sm:$0xff]   ;;  %v3857_v2 = vld [vmem:[#allocation7 + $0x88] ss:$16 sps:$4 sm:$0xff]   ;;  %v3865_v3 = vld [vmem:[#allocation7 + $0xac] ss:$16 sps:$4 sm:$0xff]  }
  0xa3   :  { %335 = vmatpush1.bf16.msra.mxu1 %v3319_v23  ;;  %v3897_v1 = vld [vmem:[#allocation7 + $0x164] ss:$16 sps:$4 sm:$0xff]   ;;  %v3902_v4 = vld [vmem:[#allocation7 + $0x160] ss:$16 sps:$4 sm:$0xff]   ;;  %v3863_v6 = vld [vmem:[#allocation7 + $0xa8] ss:$16 sps:$4 sm:$0xff]  }
  0xa4   :  { %375 = vmatprep.subr.bf16.mxu1 %v3314_v25  ;;  %2051 = vmatpush1.bf16.msra.mxu0 %v3854_v34  ;;  %v3903_v5 = vld [vmem:[#allocation7 + $0x184] ss:$16 sps:$4 sm:$0xff]   ;;  %v3871_v7 = vld [vmem:[#allocation7 + $0xcc] ss:$16 sps:$4 sm:$0xff]   ;;  %v3908_v8 = vld [vmem:[#allocation7 + $0x180] ss:$16 sps:$4 sm:$0xff]  }
  0xa5   :  { %2052 = vmatprep.subr.bf16.mxu0 %v3855_v35  ;;  %v3909_v9 = vld [vmem:[#allocation7 + $0x1a4] ss:$16 sps:$4 sm:$0xff]   ;;  %v3869_v10 = vld [vmem:[#allocation7 + $0xc8] ss:$16 sps:$4 sm:$0xff]   ;;  %v3914_v12 = vld [vmem:[#allocation7 + $0x1a0] ss:$16 sps:$4 sm:$0xff]  }
  0xa6   :  { %3326 = vmatmul.mubr.msk.bf16.vlgmr.msra.gmra.mrb[4].mxu1 %vm285_vm0, %v4734_v11  ;;  %v3875_v13 = vld [vmem:[#allocation7 + $0xe8] ss:$16 sps:$4 sm:$0xff]   ;;  %v3883_v14 = vld [vmem:[#allocation7 + $0x10c] ss:$16 sps:$4 sm:$0xff]   ;;  %v3915_v26 = vld [vmem:[#allocation7 + $0x1c4] ss:$16 sps:$4 sm:$0xff]  }
  0xa7   :  { %376 = vmatpush1.bf16.msra.mxu1 %v3313_v30  ;;  %407 = vmatprep.mubr.bf16.mxu1 %v4569_v0  ;;  %v3881_v15 = vld [vmem:[#allocation7 + $0x108] ss:$16 sps:$4 sm:$0xff]   ;;  %v3889_v16 = vld [vmem:[#allocation7 + $0x12c] ss:$16 sps:$4 sm:$0xff]   ;;  %v3920_v29 = vld [vmem:[#allocation7 + $0x1c0] ss:$16 sps:$4 sm:$0xff]  }
  0xa8   :  { %377 = vmatprep.subr.bf16.mxu1 %v3322_v32  ;;  %2053 = vmatpush1.bf16.msra.mxu0 %v3860_v40  ;;  %v3887_v17 = vld [vmem:[#allocation7 + $0x128] ss:$16 sps:$4 sm:$0xff]   ;;  %v3895_v18 = vld [vmem:[#allocation7 + $0x14c] ss:$16 sps:$4 sm:$0xff]   ;;  %v3921_v30 = vld [vmem:[#allocation7 + $0x1e4] ss:$16 sps:$4 sm:$0xff]  }
  0xa9   :  { %2054 = vmatprep.subr.bf16.mxu0 %v3861_v41  ;;  %v3893_v19 = vld [vmem:[#allocation7 + $0x148] ss:$16 sps:$4 sm:$0xff]   ;;  %v3901_v20 = vld [vmem:[#allocation7 + $0x16c] ss:$16 sps:$4 sm:$0xff]   ;;  %v3926_v33 = vld [vmem:[#allocation7 + $0x1e0] ss:$16 sps:$4 sm:$0xff]  }
  0xaa   :  { %v3899_v21 = vld [vmem:[#allocation7 + $0x168] ss:$16 sps:$4 sm:$0xff]   ;;  %v3907_v22 = vld [vmem:[#allocation7 + $0x18c] ss:$16 sps:$4 sm:$0xff]   ;;  %v3929_v34 = vld [vmem:[#allocation7 + $0x204] ss:$16 sps:$4 sm:$0xff]  }
  0xab   :  { %378 = vmatpush1.bf16.msra.mxu1 %v3321_v36  ;;  %v3905_v23 = vld [vmem:[#allocation7 + $0x188] ss:$16 sps:$4 sm:$0xff]   ;;  %v3913_v24 = vld [vmem:[#allocation7 + $0x1ac] ss:$16 sps:$4 sm:$0xff]   ;;  %v160_v36 = vlaneseq }
  0xac   :  { %418 = vmatprep.subr.bf16.mxu1 %v3316_v37  ;;  %2055 = vmatpush1.bf16.msra.mxu0 %v3866_v44  ;;  %v3911_v25 = vld [vmem:[#allocation7 + $0x1a8] ss:$16 sps:$4 sm:$0xff]   ;;  %v3919_v27 = vld [vmem:[#allocation7 + $0x1cc] ss:$16 sps:$4 sm:$0xff]  }
  0xad   :  { %2056 = vmatprep.subr.bf16.mxu0 %v3867_v45  ;;  %v3917_v28 = vld [vmem:[#allocation7 + $0x1c8] ss:$16 sps:$4 sm:$0xff]   ;;  %v3925_v31 = vld [vmem:[#allocation7 + $0x1ec] ss:$16 sps:$4 sm:$0xff]   ;;  %v4747_v37 = vshrl.u32 %v160_v36, 7 }
  0xae   :  { %3327 = vmatmul.mubr.msk.bf16.vlgmr.msra.gmra.mrb[8].mxu1 %vm285_vm0, %v4734_v11  ;;  %v3923_v32 = vld [vmem:[#allocation7 + $0x1e8] ss:$16 sps:$4 sm:$0xff]   ;;  %v3932_v35 = vld [vmem:[#allocation7 + $0x20c] ss:$16 sps:$4 sm:$0xff]  }
  0xaf   :  { %419 = vmatpush1.bf16.msra.mxu1 %v3315_v42  ;;  %450 = vmatprep.mubr.bf16.mxu1 %v4569_v0  ;;  %v3896_v0 = vld [vmem:[#allocation7 + $0x140] ss:$16 sps:$4 sm:$0xff]   ;;  %v4752_v41 = vsub.s32 0, %v4747_v37  ;;  %v4755_v42 = vsub.s32 1, %v4747_v37 }
  0xb0   :  { %420 = vmatprep.subr.bf16.mxu1 %v3324_v43  ;;  %2057 = vmatpush1.bf16.msra.mxu0 %v3872_v48  ;;  %v156_v38 = vld [vmem:[#allocation14] ss:$8 sm:$0xf]  ;;  %v170_v48 = vsub.s32 2, %v4747_v37 }
  0xb1   :  { %2058 = vmatprep.subr.bf16.mxu0 %v3873_v49  ;;  %v157_v39 = vld [vmem:[#allocation14] ss:$8 sm:$0xf0] }
  0xb2   :  { %v4749_v40 = vor.u32 %v157_v39, %v156_v38  ;;  %v3945_v38 = vld [vmem:[#allocation7 + $0x260] ss:$16 sps:$4 sm:$0xff]   ;;  %v3948_v39 = vld [vmem:[#allocation7 + $0x268] ss:$16 sps:$4 sm:$0xff]  }
  0xb3   :  { %421 = vmatpush1.bf16.msra.mxu1 %v3323_v46 }
  0xb4   :  { %2216 = vmatprep.subr.bf16.mxu1 %v3835_v47  ;;  %2059 = vmatpush1.bf16.msra.mxu0 %v3878_v52  ;;  %v163_v43 = vrot.slane %v4749_v40, %v4752_v41  ;;  %v167_v44 = vrot.slane %v4749_v40, %v4755_v42 }
  0xb5   :  { %2060 = vmatprep.subr.bf16.mxu0 %v3879_v53 }
  0xb6   :  { %3328 = vmatmul.mubr.msk.bf16.vlgmr.msra.gmra.mrb[12].mxu1 %vm285_vm0, %v4734_v11  ;;  %v3877_v11 = vld [vmem:[#allocation7 + $0xec] ss:$16 sps:$4 sm:$0xff]  }
  0xb7   :  { %2217 = vmatpush1.bf16.msra.mxu1 %v3833_v50 }
  0xb8   :  { %2218 = vmatprep.subr.bf16.mxu1 %v3841_v51  ;;  %2061 = vmatpush1.bf16.msra.mxu0 %v3884_v56  ;;  %v174_v51 = vsub.s32 3, %v4747_v37 }
  0xb9   :  { %2062 = vmatprep.subr.bf16.mxu0 %v3885_v57  ;;  %v171_v57 = vrot.slane %v4749_v40, %v170_v48 }
  0xbb   :  { %2219 = vmatpush1.bf16.msra.mxu1 %v3839_v54 }
  0xbc   :  { %2220 = vmatprep.subr.bf16.mxu1 %v3847_v55  ;;  %2063 = vmatpush1.bf16.msra.mxu0 %v3890_v60  ;;  %v175_v60 = vrot.slane %v4749_v40, %v174_v51 }
  0xbd   :  { %2064 = vmatprep.subr.bf16.mxu0 %v3891_v61 }
  0xbf   :  { %2221 = vmatpush1.bf16.msra.mxu1 %v3845_v58 }
  0xc0   :  { %2222 = vmatprep.subr.bf16.mxu1 %v3853_v59  ;;  %2065 = vmatpush1.bf16.msra.mxu0 %v3896_v0  ;;  %v3930_v0 = vld [vmem:[#allocation7 + $0x208] ss:$16 sps:$4 sm:$0xff]  }
  0xc1   :  { %2066 = vmatprep.subr.bf16.mxu0 %v3897_v1 }
  0xc3   :  { %2223 = vmatpush1.bf16.msra.mxu1 %v3851_v62 }
  0xc4   :  { %2224 = vmatprep.subr.bf16.mxu1 %v3859_v63  ;;  %2067 = vmatpush1.bf16.msra.mxu0 %v3902_v4  ;;  %v3927_v63 = vld [vmem:[#allocation7 + $0x200] ss:$16 sps:$4 sm:$0xff]  }
  0xc5   :  { %2068 = vmatprep.subr.bf16.mxu0 %v3903_v5 }
  0xc7   :  { %2225 = vmatpush1.bf16.msra.mxu1 %v3857_v2  ;;  %v3935_v2 = vld [vmem:[#allocation7 + $0x224] ss:$16 sps:$4 sm:$0xff]  }
  0xc8   :  { %2226 = vmatprep.subr.bf16.mxu1 %v3865_v3  ;;  %2069 = vmatpush1.bf16.msra.mxu0 %v3908_v8  ;;  %v3938_v3 = vld [vmem:[#allocation7 + $0x22c] ss:$16 sps:$4 sm:$0xff]  }
  0xc9   :  { %2070 = vmatprep.subr.bf16.mxu0 %v3909_v9  ;;  %v182_v9 = vsub.s32 5, %v4747_v37 }
  0xcb   :  { %2227 = vmatpush1.bf16.msra.mxu1 %v3863_v6  ;;  %v178_v6 = vsub.s32 4, %v4747_v37 }
  0xcc   :  { %2228 = vmatprep.subr.bf16.mxu1 %v3871_v7  ;;  %2071 = vmatpush1.bf16.msra.mxu0 %v3914_v12 }
  0xcd   :  { %2072 = vmatprep.subr.bf16.mxu0 %v3915_v26 }
  0xcf   :  { %2229 = vmatpush1.bf16.msra.mxu1 %v3869_v10 }
  0xd0   :  { %2230 = vmatprep.subr.bf16.mxu1 %v3877_v11  ;;  %2073 = vmatpush1.bf16.msra.mxu0 %v3920_v29  ;;  %v3950_v29 = vld [vmem:[#allocation7 + $0x26c] ss:$16 sps:$4 sm:$0xff]  }
  0xd1   :  { %2074 = vmatprep.subr.bf16.mxu0 %v3921_v30 }
  0xd3   :  { %2231 = vmatpush1.bf16.msra.mxu1 %v3875_v13  ;;  %v3933_v13 = vld [vmem:[#allocation7 + $0x220] ss:$16 sps:$4 sm:$0xff]  }
  0xd4   :  { %2232 = vmatprep.subr.bf16.mxu1 %v3883_v14  ;;  %2075 = vmatpush1.bf16.msra.mxu0 %v3926_v33  ;;  %v3936_v14 = vld [vmem:[#allocation7 + $0x228] ss:$16 sps:$4 sm:$0xff]  }
  0xd5   :  { %2087 = vmatprep.subr.bf16.mxu0 %v3929_v34 }
  0xd7   :  { %2233 = vmatpush1.bf16.msra.mxu1 %v3881_v15 }
  0xd8   :  { %2234 = vmatprep.subr.bf16.mxu1 %v3889_v16 }
  0xdb   :  { %2235 = vmatpush1.bf16.msra.mxu1 %v3887_v17  ;;  %v3941_v17 = vld [vmem:[#allocation7 + $0x244] ss:$16 sps:$4 sm:$0xff]  }
  0xdc   :  { %2236 = vmatprep.subr.bf16.mxu1 %v3895_v18  ;;  %v3944_v18 = vld [vmem:[#allocation7 + $0x24c] ss:$16 sps:$4 sm:$0xff]  }
  0xdf   :  { %2237 = vmatpush1.bf16.msra.mxu1 %v3893_v19 }
  0xe0   :  { %2238 = vmatprep.subr.bf16.mxu1 %v3901_v20  ;;  %v179_v20 = vrot.slane %v4749_v40, %v178_v6  ;;  %v3978_v6 = vld [vmem:[#allocation7 + $0x308] ss:$16 sps:$4 sm:$0xff]  }
  0xe3   :  { %2239 = vmatpush1.bf16.msra.mxu1 %v3899_v21 }
  0xe4   :  { %2240 = vmatprep.subr.bf16.mxu1 %v3907_v22  ;;  %v183_v22 = vrot.slane %v4749_v40, %v182_v9  ;;  %v3981_v9 = vld [vmem:[#allocation7 + $0x320] ss:$16 sps:$4 sm:$0xff]  }
  0xe7   :  { %2241 = vmatpush1.bf16.msra.mxu1 %v3905_v23 }
  0xe8   :  { %2242 = vmatprep.subr.bf16.mxu1 %v3913_v24  ;;  %v3939_v24 = vld [vmem:[#allocation7 + $0x240] ss:$16 sps:$4 sm:$0xff]  }
  0xeb   :  { %2243 = vmatpush1.bf16.msra.mxu1 %v3911_v25  ;;  %v3942_v25 = vld [vmem:[#allocation7 + $0x248] ss:$16 sps:$4 sm:$0xff]  }
  0xec   :  { %2244 = vmatprep.subr.bf16.mxu1 %v3919_v27 }
  0xef   :  { %2245 = vmatpush1.bf16.msra.mxu1 %v3917_v28  ;;  %v3947_v28 = vld [vmem:[#allocation7 + $0x264] ss:$16 sps:$4 sm:$0xff]  }
  0xf0   :  { %2246 = vmatprep.subr.bf16.mxu1 %v3925_v31 }
  0xf3   :  { %2247 = vmatpush1.bf16.msra.mxu1 %v3923_v32 }
  0xf4   :  { %2259 = vmatprep.subr.bf16.mxu1 %v3932_v35 }
 0x171   :  { %v323_v45 = vpop.f32.mrb[0].mxu1 }
 0x172   :  { %v324_v46 = vadd.f32 %v323_v45, %v163_v43  ;;  %v325_v47 = vpop.f32.mrb[1].mxu1  ;;  %v3953_v45 = vld [vmem:[#allocation7 + $0x284] ss:$16 sps:$4 sm:$0xff]  }
 0x173   :  { %v326_v49 = vadd.f32 %v325_v47, %v167_v44  ;;  %v327_v50 = vpop.f32.mrb[2].mxu1 }
 0x174   :  { %v328_v52 = vadd.f32 %v327_v50, %v163_v43  ;;  %v329_v53 = vpop.f32.mrb[3].mxu1  ;;  %v461_v55 = vmax.f32 %v324_v46, 0.0  ;;  %v3956_v46 = vld [vmem:[#allocation7 + $0x28c] ss:$16 sps:$4 sm:$0xff]  }
 0x175   :  { %v330_v54 = vadd.f32 %v329_v53, %v167_v44  ;;  %v462_v58 = vmax.f32 %v326_v49, 0.0  ;;  %v3954_v53 = vld [vmem:[#allocation7 + $0x288] ss:$16 sps:$4 sm:$0xff]  }
 0x176   :  { %v469_v56 = vmax.f32 %v328_v52, 0.0  ;;  %v3951_v52 = vld [vmem:[#allocation7 + $0x280] ss:$16 sps:$4 sm:$0xff]  }
 0x177   :  { %v470_v59 = vmax.f32 %v330_v54, 0.0 }
 0x178   :  { %v477_v61 = vpack.c.bf16 %v469_v56, %v461_v55  ;;  %v3959_v55 = vld [vmem:[#allocation7 + $0x2a4] ss:$16 sps:$4 sm:$0xff]   ;;  %v3962_v56 = vld [vmem:[#allocation7 + $0x2ac] ss:$16 sps:$4 sm:$0xff]  }
 0x179   :  { %v478_v62 = vpack.c.bf16 %v470_v59, %v462_v58  ;;  %v366_v1 = vpop.f32.mrb[4].mxu1  ;;  %v3960_v58 = vld [vmem:[#allocation7 + $0x2a8] ss:$16 sps:$4 sm:$0xff]   ;;  %v3965_v59 = vld [vmem:[#allocation7 + $0x2c4] ss:$16 sps:$4 sm:$0xff]  }
 0x17a   :  { %v367_v4 = vadd.f32 %v366_v1, %v171_v57  ;;  %v368_v5 = vpop.f32.mrb[5].mxu1  ;;  %v3969_v1 = vld [vmem:[#allocation7 + $0x2e0] ss:$16 sps:$4 sm:$0xff]  }
 0x17b   :  { %2076 = vmatprep.mubr.bf16.mxu0 %v478_v62  ;;  %2248 = vmatprep.mubr.bf16.mxu1 %v478_v62  ;;  %v369_v7 = vadd.f32 %v368_v5, %v175_v60  ;;  %v370_v8 = vpop.f32.mrb[6].mxu1  ;;  %v3966_v62 = vld [vmem:[#allocation7 + $0x2c8] ss:$16 sps:$4 sm:$0xff]   ;;  %v3975_v5 = vld [vmem:[#allocation7 + $0x300] ss:$16 sps:$4 sm:$0xff]  }
 0x17c   :  { %2077 = vmatmul.mubr.bf16.vlgmr.msra.gmra.mrb[0].mxu0 %v477_v61  ;;  %2249 = vmatmul.mubr.bf16.vlgmr.msra.gmra.mrb[16].mxu1 %v477_v61  ;;  %v463_v10 = vmax.f32 %v367_v4, 0.0  ;;  %v371_v11 = vadd.f32 %v370_v8, %v171_v57  ;;  %v372_v12 = vpop.f32.mrb[7].mxu1  ;;  %v3957_v57 = vld [vmem:[#allocation7 + $0x2a0] ss:$16 sps:$4 sm:$0xff]   ;;  %v3980_v4 = vld [vmem:[#allocation7 + $0x30c] ss:$16 sps:$4 sm:$0xff]  }
 0x17d   :  { %2088 = vmatpush1.bf16.msra.mxu0 %v3927_v63  ;;  %2260 = vmatpush1.bf16.msra.mxu1 %v3930_v0  ;;  %v464_v15 = vmax.f32 %v369_v7, 0.0  ;;  %v373_v16 = vadd.f32 %v372_v12, %v175_v60  ;;  %v3968_v60 = vld [vmem:[#allocation7 + $0x2cc] ss:$16 sps:$4 sm:$0xff]   ;;  %v3963_v61 = vld [vmem:[#allocation7 + $0x2c0] ss:$16 sps:$4 sm:$0xff]  }
 0x17e   :  { %2089 = vmatprep.subr.bf16.mxu0 %v3935_v2  ;;  %2261 = vmatprep.subr.bf16.mxu1 %v3938_v3  ;;  %v471_v19 = vmax.f32 %v371_v11, 0.0  ;;  %v3971_v63 = vld [vmem:[#allocation7 + $0x2e4] ss:$16 sps:$4 sm:$0xff]   ;;  %v3974_v0 = vld [vmem:[#allocation7 + $0x2ec] ss:$16 sps:$4 sm:$0xff]  }
 0x17f   :  { %v472_v21 = vmax.f32 %v373_v16, 0.0  ;;  %v3972_v2 = vld [vmem:[#allocation7 + $0x2e8] ss:$16 sps:$4 sm:$0xff]   ;;  %v3977_v3 = vld [vmem:[#allocation7 + $0x304] ss:$16 sps:$4 sm:$0xff]  }
 0x180   :  { %v4773_v23 = vpack.c.bf16 %v471_v19, %v463_v10  ;;  %v3983_v7 = vld [vmem:[#allocation7 + $0x324] ss:$16 sps:$4 sm:$0xff]   ;;  %v3986_v8 = vld [vmem:[#allocation7 + $0x32c] ss:$16 sps:$4 sm:$0xff]   ;;  %v3984_v10 = vld [vmem:[#allocation7 + $0x328] ss:$16 sps:$4 sm:$0xff]  }
 0x181   :  { %2090 = vmatpush1.bf16.msra.mxu0 %v3933_v13  ;;  %2262 = vmatpush1.bf16.msra.mxu1 %v3936_v14  ;;  %v480_v26 = vpack.c.bf16 %v472_v21, %v464_v15  ;;  %v409_v27 = vpop.f32.mrb[8].mxu1  ;;  %v3989_v11 = vld [vmem:[#allocation7 + $0x344] ss:$16 sps:$4 sm:$0xff]   ;;  %v3992_v12 = vld [vmem:[#allocation7 + $0x34c] ss:$16 sps:$4 sm:$0xff]  }
 0x182   :  { %2091 = vmatprep.subr.bf16.mxu0 %v3941_v17  ;;  %2263 = vmatprep.subr.bf16.mxu1 %v3944_v18  ;;  %v410_v30 = vadd.f32 %v409_v27, %v179_v20  ;;  %v411_v31 = vpop.f32.mrb[9].mxu1  ;;  %v3987_v13 = vld [vmem:[#allocation7 + $0x340] ss:$16 sps:$4 sm:$0xff]   ;;  %v3990_v14 = vld [vmem:[#allocation7 + $0x348] ss:$16 sps:$4 sm:$0xff]  }
 0x183   :  { %2119 = vmatprep.mubr.bf16.mxu0 %v480_v26  ;;  %2291 = vmatprep.mubr.bf16.mxu1 %v480_v26  ;;  %v412_v32 = vadd.f32 %v411_v31, %v183_v22  ;;  %v413_v33 = vpop.f32.mrb[10].mxu1  ;;  %v3995_v15 = vld [vmem:[#allocation7 + $0x364] ss:$16 sps:$4 sm:$0xff]   ;;  %v3998_v16 = vld [vmem:[#allocation7 + $0x36c] ss:$16 sps:$4 sm:$0xff]  }
 0x184   :  { %v465_v34 = vmax.f32 %v410_v30, 0.0  ;;  %v414_v35 = vadd.f32 %v413_v33, %v179_v20  ;;  %v415_v36 = vpop.f32.mrb[11].mxu1  ;;  %v3993_v17 = vld [vmem:[#allocation7 + $0x360] ss:$16 sps:$4 sm:$0xff]   ;;  %v3996_v18 = vld [vmem:[#allocation7 + $0x368] ss:$16 sps:$4 sm:$0xff]  }
 0x185   :  { %2092 = vmatpush1.bf16.msra.mxu0 %v3939_v24  ;;  %2264 = vmatpush1.bf16.msra.mxu1 %v3942_v25  ;;  %v466_v43 = vmax.f32 %v412_v32, 0.0  ;;  %v416_v44 = vadd.f32 %v415_v36, %v183_v22  ;;  %v4001_v19 = vld [vmem:[#allocation7 + $0x384] ss:$16 sps:$4 sm:$0xff]   ;;  %v4004_v20 = vld [vmem:[#allocation7 + $0x38c] ss:$16 sps:$4 sm:$0xff]   ;;  %v190_v30 = vsub.s32 7, %v4747_v37 }
 0x186   :  { %2093 = vmatprep.subr.bf16.mxu0 %v3947_v28  ;;  %2265 = vmatprep.subr.bf16.mxu1 %v3950_v29  ;;  %v473_v47 = vmax.f32 %v414_v35, 0.0  ;;  %v3999_v21 = vld [vmem:[#allocation7 + $0x380] ss:$16 sps:$4 sm:$0xff]   ;;  %v4002_v22 = vld [vmem:[#allocation7 + $0x388] ss:$16 sps:$4 sm:$0xff]   ;;  %v186_v28 = vsub.s32 6, %v4747_v37 }
 0x187   :  { %v474_v49 = vmax.f32 %v416_v44, 0.0  ;;  %v4007_v24 = vld [vmem:[#allocation7 + $0x3a4] ss:$16 sps:$4 sm:$0xff]   ;;  %v4010_v25 = vld [vmem:[#allocation7 + $0x3ac] ss:$16 sps:$4 sm:$0xff]   ;;  %v191_v35 = vrot.slane %v4749_v40, %v190_v30 }
 0x188   :  { %v4775_v50 = vpack.c.bf16 %v473_v47, %v465_v34  ;;  %v4005_v26 = vld [vmem:[#allocation7 + $0x3a0] ss:$16 sps:$4 sm:$0xff]   ;;  %v4008_v27 = vld [vmem:[#allocation7 + $0x3a8] ss:$16 sps:$4 sm:$0xff]   ;;  %v4013_v31 = vld [vmem:[#allocation7 + $0x3c4] ss:$16 sps:$4 sm:$0xff]   ;;  %v187_v34 = vrot.slane %v4749_v40, %v186_v28 }
 0x189   :  { %2094 = vmatpush1.bf16.msra.mxu0 %v3945_v38  ;;  %2266 = vmatpush1.bf16.msra.mxu1 %v3948_v39  ;;  %v4777_v54 = vpack.c.bf16 %v474_v49, %v466_v43  ;;  %v452_v29 = vpop.f32.mrb[12].mxu1  ;;  %v4016_v32 = vld [vmem:[#allocation7 + $0x3cc] ss:$16 sps:$4 sm:$0xff]   ;;  %v4011_v39 = vld [vmem:[#allocation7 + $0x3c0] ss:$16 sps:$4 sm:$0xff]  }
 0x18a   :  { %2095 = vmatprep.subr.bf16.mxu0 %v3953_v45  ;;  %2267 = vmatprep.subr.bf16.mxu1 %v3956_v46  ;;  %v454_v33 = vpop.f32.mrb[13].mxu1  ;;  %v4014_v43 = vld [vmem:[#allocation7 + $0x3c8] ss:$16 sps:$4 sm:$0xff]   ;;  %v453_v44 = vadd.f32 %v452_v29, %v187_v34  ;;  %v4019_v47 = vld [vmem:[#allocation7 + $0x3e4] ss:$16 sps:$4 sm:$0xff]  }
 0x18b   :  { %v456_v36 = vpop.f32.mrb[14].mxu1  ;;  %v455_v45 = vadd.f32 %v454_v33, %v191_v35  ;;  %v4022_v49 = vld [vmem:[#allocation7 + $0x3ec] ss:$16 sps:$4 sm:$0xff]   ;;  %v4017_v40 = vld [vmem:[#allocation7 + $0x3e0] ss:$16 sps:$4 sm:$0xff]  }
 0x18c   :  { %v458_v38 = vpop.f32.mrb[15].mxu1  ;;  %v457_v46 = vadd.f32 %v456_v36, %v187_v34  ;;  %v4073_v28 = vld [vmem:[#allocation7 + $0x504] ss:$16 sps:$4 sm:$0xff]   ;;  %v4076_v29 = vld [vmem:[#allocation7 + $0x50c] ss:$16 sps:$4 sm:$0xff]  }
 0x18d   :  { %2096 = vmatpush1.bf16.msra.mxu0 %v3951_v52  ;;  %2268 = vmatpush1.bf16.msra.mxu1 %v3954_v53  ;;  %v459_v52 = vadd.f32 %v458_v38, %v191_v35  ;;  %v467_v53 = vmax.f32 %v453_v44, 0.0  ;;  %v4071_v30 = vld [vmem:[#allocation7 + $0x500] ss:$16 sps:$4 sm:$0xff]   ;;  %v4082_v33 = vld [vmem:[#allocation7 + $0x52c] ss:$16 sps:$4 sm:$0xff]  }
 0x18e   :  { %2097 = vmatprep.subr.bf16.mxu0 %v3959_v55  ;;  %2269 = vmatprep.subr.bf16.mxu1 %v3962_v56  ;;  %v468_v55 = vmax.f32 %v455_v45, 0.0  ;;  %v475_v56 = vmax.f32 %v457_v46, 0.0  ;;  %v4077_v34 = vld [vmem:[#allocation7 + $0x520] ss:$16 sps:$4 sm:$0xff]   ;;  %v4080_v35 = vld [vmem:[#allocation7 + $0x528] ss:$16 sps:$4 sm:$0xff]  }
 0x18f   :  { %v4085_v36 = vld [vmem:[#allocation7 + $0x544] ss:$16 sps:$4 sm:$0xff]   ;;  %v4088_v38 = vld [vmem:[#allocation7 + $0x54c] ss:$16 sps:$4 sm:$0xff]   ;;  %v4089_v46 = vld [vmem:[#allocation7 + $0x560] ss:$16 sps:$4 sm:$0xff]  }
 0x190   :  { %v4091_v44 = vld [vmem:[#allocation7 + $0x564] ss:$16 sps:$4 sm:$0xff]   ;;  %v4094_v45 = vld [vmem:[#allocation7 + $0x56c] ss:$16 sps:$4 sm:$0xff]  }
 0x191   :  { %2098 = vmatpush1.bf16.msra.mxu0 %v3957_v57  ;;  %2270 = vmatpush1.bf16.msra.mxu1 %v3960_v58  ;;  %v476_v57 = vmax.f32 %v459_v52, 0.0  ;;  %v4020_v58 = vld [vmem:[#allocation7 + $0x3e8] ss:$16 sps:$4 sm:$0xff]   ;;  %v4100_v52 = vld [vmem:[#allocation7 + $0x58c] ss:$16 sps:$4 sm:$0xff]  }
 0x192   :  { %2099 = vmatprep.subr.bf16.mxu0 %v3965_v59  ;;  %2271 = vmatprep.subr.bf16.mxu1 %v3968_v60  ;;  %v4783_v59 = vpack.c.bf16 %v475_v56, %v467_v53  ;;  %v4025_v60 = vld [vmem:[#allocation7 + $0x404] ss:$16 sps:$4 sm:$0xff]   ;;  %v4095_v53 = vld [vmem:[#allocation7 + $0x580] ss:$16 sps:$4 sm:$0xff]  }
 0x193   :  { %v4103_v56 = vld [vmem:[#allocation7 + $0x5a4] ss:$16 sps:$4 sm:$0xff]  }
 0x195   :  { %2100 = vmatpush1.bf16.msra.mxu0 %v3963_v61  ;;  %2272 = vmatpush1.bf16.msra.mxu1 %v3966_v62  ;;  %v4028_v61 = vld [vmem:[#allocation7 + $0x40c] ss:$16 sps:$4 sm:$0xff]   ;;  %v4785_v62 = vpack.c.bf16 %v476_v57, %v468_v55  ;;  %v4098_v55 = vld [vmem:[#allocation7 + $0x588] ss:$16 sps:$4 sm:$0xff]  }
 0x196   :  { %2101 = vmatprep.subr.bf16.mxu0 %v3971_v63  ;;  %2273 = vmatprep.subr.bf16.mxu1 %v3974_v0  ;;  %v4023_v63 = vld [vmem:[#allocation7 + $0x400] ss:$16 sps:$4 sm:$0xff]   ;;  %v4026_v0 = vld [vmem:[#allocation7 + $0x408] ss:$16 sps:$4 sm:$0xff]   ;;  %v4106_v57 = vld [vmem:[#allocation7 + $0x5ac] ss:$16 sps:$4 sm:$0xff]  }
 0x199   :  { %2102 = vmatpush1.bf16.msra.mxu0 %v3969_v1  ;;  %2274 = vmatpush1.bf16.msra.mxu1 %v3972_v2  ;;  %v4031_v1 = vld [vmem:[#allocation7 + $0x424] ss:$16 sps:$4 sm:$0xff]   ;;  %v4034_v2 = vld [vmem:[#allocation7 + $0x42c] ss:$16 sps:$4 sm:$0xff]  }
 0x19a   :  { %2103 = vmatprep.subr.bf16.mxu0 %v3977_v3  ;;  %2275 = vmatprep.subr.bf16.mxu1 %v3980_v4  ;;  %v4029_v3 = vld [vmem:[#allocation7 + $0x420] ss:$16 sps:$4 sm:$0xff]   ;;  %v4032_v4 = vld [vmem:[#allocation7 + $0x428] ss:$16 sps:$4 sm:$0xff]  }
 0x19d   :  { %2104 = vmatpush1.bf16.msra.mxu0 %v3975_v5  ;;  %2276 = vmatpush1.bf16.msra.mxu1 %v3978_v6  ;;  %v4037_v5 = vld [vmem:[#allocation7 + $0x444] ss:$16 sps:$4 sm:$0xff]   ;;  %v4040_v6 = vld [vmem:[#allocation7 + $0x44c] ss:$16 sps:$4 sm:$0xff]  }
 0x19e   :  { %2105 = vmatprep.subr.bf16.mxu0 %v3983_v7  ;;  %2277 = vmatprep.subr.bf16.mxu1 %v3986_v8  ;;  %v4035_v7 = vld [vmem:[#allocation7 + $0x440] ss:$16 sps:$4 sm:$0xff]   ;;  %v4038_v8 = vld [vmem:[#allocation7 + $0x448] ss:$16 sps:$4 sm:$0xff]  }
 0x1a1   :  { %2106 = vmatpush1.bf16.msra.mxu0 %v3981_v9  ;;  %2278 = vmatpush1.bf16.msra.mxu1 %v3984_v10  ;;  %v4043_v9 = vld [vmem:[#allocation7 + $0x464] ss:$16 sps:$4 sm:$0xff]   ;;  %v4041_v10 = vld [vmem:[#allocation7 + $0x460] ss:$16 sps:$4 sm:$0xff]  }
 0x1a2   :  { %2107 = vmatprep.subr.bf16.mxu0 %v3989_v11  ;;  %2279 = vmatprep.subr.bf16.mxu1 %v3992_v12  ;;  %v4044_v11 = vld [vmem:[#allocation7 + $0x468] ss:$16 sps:$4 sm:$0xff]   ;;  %v4049_v12 = vld [vmem:[#allocation7 + $0x484] ss:$16 sps:$4 sm:$0xff]  }
 0x1a5   :  { %2108 = vmatpush1.bf16.msra.mxu0 %v3987_v13  ;;  %2280 = vmatpush1.bf16.msra.mxu1 %v3990_v14  ;;  %v4052_v13 = vld [vmem:[#allocation7 + $0x48c] ss:$16 sps:$4 sm:$0xff]   ;;  %v4047_v14 = vld [vmem:[#allocation7 + $0x480] ss:$16 sps:$4 sm:$0xff]  }
 0x1a6   :  { %2109 = vmatprep.subr.bf16.mxu0 %v3995_v15  ;;  %2281 = vmatprep.subr.bf16.mxu1 %v3998_v16  ;;  %v4055_v15 = vld [vmem:[#allocation7 + $0x4a4] ss:$16 sps:$4 sm:$0xff]   ;;  %v4058_v16 = vld [vmem:[#allocation7 + $0x4ac] ss:$16 sps:$4 sm:$0xff]  }
 0x1a9   :  { %2110 = vmatpush1.bf16.msra.mxu0 %v3993_v17  ;;  %2282 = vmatpush1.bf16.msra.mxu1 %v3996_v18  ;;  %v4053_v17 = vld [vmem:[#allocation7 + $0x4a0] ss:$16 sps:$4 sm:$0xff]   ;;  %v4056_v18 = vld [vmem:[#allocation7 + $0x4a8] ss:$16 sps:$4 sm:$0xff]  }
 0x1aa   :  { %2111 = vmatprep.subr.bf16.mxu0 %v4001_v19  ;;  %2283 = vmatprep.subr.bf16.mxu1 %v4004_v20  ;;  %v4061_v19 = vld [vmem:[#allocation7 + $0x4c4] ss:$16 sps:$4 sm:$0xff]   ;;  %v4064_v20 = vld [vmem:[#allocation7 + $0x4cc] ss:$16 sps:$4 sm:$0xff]  }
 0x1ad   :  { %2112 = vmatpush1.bf16.msra.mxu0 %v3999_v21  ;;  %2284 = vmatpush1.bf16.msra.mxu1 %v4002_v22  ;;  %v4059_v21 = vld [vmem:[#allocation7 + $0x4c0] ss:$16 sps:$4 sm:$0xff]   ;;  %v4062_v22 = vld [vmem:[#allocation7 + $0x4c8] ss:$16 sps:$4 sm:$0xff]  }
 0x1ae   :  { %2113 = vmatprep.subr.bf16.mxu0 %v4007_v24  ;;  %2285 = vmatprep.subr.bf16.mxu1 %v4010_v25  ;;  %v4067_v24 = vld [vmem:[#allocation7 + $0x4e4] ss:$16 sps:$4 sm:$0xff]   ;;  %v4070_v25 = vld [vmem:[#allocation7 + $0x4ec] ss:$16 sps:$4 sm:$0xff]  }
 0x1b1   :  { %2114 = vmatpush1.bf16.msra.mxu0 %v4005_v26  ;;  %2286 = vmatpush1.bf16.msra.mxu1 %v4008_v27  ;;  %v4065_v26 = vld [vmem:[#allocation7 + $0x4e0] ss:$16 sps:$4 sm:$0xff]   ;;  %v4068_v27 = vld [vmem:[#allocation7 + $0x4e8] ss:$16 sps:$4 sm:$0xff]  }
 0x1b2   :  { %2115 = vmatprep.subr.bf16.mxu0 %v4013_v31  ;;  %2287 = vmatprep.subr.bf16.mxu1 %v4016_v32  ;;  %v4074_v31 = vld [vmem:[#allocation7 + $0x508] ss:$16 sps:$4 sm:$0xff]   ;;  %v4079_v32 = vld [vmem:[#allocation7 + $0x524] ss:$16 sps:$4 sm:$0xff]  }
 0x1b5   :  { %2116 = vmatpush1.bf16.msra.mxu0 %v4011_v39  ;;  %2288 = vmatpush1.bf16.msra.mxu1 %v4014_v43  ;;  %v4083_v39 = vld [vmem:[#allocation7 + $0x540] ss:$16 sps:$4 sm:$0xff]   ;;  %v4086_v43 = vld [vmem:[#allocation7 + $0x548] ss:$16 sps:$4 sm:$0xff]  }
 0x1b6   :  { %2117 = vmatprep.subr.bf16.mxu0 %v4019_v47  ;;  %2289 = vmatprep.subr.bf16.mxu1 %v4022_v49  ;;  %v4092_v47 = vld [vmem:[#allocation7 + $0x568] ss:$16 sps:$4 sm:$0xff]   ;;  %v4097_v49 = vld [vmem:[#allocation7 + $0x584] ss:$16 sps:$4 sm:$0xff]  }
 0x1b9   :  { %2118 = vmatpush1.bf16.msra.mxu0 %v4017_v40  ;;  %2290 = vmatpush1.bf16.msra.mxu1 %v4020_v58  ;;  %v4101_v40 = vld [vmem:[#allocation7 + $0x5a0] ss:$16 sps:$4 sm:$0xff]   ;;  %v4104_v58 = vld [vmem:[#allocation7 + $0x5a8] ss:$16 sps:$4 sm:$0xff]  }
 0x1ba   :  { %2130 = vmatprep.subr.bf16.mxu0 %v4025_v60  ;;  %2302 = vmatprep.subr.bf16.mxu1 %v4028_v61  ;;  %v4109_v60 = vld [vmem:[#allocation7 + $0x5c4] ss:$16 sps:$4 sm:$0xff]   ;;  %v4112_v61 = vld [vmem:[#allocation7 + $0x5cc] ss:$16 sps:$4 sm:$0xff]  }
 0x1bc   :  { %2120 = vmatmul.mubr.bf16.vlgmr.msra.gmra.mrb[0].mxu0 %v4773_v23  ;;  %2292 = vmatmul.mubr.bf16.vlgmr.msra.gmra.mrb[16].mxu1 %v4773_v23  ;;  %v4046_v23 = vld [vmem:[#allocation7 + $0x46c] ss:$16 sps:$4 sm:$0xff]  }
 0x1bd   :  { %2131 = vmatpush1.bf16.msra.mxu0 %v4023_v63  ;;  %2303 = vmatpush1.bf16.msra.mxu1 %v4026_v0  ;;  %v4107_v63 = vld [vmem:[#allocation7 + $0x5c0] ss:$16 sps:$4 sm:$0xff]   ;;  %v4110_v0 = vld [vmem:[#allocation7 + $0x5c8] ss:$16 sps:$4 sm:$0xff]  }
 0x1be   :  { %2132 = vmatprep.subr.bf16.mxu0 %v4031_v1  ;;  %2304 = vmatprep.subr.bf16.mxu1 %v4034_v2  ;;  %v4115_v1 = vld [vmem:[#allocation7 + $0x5e4] ss:$16 sps:$4 sm:$0xff]   ;;  %v4118_v2 = vld [vmem:[#allocation7 + $0x5ec] ss:$16 sps:$4 sm:$0xff]  }
 0x1bf   :  { %2162 = vmatprep.mubr.bf16.mxu0 %v4777_v54  ;;  %2334 = vmatprep.mubr.bf16.mxu1 %v4777_v54  ;;  %v4050_v54 = vld [vmem:[#allocation7 + $0x488] ss:$16 sps:$4 sm:$0xff]  }
 0x1c1   :  { %2133 = vmatpush1.bf16.msra.mxu0 %v4029_v3  ;;  %2305 = vmatpush1.bf16.msra.mxu1 %v4032_v4  ;;  %v4113_v3 = vld [vmem:[#allocation7 + $0x5e0] ss:$16 sps:$4 sm:$0xff]   ;;  %v4116_v4 = vld [vmem:[#allocation7 + $0x5e8] ss:$16 sps:$4 sm:$0xff]  }
 0x1c2   :  { %2134 = vmatprep.subr.bf16.mxu0 %v4037_v5  ;;  %2306 = vmatprep.subr.bf16.mxu1 %v4040_v6  ;;  %v4121_v5 = vld [vmem:[#allocation7 + $0x604] ss:$16 sps:$4 sm:$0xff]   ;;  %v4124_v6 = vld [vmem:[#allocation7 + $0x60c] ss:$16 sps:$4 sm:$0xff]  }
 0x1c5   :  { %2135 = vmatpush1.bf16.msra.mxu0 %v4035_v7  ;;  %2307 = vmatpush1.bf16.msra.mxu1 %v4038_v8  ;;  %v4119_v7 = vld [vmem:[#allocation7 + $0x600] ss:$16 sps:$4 sm:$0xff]   ;;  %v4122_v8 = vld [vmem:[#allocation7 + $0x608] ss:$16 sps:$4 sm:$0xff]  }
 0x1c6   :  { %2136 = vmatprep.subr.bf16.mxu0 %v4043_v9  ;;  %2308 = vmatprep.subr.bf16.mxu1 %v4046_v23  ;;  %v4127_v9 = vld [vmem:[#allocation7 + $0x624] ss:$16 sps:$4 sm:$0xff]   ;;  %v4130_v23 = vld [vmem:[#allocation7 + $0x62c] ss:$16 sps:$4 sm:$0xff]  }
 0x1c9   :  { %2137 = vmatpush1.bf16.msra.mxu0 %v4041_v10  ;;  %2309 = vmatpush1.bf16.msra.mxu1 %v4044_v11  ;;  %v4125_v10 = vld [vmem:[#allocation7 + $0x620] ss:$16 sps:$4 sm:$0xff]   ;;  %v4128_v11 = vld [vmem:[#allocation7 + $0x628] ss:$16 sps:$4 sm:$0xff]  }
 0x1ca   :  { %2138 = vmatprep.subr.bf16.mxu0 %v4049_v12  ;;  %2310 = vmatprep.subr.bf16.mxu1 %v4052_v13  ;;  %v4133_v12 = vld [vmem:[#allocation7 + $0x644] ss:$16 sps:$4 sm:$0xff]   ;;  %v4136_v13 = vld [vmem:[#allocation7 + $0x64c] ss:$16 sps:$4 sm:$0xff]  }
 0x1cd   :  { %2139 = vmatpush1.bf16.msra.mxu0 %v4047_v14  ;;  %2311 = vmatpush1.bf16.msra.mxu1 %v4050_v54  ;;  %v4131_v14 = vld [vmem:[#allocation7 + $0x640] ss:$16 sps:$4 sm:$0xff]   ;;  %v4134_v54 = vld [vmem:[#allocation7 + $0x648] ss:$16 sps:$4 sm:$0xff]  }
 0x1ce   :  { %2140 = vmatprep.subr.bf16.mxu0 %v4055_v15  ;;  %2312 = vmatprep.subr.bf16.mxu1 %v4058_v16  ;;  %v4139_v15 = vld [vmem:[#allocation7 + $0x664] ss:$16 sps:$4 sm:$0xff]   ;;  %v4137_v16 = vld [vmem:[#allocation7 + $0x660] ss:$16 sps:$4 sm:$0xff]  }
 0x1d1   :  { %2141 = vmatpush1.bf16.msra.mxu0 %v4053_v17  ;;  %2313 = vmatpush1.bf16.msra.mxu1 %v4056_v18  ;;  %v4140_v17 = vld [vmem:[#allocation7 + $0x668] ss:$16 sps:$4 sm:$0xff]   ;;  %v4145_v18 = vld [vmem:[#allocation7 + $0x684] ss:$16 sps:$4 sm:$0xff]  }
 0x1d2   :  { %2142 = vmatprep.subr.bf16.mxu0 %v4061_v19  ;;  %2314 = vmatprep.subr.bf16.mxu1 %v4064_v20  ;;  %v4148_v19 = vld [vmem:[#allocation7 + $0x68c] ss:$16 sps:$4 sm:$0xff]   ;;  %v4143_v20 = vld [vmem:[#allocation7 + $0x680] ss:$16 sps:$4 sm:$0xff]  }
 0x1d5   :  { %2143 = vmatpush1.bf16.msra.mxu0 %v4059_v21  ;;  %2315 = vmatpush1.bf16.msra.mxu1 %v4062_v22  ;;  %v4151_v21 = vld [vmem:[#allocation7 + $0x6a4] ss:$16 sps:$4 sm:$0xff]   ;;  %v4154_v22 = vld [vmem:[#allocation7 + $0x6ac] ss:$16 sps:$4 sm:$0xff]  }
 0x1d6   :  { %2144 = vmatprep.subr.bf16.mxu0 %v4067_v24  ;;  %2316 = vmatprep.subr.bf16.mxu1 %v4070_v25  ;;  %v4149_v24 = vld [vmem:[#allocation7 + $0x6a0] ss:$16 sps:$4 sm:$0xff]   ;;  %v4152_v25 = vld [vmem:[#allocation7 + $0x6a8] ss:$16 sps:$4 sm:$0xff]  }
 0x1d9   :  { %2145 = vmatpush1.bf16.msra.mxu0 %v4065_v26  ;;  %2317 = vmatpush1.bf16.msra.mxu1 %v4068_v27  ;;  %v4157_v26 = vld [vmem:[#allocation7 + $0x6c4] ss:$16 sps:$4 sm:$0xff]   ;;  %v4160_v27 = vld [vmem:[#allocation7 + $0x6cc] ss:$16 sps:$4 sm:$0xff]  }
 0x1da   :  { %2146 = vmatprep.subr.bf16.mxu0 %v4073_v28  ;;  %2318 = vmatprep.subr.bf16.mxu1 %v4076_v29  ;;  %v4155_v28 = vld [vmem:[#allocation7 + $0x6c0] ss:$16 sps:$4 sm:$0xff]   ;;  %v4158_v29 = vld [vmem:[#allocation7 + $0x6c8] ss:$16 sps:$4 sm:$0xff]  }
 0x1dd   :  { %2147 = vmatpush1.bf16.msra.mxu0 %v4071_v30  ;;  %2319 = vmatpush1.bf16.msra.mxu1 %v4074_v31  ;;  %v4163_v30 = vld [vmem:[#allocation7 + $0x6e4] ss:$16 sps:$4 sm:$0xff]   ;;  %v4166_v31 = vld [vmem:[#allocation7 + $0x6ec] ss:$16 sps:$4 sm:$0xff]  }
 0x1de   :  { %2148 = vmatprep.subr.bf16.mxu0 %v4079_v32  ;;  %2320 = vmatprep.subr.bf16.mxu1 %v4082_v33  ;;  %v4161_v32 = vld [vmem:[#allocation7 + $0x6e0] ss:$16 sps:$4 sm:$0xff]   ;;  %v4164_v33 = vld [vmem:[#allocation7 + $0x6e8] ss:$16 sps:$4 sm:$0xff]  }
 0x1e1   :  { %2149 = vmatpush1.bf16.msra.mxu0 %v4077_v34  ;;  %2321 = vmatpush1.bf16.msra.mxu1 %v4080_v35  ;;  %v4169_v34 = vld [vmem:[#allocation7 + $0x704] ss:$16 sps:$4 sm:$0xff]   ;;  %v4172_v35 = vld [vmem:[#allocation7 + $0x70c] ss:$16 sps:$4 sm:$0xff]  }
 0x1e2   :  { %2150 = vmatprep.subr.bf16.mxu0 %v4085_v36  ;;  %2322 = vmatprep.subr.bf16.mxu1 %v4088_v38  ;;  %v4167_v36 = vld [vmem:[#allocation7 + $0x700] ss:$16 sps:$4 sm:$0xff]   ;;  %v4170_v38 = vld [vmem:[#allocation7 + $0x708] ss:$16 sps:$4 sm:$0xff]  }
 0x1e5   :  { %2151 = vmatpush1.bf16.msra.mxu0 %v4083_v39  ;;  %2323 = vmatpush1.bf16.msra.mxu1 %v4086_v43  ;;  %v4175_v39 = vld [vmem:[#allocation7 + $0x724] ss:$16 sps:$4 sm:$0xff]   ;;  %v4178_v43 = vld [vmem:[#allocation7 + $0x72c] ss:$16 sps:$4 sm:$0xff]  }
 0x1e6   :  { %2152 = vmatprep.subr.bf16.mxu0 %v4091_v44  ;;  %2324 = vmatprep.subr.bf16.mxu1 %v4094_v45  ;;  %v4173_v44 = vld [vmem:[#allocation7 + $0x720] ss:$16 sps:$4 sm:$0xff]   ;;  %v4176_v45 = vld [vmem:[#allocation7 + $0x728] ss:$16 sps:$4 sm:$0xff]  }
 0x1e9   :  { %2153 = vmatpush1.bf16.msra.mxu0 %v4089_v46  ;;  %2325 = vmatpush1.bf16.msra.mxu1 %v4092_v47  ;;  %v4181_v46 = vld [vmem:[#allocation7 + $0x744] ss:$16 sps:$4 sm:$0xff]   ;;  %v4184_v47 = vld [vmem:[#allocation7 + $0x74c] ss:$16 sps:$4 sm:$0xff]  }
 0x1ea   :  { %2154 = vmatprep.subr.bf16.mxu0 %v4097_v49  ;;  %2326 = vmatprep.subr.bf16.mxu1 %v4100_v52  ;;  %v4179_v49 = vld [vmem:[#allocation7 + $0x740] ss:$16 sps:$4 sm:$0xff]   ;;  %v4182_v52 = vld [vmem:[#allocation7 + $0x748] ss:$16 sps:$4 sm:$0xff]  }
 0x1ed   :  { %2155 = vmatpush1.bf16.msra.mxu0 %v4095_v53  ;;  %2327 = vmatpush1.bf16.msra.mxu1 %v4098_v55  ;;  %v4187_v53 = vld [vmem:[#allocation7 + $0x764] ss:$16 sps:$4 sm:$0xff]   ;;  %v4190_v55 = vld [vmem:[#allocation7 + $0x76c] ss:$16 sps:$4 sm:$0xff]  }
 0x1ee   :  { %2156 = vmatprep.subr.bf16.mxu0 %v4103_v56  ;;  %2328 = vmatprep.subr.bf16.mxu1 %v4106_v57  ;;  %v4185_v56 = vld [vmem:[#allocation7 + $0x760] ss:$16 sps:$4 sm:$0xff]   ;;  %v4188_v57 = vld [vmem:[#allocation7 + $0x768] ss:$16 sps:$4 sm:$0xff]  }
 0x1f1   :  { %2157 = vmatpush1.bf16.msra.mxu0 %v4101_v40  ;;  %2329 = vmatpush1.bf16.msra.mxu1 %v4104_v58  ;;  %v4193_v40 = vld [vmem:[#allocation7 + $0x784] ss:$16 sps:$4 sm:$0xff]   ;;  %v4196_v58 = vld [vmem:[#allocation7 + $0x78c] ss:$16 sps:$4 sm:$0xff]  }
 0x1f2   :  { %2158 = vmatprep.subr.bf16.mxu0 %v4109_v60  ;;  %2330 = vmatprep.subr.bf16.mxu1 %v4112_v61  ;;  %v4191_v60 = vld [vmem:[#allocation7 + $0x780] ss:$16 sps:$4 sm:$0xff]   ;;  %v4194_v61 = vld [vmem:[#allocation7 + $0x788] ss:$16 sps:$4 sm:$0xff]  }
 0x1f5   :  { %2159 = vmatpush1.bf16.msra.mxu0 %v4107_v63  ;;  %2331 = vmatpush1.bf16.msra.mxu1 %v4110_v0  ;;  %v4199_v63 = vld [vmem:[#allocation7 + $0x7a4] ss:$16 sps:$4 sm:$0xff]   ;;  %v4202_v0 = vld [vmem:[#allocation7 + $0x7ac] ss:$16 sps:$4 sm:$0xff]  }
 0x1f6   :  { %2160 = vmatprep.subr.bf16.mxu0 %v4115_v1  ;;  %2332 = vmatprep.subr.bf16.mxu1 %v4118_v2  ;;  %v4197_v1 = vld [vmem:[#allocation7 + $0x7a0] ss:$16 sps:$4 sm:$0xff]   ;;  %v4200_v2 = vld [vmem:[#allocation7 + $0x7a8] ss:$16 sps:$4 sm:$0xff]  }
 0x1f9   :  { %2161 = vmatpush1.bf16.msra.mxu0 %v4113_v3  ;;  %2333 = vmatpush1.bf16.msra.mxu1 %v4116_v4  ;;  %v4205_v3 = vld [vmem:[#allocation7 + $0x7c4] ss:$16 sps:$4 sm:$0xff]   ;;  %v4208_v4 = vld [vmem:[#allocation7 + $0x7cc] ss:$16 sps:$4 sm:$0xff]  }
 0x1fa   :  { %2173 = vmatprep.subr.bf16.mxu0 %v4121_v5  ;;  %2345 = vmatprep.subr.bf16.mxu1 %v4124_v6  ;;  %v4203_v5 = vld [vmem:[#allocation7 + $0x7c0] ss:$16 sps:$4 sm:$0xff]   ;;  %v4206_v6 = vld [vmem:[#allocation7 + $0x7c8] ss:$16 sps:$4 sm:$0xff]  }
 0x1fc   :  { %2163 = vmatmul.mubr.bf16.vlgmr.msra.gmra.mrb[0].mxu0 %v4775_v50  ;;  %2335 = vmatmul.mubr.bf16.vlgmr.msra.gmra.mrb[16].mxu1 %v4775_v50  ;;  %v4142_v50 = vld [vmem:[#allocation7 + $0x66c] ss:$16 sps:$4 sm:$0xff]  }
 0x1fd   :  { %2174 = vmatpush1.bf16.msra.mxu0 %v4119_v7  ;;  %2346 = vmatpush1.bf16.msra.mxu1 %v4122_v8  ;;  %v4211_v7 = vld [vmem:[#allocation7 + $0x7e4] ss:$16 sps:$4 sm:$0xff]   ;;  %v4214_v8 = vld [vmem:[#allocation7 + $0x7ec] ss:$16 sps:$4 sm:$0xff]  }
 0x1fe   :  { %2175 = vmatprep.subr.bf16.mxu0 %v4127_v9  ;;  %2347 = vmatprep.subr.bf16.mxu1 %v4130_v23  ;;  %v4209_v9 = vld [vmem:[#allocation7 + $0x7e0] ss:$16 sps:$4 sm:$0xff]   ;;  %v4212_v23 = vld [vmem:[#allocation7 + $0x7e8] ss:$16 sps:$4 sm:$0xff]  }
 0x1ff   :  { %2205 = vmatprep.mubr.bf16.mxu0 %v4785_v62  ;;  %2377 = vmatprep.mubr.bf16.mxu1 %v4785_v62  ;;  %v4146_v62 = vld [vmem:[#allocation7 + $0x688] ss:$16 sps:$4 sm:$0xff]  }
 0x201   :  { %2176 = vmatpush1.bf16.msra.mxu0 %v4125_v10  ;;  %2348 = vmatpush1.bf16.msra.mxu1 %v4128_v11  ;;  %v4217_v10 = vld [vmem:[#allocation8 + $0x4] ss:$8 sps:$4 sm:$0xff]   ;;  %v4215_v11 = vld [vmem:[#allocation8] ss:$8 sps:$4 sm:$0xff]  }
 0x202   :  { %2177 = vmatprep.subr.bf16.mxu0 %v4133_v12  ;;  %2349 = vmatprep.subr.bf16.mxu1 %v4136_v13  ;;  %v4220_v12 = vld [vmem:[#allocation8 + $0x14] ss:$8 sps:$4 sm:$0xff]   ;;  %v4218_v13 = vld [vmem:[#allocation8 + $0x10] ss:$8 sps:$4 sm:$0xff]  }
 0x205   :  { %2178 = vmatpush1.bf16.msra.mxu0 %v4131_v14  ;;  %2350 = vmatpush1.bf16.msra.mxu1 %v4134_v54  ;;  %v4223_v14 = vld [vmem:[#allocation8 + $0x24] ss:$8 sps:$4 sm:$0xff]   ;;  %v4221_v54 = vld [vmem:[#allocation8 + $0x20] ss:$8 sps:$4 sm:$0xff]  }
 0x206   :  { %2179 = vmatprep.subr.bf16.mxu0 %v4139_v15  ;;  %2351 = vmatprep.subr.bf16.mxu1 %v4142_v50  ;;  %v4226_v15 = vld [vmem:[#allocation8 + $0x34] ss:$8 sps:$4 sm:$0xff]   ;;  %v4224_v50 = vld [vmem:[#allocation8 + $0x30] ss:$8 sps:$4 sm:$0xff]  }
 0x209   :  { %2180 = vmatpush1.bf16.msra.mxu0 %v4137_v16  ;;  %2352 = vmatpush1.bf16.msra.mxu1 %v4140_v17  ;;  %v4229_v16 = vld [vmem:[#allocation8 + $0x44] ss:$8 sps:$4 sm:$0xff]   ;;  %v4227_v17 = vld [vmem:[#allocation8 + $0x40] ss:$8 sps:$4 sm:$0xff]  }
 0x20a   :  { %2181 = vmatprep.subr.bf16.mxu0 %v4145_v18  ;;  %2353 = vmatprep.subr.bf16.mxu1 %v4148_v19  ;;  %v4232_v18 = vld [vmem:[#allocation8 + $0x54] ss:$8 sps:$4 sm:$0xff]   ;;  %v4230_v19 = vld [vmem:[#allocation8 + $0x50] ss:$8 sps:$4 sm:$0xff]  }
 0x20d   :  { %2182 = vmatpush1.bf16.msra.mxu0 %v4143_v20  ;;  %2354 = vmatpush1.bf16.msra.mxu1 %v4146_v62  ;;  %v4233_v20 = vld [vmem:[#allocation8 + $0x60] ss:$8 sps:$4 sm:$0xff]   ;;  %v4238_v62 = vld [vmem:[#allocation8 + $0x74] ss:$8 sps:$4 sm:$0xff]  }
 0x20e   :  { %2183 = vmatprep.subr.bf16.mxu0 %v4151_v21  ;;  %2355 = vmatprep.subr.bf16.mxu1 %v4154_v22  ;;  %v4236_v21 = vld [vmem:[#allocation8 + $0x70] ss:$8 sps:$4 sm:$0xff]   ;;  %v4241_v22 = vld [vmem:[#allocation8 + $0x84] ss:$8 sps:$4 sm:$0xff]  }
 0x211   :  { %2184 = vmatpush1.bf16.msra.mxu0 %v4149_v24  ;;  %2356 = vmatpush1.bf16.msra.mxu1 %v4152_v25  ;;  %v4239_v24 = vld [vmem:[#allocation8 + $0x80] ss:$8 sps:$4 sm:$0xff]   ;;  %v4244_v25 = vld [vmem:[#allocation8 + $0x94] ss:$8 sps:$4 sm:$0xff]  }
 0x212   :  { %2185 = vmatprep.subr.bf16.mxu0 %v4157_v26  ;;  %2357 = vmatprep.subr.bf16.mxu1 %v4160_v27  ;;  %v4242_v26 = vld [vmem:[#allocation8 + $0x90] ss:$8 sps:$4 sm:$0xff]   ;;  %v4247_v27 = vld [vmem:[#allocation8 + $0xa4] ss:$8 sps:$4 sm:$0xff]  }
 0x215   :  { %2186 = vmatpush1.bf16.msra.mxu0 %v4155_v28  ;;  %2358 = vmatpush1.bf16.msra.mxu1 %v4158_v29  ;;  %v4245_v28 = vld [vmem:[#allocation8 + $0xa0] ss:$8 sps:$4 sm:$0xff]   ;;  %v4250_v29 = vld [vmem:[#allocation8 + $0xb4] ss:$8 sps:$4 sm:$0xff]  }
 0x216   :  { %2187 = vmatprep.subr.bf16.mxu0 %v4163_v30  ;;  %2359 = vmatprep.subr.bf16.mxu1 %v4166_v31  ;;  %v4248_v30 = vld [vmem:[#allocation8 + $0xb0] ss:$8 sps:$4 sm:$0xff]   ;;  %v4253_v31 = vld [vmem:[#allocation8 + $0xc4] ss:$8 sps:$4 sm:$0xff]  }
 0x219   :  { %2188 = vmatpush1.bf16.msra.mxu0 %v4161_v32  ;;  %2360 = vmatpush1.bf16.msra.mxu1 %v4164_v33  ;;  %v4251_v32 = vld [vmem:[#allocation8 + $0xc0] ss:$8 sps:$4 sm:$0xff]   ;;  %v4256_v33 = vld [vmem:[#allocation8 + $0xd4] ss:$8 sps:$4 sm:$0xff]  }
 0x21a   :  { %2189 = vmatprep.subr.bf16.mxu0 %v4169_v34  ;;  %2361 = vmatprep.subr.bf16.mxu1 %v4172_v35  ;;  %v4254_v34 = vld [vmem:[#allocation8 + $0xd0] ss:$8 sps:$4 sm:$0xff]   ;;  %v4259_v35 = vld [vmem:[#allocation8 + $0xe4] ss:$8 sps:$4 sm:$0xff]  }
 0x21d   :  { %2190 = vmatpush1.bf16.msra.mxu0 %v4167_v36  ;;  %2362 = vmatpush1.bf16.msra.mxu1 %v4170_v38  ;;  %v4257_v36 = vld [vmem:[#allocation8 + $0xe0] ss:$8 sps:$4 sm:$0xff]   ;;  %v4262_v38 = vld [vmem:[#allocation8 + $0xf4] ss:$8 sps:$4 sm:$0xff]  }
 0x21e   :  { %2191 = vmatprep.subr.bf16.mxu0 %v4175_v39  ;;  %2363 = vmatprep.subr.bf16.mxu1 %v4178_v43  ;;  %v4260_v39 = vld [vmem:[#allocation8 + $0xf0] ss:$8 sps:$4 sm:$0xff]   ;;  %v4265_v43 = vld [vmem:[#allocation8 + $0x104] ss:$8 sps:$4 sm:$0xff]  }
 0x221   :  { %2192 = vmatpush1.bf16.msra.mxu0 %v4173_v44  ;;  %2364 = vmatpush1.bf16.msra.mxu1 %v4176_v45  ;;  %v4311_v44 = vld [vmem:[#allocation10 + $0x40] sm:$0xff]  }
 0x222   :  { %2193 = vmatprep.subr.bf16.mxu0 %v4181_v46  ;;  %2365 = vmatprep.subr.bf16.mxu1 %v4184_v47  ;;  %v4312_v45 = vld [vmem:[#allocation10] sm:$0xff]   ;;  %v4313_v46 = vld [vmem:[#allocation10 + $0x48] sm:$0xff]  }
 0x223   :  { %v4314_v47 = vld [vmem:[#allocation10 + $0x8] sm:$0xff]  }
 0x225   :  { %2194 = vmatpush1.bf16.msra.mxu0 %v4179_v49  ;;  %2366 = vmatpush1.bf16.msra.mxu1 %v4182_v52  ;;  %v4315_v49 = vld [vmem:[#allocation10 + $0x50] sm:$0xff]  }
 0x226   :  { %2195 = vmatprep.subr.bf16.mxu0 %v4187_v53  ;;  %2367 = vmatprep.subr.bf16.mxu1 %v4190_v55  ;;  %v4316_v52 = vld [vmem:[#allocation10 + $0x10] sm:$0xff]   ;;  %v4317_v53 = vld [vmem:[#allocation10 + $0x58] sm:$0xff]  }
 0x227   :  { %v4318_v55 = vld [vmem:[#allocation10 + $0x18] sm:$0xff]  }
 0x229   :  { %2196 = vmatpush1.bf16.msra.mxu0 %v4185_v56  ;;  %2368 = vmatpush1.bf16.msra.mxu1 %v4188_v57  ;;  %v4319_v56 = vld [vmem:[#allocation10 + $0x60] sm:$0xff]  }
 0x22a   :  { %2197 = vmatprep.subr.bf16.mxu0 %v4193_v40  ;;  %2369 = vmatprep.subr.bf16.mxu1 %v4196_v58  ;;  %v4320_v57 = vld [vmem:[#allocation10 + $0x20] sm:$0xff]   ;;  %v4321_v40 = vld [vmem:[#allocation10 + $0x68] sm:$0xff]  }
 0x22b   :  { %v742_v58 = vld [vmem:[#allocation14 + $0x1] ss:$8 sm:$0xf] }
 0x22d   :  { %2198 = vmatpush1.bf16.msra.mxu0 %v4191_v60  ;;  %2370 = vmatpush1.bf16.msra.mxu1 %v4194_v61  ;;  %v747_v60 = vrot.slane %v742_v58, %v4752_v41  ;;  %v755_v61 = vrot.slane %v742_v58, %v170_v48 }
 0x22e   :  { %2199 = vmatprep.subr.bf16.mxu0 %v4199_v63  ;;  %2371 = vmatprep.subr.bf16.mxu1 %v4202_v0  ;;  %v751_v63 = vrot.slane %v742_v58, %v4755_v42  ;;  %v759_v0 = vrot.slane %v742_v58, %v174_v51  ;;  %v4310_v58 = vld [vmem:[#allocation8 + $0x1f4] ss:$8 sps:$4 sm:$0xff]  }
 0x231   :  { %2200 = vmatpush1.bf16.msra.mxu0 %v4197_v1  ;;  %2372 = vmatpush1.bf16.msra.mxu1 %v4200_v2 }
 0x232   :  { %2201 = vmatprep.subr.bf16.mxu0 %v4205_v3  ;;  %2373 = vmatprep.subr.bf16.mxu1 %v4208_v4 }
 0x235   :  { %2202 = vmatpush1.bf16.msra.mxu0 %v4203_v5  ;;  %2374 = vmatpush1.bf16.msra.mxu1 %v4206_v6 }
 0x236   :  { %2203 = vmatprep.subr.bf16.mxu0 %v4211_v7  ;;  %2375 = vmatprep.subr.bf16.mxu1 %v4214_v8 }
 0x239   :  { %2204 = vmatpush1.bf16.msra.mxu0 %v4209_v9  ;;  %2376 = vmatpush1.bf16.msra.mxu1 %v4212_v23 }
 0x23a   :  { %2797 = vmatprep.subr.bf16.mxu0 %v4217_v10  ;;  %3690 = vmatprep.subr.bf16.mxu1 %v4311_v44  ;;  %v4290_v44 = vld [vmem:[#allocation8 + $0x190] ss:$8 sps:$4 sm:$0xff]  }
 0x23c   :  { %2206 = vmatmul.mubr.bf16.vlgmr.msra.gmra.mrb[0].mxu0 %v4783_v59  ;;  %2378 = vmatmul.mubr.bf16.vlgmr.msra.gmra.mrb[16].mxu1 %v4783_v59  ;;  %v4235_v59 = vld [vmem:[#allocation8 + $0x64] ss:$8 sps:$4 sm:$0xff]  }
 0x23d   :  { %2798 = vmatpush1.bf16.msra.mxu0 %v4215_v11  ;;  %3691 = vmatpush3.bf16.msra.mxu1 %v4312_v45  ;;  %v4295_v45 = vld [vmem:[#allocation8 + $0x1a4] ss:$8 sps:$4 sm:$0xff]  }
 0x23e   :  { %2799 = vmatprep.subr.bf16.mxu0 %v4220_v12  ;;  %3692 = vmatprep.subr.bf16.mxu1 %v4313_v46  ;;  %v4293_v46 = vld [vmem:[#allocation8 + $0x1a0] ss:$8 sps:$4 sm:$0xff]  }
 0x241   :  { %2800 = vmatpush1.bf16.msra.mxu0 %v4218_v13  ;;  %3693 = vmatpush3.bf16.msra.mxu1 %v4314_v47  ;;  %v4298_v47 = vld [vmem:[#allocation8 + $0x1b4] ss:$8 sps:$4 sm:$0xff]  }
 0x242   :  { %2801 = vmatprep.subr.bf16.mxu0 %v4223_v14  ;;  %3694 = vmatprep.subr.bf16.mxu1 %v4315_v49  ;;  %v4296_v49 = vld [vmem:[#allocation8 + $0x1b0] ss:$8 sps:$4 sm:$0xff]  }
 0x245   :  { %2802 = vmatpush1.bf16.msra.mxu0 %v4221_v54  ;;  %3695 = vmatpush3.bf16.msra.mxu1 %v4316_v52  ;;  %v4301_v52 = vld [vmem:[#allocation8 + $0x1c4] ss:$8 sps:$4 sm:$0xff]  }
 0x246   :  { %2803 = vmatprep.subr.bf16.mxu0 %v4226_v15  ;;  %3696 = vmatprep.subr.bf16.mxu1 %v4317_v53  ;;  %v4299_v53 = vld [vmem:[#allocation8 + $0x1c0] ss:$8 sps:$4 sm:$0xff]  }
 0x249   :  { %2804 = vmatpush1.bf16.msra.mxu0 %v4224_v50  ;;  %3697 = vmatpush3.bf16.msra.mxu1 %v4318_v55  ;;  %v4304_v55 = vld [vmem:[#allocation8 + $0x1d4] ss:$8 sps:$4 sm:$0xff]  }
 0x24a   :  { %2805 = vmatprep.subr.bf16.mxu0 %v4229_v16  ;;  %3698 = vmatprep.subr.bf16.mxu1 %v4319_v56  ;;  %v4302_v56 = vld [vmem:[#allocation8 + $0x1d0] ss:$8 sps:$4 sm:$0xff]  }
 0x24d   :  { %2806 = vmatpush1.bf16.msra.mxu0 %v4227_v17  ;;  %3699 = vmatpush3.bf16.msra.mxu1 %v4320_v57  ;;  %v4307_v57 = vld [vmem:[#allocation8 + $0x1e4] ss:$8 sps:$4 sm:$0xff]  }
 0x24e   :  { %2807 = vmatprep.subr.bf16.mxu0 %v4232_v18  ;;  %3700 = vmatprep.subr.bf16.mxu1 %v4321_v40  ;;  %v4305_v40 = vld [vmem:[#allocation8 + $0x1e0] ss:$8 sps:$4 sm:$0xff]  }
 0x251   :  { %2808 = vmatpush1.bf16.msra.mxu0 %v4230_v19 }
 0x252   :  { %2809 = vmatprep.subr.bf16.mxu0 %v4235_v59 }
 0x255   :  { %2810 = vmatpush1.bf16.msra.mxu0 %v4233_v20 }
 0x256   :  { %2811 = vmatprep.subr.bf16.mxu0 %v4238_v62 }
 0x259   :  { %2812 = vmatpush1.bf16.msra.mxu0 %v4236_v21  ;;  %v4263_v21 = vld [vmem:[#allocation8 + $0x100] ss:$8 sps:$4 sm:$0xff]  }
 0x25a   :  { %2813 = vmatprep.subr.bf16.mxu0 %v4241_v22  ;;  %v4268_v22 = vld [vmem:[#allocation8 + $0x114] ss:$8 sps:$4 sm:$0xff]  }
 0x25d   :  { %2814 = vmatpush1.bf16.msra.mxu0 %v4239_v24  ;;  %v4266_v24 = vld [vmem:[#allocation8 + $0x110] ss:$8 sps:$4 sm:$0xff]  }
 0x25e   :  { %2815 = vmatprep.subr.bf16.mxu0 %v4244_v25  ;;  %v4271_v25 = vld [vmem:[#allocation8 + $0x124] ss:$8 sps:$4 sm:$0xff]  }
 0x261   :  { %2816 = vmatpush1.bf16.msra.mxu0 %v4242_v26  ;;  %v4269_v26 = vld [vmem:[#allocation8 + $0x120] ss:$8 sps:$4 sm:$0xff]  }
 0x262   :  { %2817 = vmatprep.subr.bf16.mxu0 %v4247_v27  ;;  %v4274_v27 = vld [vmem:[#allocation8 + $0x134] ss:$8 sps:$4 sm:$0xff]  }
 0x265   :  { %2818 = vmatpush1.bf16.msra.mxu0 %v4245_v28  ;;  %v4272_v28 = vld [vmem:[#allocation8 + $0x130] ss:$8 sps:$4 sm:$0xff]  }
 0x266   :  { %2819 = vmatprep.subr.bf16.mxu0 %v4250_v29  ;;  %v4277_v29 = vld [vmem:[#allocation8 + $0x144] ss:$8 sps:$4 sm:$0xff]  }
 0x269   :  { %2820 = vmatpush1.bf16.msra.mxu0 %v4248_v30  ;;  %v4275_v30 = vld [vmem:[#allocation8 + $0x140] ss:$8 sps:$4 sm:$0xff]  }
 0x26a   :  { %2821 = vmatprep.subr.bf16.mxu0 %v4253_v31  ;;  %v4280_v31 = vld [vmem:[#allocation8 + $0x154] ss:$8 sps:$4 sm:$0xff]  }
 0x26d   :  { %2822 = vmatpush1.bf16.msra.mxu0 %v4251_v32  ;;  %v4278_v32 = vld [vmem:[#allocation8 + $0x150] ss:$8 sps:$4 sm:$0xff]  }
 0x26e   :  { %2823 = vmatprep.subr.bf16.mxu0 %v4256_v33  ;;  %v4283_v33 = vld [vmem:[#allocation8 + $0x164] ss:$8 sps:$4 sm:$0xff]  }
 0x271   :  { %2824 = vmatpush1.bf16.msra.mxu0 %v4254_v34  ;;  %v4281_v34 = vld [vmem:[#allocation8 + $0x160] ss:$8 sps:$4 sm:$0xff]  }
 0x272   :  { %2825 = vmatprep.subr.bf16.mxu0 %v4259_v35  ;;  %v4286_v35 = vld [vmem:[#allocation8 + $0x174] ss:$8 sps:$4 sm:$0xff]  }
 0x275   :  { %2826 = vmatpush1.bf16.msra.mxu0 %v4257_v36  ;;  %v4284_v36 = vld [vmem:[#allocation8 + $0x170] ss:$8 sps:$4 sm:$0xff]  }
 0x276   :  { %2827 = vmatprep.subr.bf16.mxu0 %v4262_v38  ;;  %v4289_v38 = vld [vmem:[#allocation8 + $0x184] ss:$8 sps:$4 sm:$0xff]  }
 0x279   :  { %2828 = vmatpush1.bf16.msra.mxu0 %v4260_v39  ;;  %v4287_v39 = vld [vmem:[#allocation8 + $0x180] ss:$8 sps:$4 sm:$0xff]  }
 0x27a   :  { %2840 = vmatprep.subr.bf16.mxu0 %v4265_v43  ;;  %v4292_v43 = vld [vmem:[#allocation8 + $0x194] ss:$8 sps:$4 sm:$0xff]  }
 0x30f   :  { %v2207_v1 = vpop.f32.mrb[0].mxu0  ;;  %v2379_v2 = vpop.f32.mrb[16].mxu1 }
 0x310   :  { %v3770_v3 = vadd.f32 %v2207_v1, %v747_v60  ;;  %v3774_v4 = vadd.f32 %v2379_v2, %v755_v61  ;;  %v2209_v5 = vpop.f32.mrb[1].mxu0  ;;  %v2381_v6 = vpop.f32.mrb[17].mxu1  ;;  %v4325_v1 = vld [vmem:[#allocation10 + $0x78] sm:$0xff]  }
 0x311   :  { %v3771_v7 = vadd.f32 %v2209_v5, %v751_v63  ;;  %v3775_v8 = vadd.f32 %v2381_v6, %v759_v0  ;;  %v2211_v9 = vpop.f32.mrb[2].mxu0  ;;  %v2383_v23 = vpop.f32.mrb[18].mxu1  ;;  %v4326_v2 = vld [vmem:[#allocation10 + $0x38] sm:$0xff]  }
 0x312   :  { %v3772_v10 = vadd.f32 %v2211_v9, %v747_v60  ;;  %v3776_v11 = vadd.f32 %v2383_v23, %v755_v61  ;;  %v2213_v12 = vpop.f32.mrb[3].mxu0  ;;  %v2385_v13 = vpop.f32.mrb[19].mxu1  ;;  %v2388_v54 = vmax.f32 %v3770_v3, 0.0  ;;  %v2390_v15 = vmax.f32 %v3774_v4, 0.0  ;;  %v4308_v60 = vld [vmem:[#allocation8 + $0x1f0] ss:$8 sps:$4 sm:$0xff]  }
 0x313   :  { %v3773_v48 = vadd.f32 %v2213_v12, %v751_v63  ;;  %v3777_v14 = vadd.f32 %v2385_v13, %v759_v0  ;;  %v2389_v50 = vmax.f32 %v3771_v7, 0.0  ;;  %v2391_v16 = vmax.f32 %v3775_v8, 0.0  ;;  %v4322_v61 = vld [vmem:[#allocation10 + $0x28] sm:$0xff]   ;;  %v4323_v63 = vld [vmem:[#allocation10 + $0x70] sm:$0xff]  }
 0x314   :  { %v2392_v37 = vmax.f32 %v3772_v10, 0.0  ;;  %v2394_v51 = vmax.f32 %v3776_v11, 0.0  ;;  %3701 = vmatpush3.bf16.msra.mxu1 %v4322_v61  ;;  %v4324_v0 = vld [vmem:[#allocation10 + $0x30] sm:$0xff]   ;;  %v4570_v3 = vmov 0.0  }
 0x315   :  { %v2393_v17 = vmax.f32 %v3773_v48, 0.0  ;;  %v2395_v18 = vmax.f32 %v3777_v14, 0.0  ;;  %3702 = vmatprep.subr.bf16.mxu1 %v4323_v63  ;;  %v2465_v4 = vld [vmem:[#allocation14 + $0x2] ss:$8 sm:$0x3] }
 0x316   :  { %v2396_v19 = vpack.c.bf16 %v2392_v37, %v2388_v54  ;;  %v4803_v59 = vpack.c.bf16 %v2394_v51, %v2390_v15  ;;  %v2470_v5 = vrot.slane %v2465_v4, %v4752_v41  ;;  %v2474_v6 = vrot.slane %v2465_v4, %v4755_v42  ;;  %v4328_v41 = vld [vmem:[#allocation11 + $0x8] sm:$0xff]   ;;  %v4329_v42 = vld [vmem:[#allocation11 + $0x10] sm:$0xff]  }
 0x317   :  { %v2397_v20 = vpack.c.bf16 %v2393_v17, %v2389_v50  ;;  %v2399_v62 = vpack.c.bf16 %v2395_v18, %v2391_v16  ;;  %v4327_v50 = vld [vmem:[#allocation11] sm:$0xff]   ;;  %v4330_v16 = vld [vmem:[#allocation11 + $0x18] sm:$0xff]   ;;  %v4332_v18 = vld [vmem:[#allocation11 + $0x28] sm:$0xff]  }
 0x318   :  { %3703 = vmatpush3.bf16.msra.mxu1 %v4324_v0  ;;  %v4331_v17 = vld [vmem:[#allocation11 + $0x20] sm:$0xff]  }
 0x319   :  { %2829 = vmatprep.mubr.bf16.mxu0 %v2397_v20  ;;  %3704 = vmatprep.subr.bf16.mxu1 %v4325_v1 }
 0x31a   :  { %2830 = vmatmul.mubr.bf16.vlgmr.msra.gmra.mrb[4].mxu0 %v2396_v19  ;;  %v4333_v19 = vld [vmem:[#allocation11 + $0x30] sm:$0xff]  }
 0x31b   :  { %2841 = vmatpush1.bf16.msra.mxu0 %v4263_v21  ;;  %2872 = vmatprep.mubr.bf16.mxu0 %v2399_v62  ;;  %v2921_v62 = vld [vmem:[#allocation14 + $0x3] ss:$0 sm:$0xff] }
 0x31c   :  { %2842 = vmatprep.subr.bf16.mxu0 %v4268_v22  ;;  %3705 = vmatpush3.bf16.msra.mxu1 %v4326_v2 }
 0x31d   :  { %3730 = vmatprep.subr.bf16.mxu1 %v4570_v3 }
 0x31f   :  { %2843 = vmatpush1.bf16.msra.mxu0 %v4266_v24 }
 0x320   :  { %2844 = vmatprep.subr.bf16.mxu0 %v4271_v25 }
 0x323   :  { %2845 = vmatpush1.bf16.msra.mxu0 %v4269_v26 }
 0x324   :  { %2846 = vmatprep.subr.bf16.mxu0 %v4274_v27 }
 0x327   :  { %2847 = vmatpush1.bf16.msra.mxu0 %v4272_v28 }
 0x328   :  { %2848 = vmatprep.subr.bf16.mxu0 %v4277_v29 }
 0x32b   :  { %2849 = vmatpush1.bf16.msra.mxu0 %v4275_v30 }
 0x32c   :  { %2850 = vmatprep.subr.bf16.mxu0 %v4280_v31  ;;  %v4335_v31 = vld [vmem:[#allocation13] sm:$0xff]  }
 0x32f   :  { %2851 = vmatpush1.bf16.msra.mxu0 %v4278_v32 }
 0x330   :  { %2852 = vmatprep.subr.bf16.mxu0 %v4283_v33  ;;  %v4336_v33 = vld [vmem:[#allocation13 + $0x8] sm:$0xff]  }
 0x333   :  { %2853 = vmatpush1.bf16.msra.mxu0 %v4281_v34  ;;  %v4337_v34 = vld [vmem:[#allocation13 + $0x10] sm:$0xff]  }
 0x334   :  { %2854 = vmatprep.subr.bf16.mxu0 %v4286_v35  ;;  %v4338_v35 = vld [vmem:[#allocation13 + $0x18] sm:$0xff]  }
 0x337   :  { %2855 = vmatpush1.bf16.msra.mxu0 %v4284_v36  ;;  %v4339_v36 = vld [vmem:[#allocation13 + $0x20] sm:$0xff]  }
 0x338   :  { %2856 = vmatprep.subr.bf16.mxu0 %v4289_v38  ;;  %v4340_v38 = vld [vmem:[#allocation13 + $0x28] sm:$0xff]  }
 0x33b   :  { %2857 = vmatpush1.bf16.msra.mxu0 %v4287_v39  ;;  %v4341_v39 = vld [vmem:[#allocation13 + $0x30] sm:$0xff]  }
 0x33c   :  { %2858 = vmatprep.subr.bf16.mxu0 %v4292_v43  ;;  %v4342_v43 = vld [vmem:[#allocation13 + $0x38] sm:$0xff]  }
 0x33f   :  { %2859 = vmatpush1.bf16.msra.mxu0 %v4290_v44  ;;  %v3078_v44 = vld [vmem:[#allocation14 + $0x4] ss:$0 sm:$0xff] }
 0x340   :  { %2860 = vmatprep.subr.bf16.mxu0 %v4295_v45 }
 0x343   :  { %2861 = vmatpush1.bf16.msra.mxu0 %v4293_v46 }
 0x344   :  { %2862 = vmatprep.subr.bf16.mxu0 %v4298_v47 }
 0x347   :  { %2863 = vmatpush1.bf16.msra.mxu0 %v4296_v49 }
 0x348   :  { %2864 = vmatprep.subr.bf16.mxu0 %v4301_v52 }
 0x34b   :  { %2865 = vmatpush1.bf16.msra.mxu0 %v4299_v53 }
 0x34c   :  { %2866 = vmatprep.subr.bf16.mxu0 %v4304_v55 }
 0x34f   :  { %2867 = vmatpush1.bf16.msra.mxu0 %v4302_v56 }
 0x350   :  { %2868 = vmatprep.subr.bf16.mxu0 %v4307_v57 }
 0x353   :  { %2869 = vmatpush1.bf16.msra.mxu0 %v4305_v40  ;;  %v3187_v40 = vld [vmem:[#allocation14 + $0x5] ss:$0 sm:$0xff] }
 0x354   :  { %2870 = vmatprep.subr.bf16.mxu0 %v4310_v58 }
 0x357   :  { %2871 = vmatpush1.bf16.msra.mxu0 %v4308_v60 }
 0x35a   :  { %2873 = vmatmul.mubr.bf16.vlgmr.msra.gmra.mrb[4].mxu0 %v4803_v59  ;;  %v4334_v59 = vld [vmem:[#allocation11 + $0x38] sm:$0xff]  }
 0x42d   :  { %v2874_v7 = vpop.f32.mrb[4].mxu0 }
 0x42e   :  { %v3778_v8 = vadd.f32 %v2874_v7, %v2470_v5  ;;  %v2876_v9 = vpop.f32.mrb[5].mxu0 }
 0x42f   :  { %v3779_v23 = vadd.f32 %v2876_v9, %v2474_v6  ;;  %v2878_v10 = vpop.f32.mrb[6].mxu0 }
 0x430   :  { %v3780_v11 = vadd.f32 %v2878_v10, %v2470_v5  ;;  %v2880_v12 = vpop.f32.mrb[7].mxu0  ;;  %v2883_v48 = vmax.f32 %v3778_v8, 0.0 }
 0x431   :  { %v3781_v13 = vadd.f32 %v2880_v12, %v2474_v6  ;;  %v2884_v54 = vmax.f32 %v3779_v23, 0.0 }
 0x432   :  { %v2885_v14 = vmax.f32 %v3780_v11, 0.0 }
 0x433   :  { %v2886_v15 = vmax.f32 %v3781_v13, 0.0 }
 0x434   :  { %v2887_v37 = vpack.c.bf16 %v2885_v14, %v2883_v48 }
 0x435   :  { %v2888_v51 = vpack.c.bf16 %v2886_v15, %v2884_v54 }
 0x437   :  { %3050 = vmatprep.mubr.bf16.mxu1 %v2888_v51 }
 0x438   :  { %3051 = vmatmul.mubr.bf16.vlgmr.msra.gmra.mrb[20].mxu1 %v2887_v37 }
 0x439   :  { %3731 = vmatpush3.bf16.msra.mxu1 %v4327_v50  ;;  %3746 = vmatprep.mubr.msk.bf16.mxu1 %vm4571_vm1, %v4570_v3 }
 0x43a   :  { %3732 = vmatprep.subr.bf16.mxu1 %v4570_v3 }
 0x43d   :  { %3733 = vmatpush3.bf16.msra.mxu1 %v4328_v41 }
 0x43e   :  { %3734 = vmatprep.subr.bf16.mxu1 %v4570_v3 }
 0x441   :  { %3735 = vmatpush3.bf16.msra.mxu1 %v4329_v42 }
 0x442   :  { %3736 = vmatprep.subr.bf16.mxu1 %v4570_v3 }
 0x445   :  { %3737 = vmatpush3.bf16.msra.mxu1 %v4330_v16 }
 0x446   :  { %3738 = vmatprep.subr.bf16.mxu1 %v4570_v3 }
 0x449   :  { %3739 = vmatpush3.bf16.msra.mxu1 %v4331_v17 }
 0x44a   :  { %3740 = vmatprep.subr.bf16.mxu1 %v4570_v3 }
 0x44d   :  { %3741 = vmatpush3.bf16.msra.mxu1 %v4332_v18 }
 0x44e   :  { %3742 = vmatprep.subr.bf16.mxu1 %v4570_v3 }
 0x451   :  { %3743 = vmatpush3.bf16.msra.mxu1 %v4333_v19 }
 0x452   :  { %3744 = vmatprep.subr.bf16.mxu1 %v4570_v3 }
 0x455   :  { %3745 = vmatpush3.bf16.msra.mxu1 %v4334_v59 }
 0x456   :  { %3750 = vmatprep.subr.bf16.mxu1 %v4570_v3 }
 0x50b   :  { %v3706_v20 = vpop.f32.mrb[20].mxu1 }
 0x50c   :  { %v3707_v21 = vpop.f32.mrb[21].mxu1 }
 0x50d   :  { %v3708_v22 = vadd.f32 %v3707_v21, %v3706_v20  ;;  %v3709_v24 = vpop.f32.mrb[22].mxu1 }
 0x50e   :  { %v3710_v25 = vpop.f32.mrb[23].mxu1 }
 0x50f   :  { %v3053_v26 = vadd.f32 %v3708_v22, %v2921_v62  ;;  %v3711_v27 = vadd.f32 %v3710_v25, %v3709_v24 }
 0x511   :  { %v3056_v28 = vadd.f32 %v3711_v27, %v2921_v62  ;;  %v3059_v29 = vmax.f32 %v3053_v26, 0.0 }
 0x513   :  { %v3060_v30 = vmax.f32 %v3056_v28, 0.0 }
 0x515   :  { %v3061_v32 = vpack.c.bf16 %v3060_v30, %v3059_v29 }
 0x517   :  { %3747 = vmatmul.mubr.bf16.vlgmr.msra.gmra.mrb[24].mxu1 %v3061_v32 }
 0x518   :  { %3751 = vmatpush3.bf16.msra.mxu1 %v4335_v31  ;;  %3766 = vmatprep.mubr.msk.bf16.mxu1 %vm4571_vm1, %v4570_v3 }
 0x519   :  { %3752 = vmatprep.subr.bf16.mxu1 %v4570_v3 }
 0x51c   :  { %3753 = vmatpush3.bf16.msra.mxu1 %v4336_v33 }
 0x51d   :  { %3754 = vmatprep.subr.bf16.mxu1 %v4570_v3 }
 0x520   :  { %3755 = vmatpush3.bf16.msra.mxu1 %v4337_v34 }
 0x521   :  { %3756 = vmatprep.subr.bf16.mxu1 %v4570_v3 }
 0x524   :  { %3757 = vmatpush3.bf16.msra.mxu1 %v4338_v35 }
 0x525   :  { %3758 = vmatprep.subr.bf16.mxu1 %v4570_v3 }
 0x528   :  { %3759 = vmatpush3.bf16.msra.mxu1 %v4339_v36 }
 0x529   :  { %3760 = vmatprep.subr.bf16.mxu1 %v4570_v3 }
 0x52c   :  { %3761 = vmatpush3.bf16.msra.mxu1 %v4340_v38 }
 0x52d   :  { %3762 = vmatprep.subr.bf16.mxu1 %v4570_v3 }
 0x530   :  { %3763 = vmatpush3.bf16.msra.mxu1 %v4341_v39 }
 0x531   :  { %3764 = vmatprep.subr.bf16.mxu1 %v4570_v3 }
 0x534   :  { %3765 = vmatpush3.bf16.msra.mxu1 %v4342_v43 }
 0x5ea   :  { %v3161_v45 = vpop.f32.mrb[24].mxu1 }
 0x5eb   :  { %v3162_v46 = vadd.f32 %v3161_v45, %v3078_v44  ;;  %v3748_v47 = vpop.f32.mrb[25].mxu1 }
 0x5ec   :  { %v3164_v49 = vpop.f32.mrb[26].mxu1 }
 0x5ed   :  { %v3165_v52 = vadd.f32 %v3164_v49, %v3078_v44  ;;  %v3749_v53 = vpop.f32.mrb[27].mxu1  ;;  %v3168_v55 = vmax.f32 %v3162_v46, 0.0 }
 0x5ef   :  { %v3169_v56 = vmax.f32 %v3165_v52, 0.0 }
 0x5f1   :  { %v3170_v57 = vpack.c.bf16 %v3169_v56, %v3168_v55 }
 0x5f3   :  { %3767 = vmatmul.mubr.bf16.vlgmr.msra.gmra.mrb[28].mxu1 %v3170_v57 }
 0x6c6   :  { %v3270_v58 = vpop.f32.mrb[28].mxu1 }
 0x6c7   :  { %v3768_v60 = vpop.f32.mrb[29].mxu1  ;;  %v3271_v63 = vadd.f32 %v3270_v58, %v3187_v40 }
 0x6c8   :  { %v3273_v61 = vpop.f32.mrb[30].mxu1 }
 0x6c9   :  { %v3274_v0 = vadd.f32 %v3273_v61, %v3187_v40  ;;  %v3769_v1 = vpop.f32.mrb[31].mxu1 }
 0x6cb   :  { %v3688_v2 = vpack.c.bf16 %v3274_v0, %v3271_v63 }
 0x6cd   :  { %3689 = vst [vmem:[#allocation16] sm:$0xff] %v3688_v2  }
 0x6ce   :  { %4530 = shalt.err (!%p4527_p12)
}
 0x6cf   :  { %s4531_s14 = scalar_lea.hbm %s4851_s8, 128 }
 0x6d0   :  { %p4532_p13 = scmp.ne.s32.totalorder %s4851_s8, %s4531_s14  ;;  %p4535_p0 = scmp.lt.u32.totalorder %s4531_s14, %s4851_s8 }
 0x6d2   :  { %p4537_p1 = pnand %p4535_p0, %p4532_p13 }
 0x6d4   :  { %4540 = shalt.err (!%p4537_p1)
}
 0x6d5   :  { %3298 = dma.vmem_to_hbm [thread:$0]  %s3293_s10, 128, %s4851_s8, [#allocation4], %s4561_s20, %s4561_s20, %s4562_s22  }
 0x6d6   :  { %4551 = dma.done.wait [#allocation4], 128  }
 0x6d7   :  { %4552 = vsyncadd [#allocation4], 4294967168 }
 0x6d8   :  { %3302 = vsyncpa [#allocation3], 1 }
 0x6d9   :  { %3303 = vsyncpa [#allocation6], 1 }
 0x6da   :  { %3304 = vsyncpa [#allocation9], 1 }
 0x6db   :  { %3305 = vsyncpa [#allocation12], 1 }
 0x6dc   :  { %3306 = vsyncpa [#allocation15], 1 }
 0x6dd   :  { %3307 = vsyncpa [#allocation4], 1 }

</bundles_post_ra>
